<compile_context>
chip_gen: v5e
topology: v5e:2x2
jax: 0.10.0
libtpu: 0.0.40
codegen_flags: <defaults>
</compile_context>

<pallas_src>
import numpy as np
import jax
import jax.numpy as jnp
from jax.experimental import pallas as pl
from jax.experimental.pallas import tpu as pltpu

# ---- static configuration (small, TPU-tile friendly) ----
BATCH = 8          # batch size
NUM_COLS = 8       # numerical feature columns
CHANNELS = 32      # hidden channel dimensionality
NUM_PROMPTS = 8    # number of prompt columns
OUT_CHANNELS = 8   # output channels
NUM_LAYERS = 2     # number of TromptConv layers
NUM_GROUPS = 2     # GroupNorm groups inside TromptConv
EPS = 1e-5

# ---- packed parameter layout (all sections start on 8-row boundaries) ----
# per-layer block (repeated NUM_LAYERS times, LP_ROWS rows each):
R_ENC_W = 0      # [NUM_COLS, C]   LinearEncoder weight
R_ENC_B = 8      # [NUM_COLS, C]   LinearEncoder bias
R_LN_W = 16      # row 16          encoder LayerNorm weight  [1, C]
R_LN_B = 24      # row 24          encoder LayerNorm bias    [1, C]
R_EMB = 32       # [NUM_COLS, C]   column embeddings
R_LIN_W = 40     # [C, C]          prompt dense weight (rows 40..71)
R_LIN_B = 72     # row 72          prompt dense bias          [1, C]
R_EXP0 = 80      # [P, C]          softmax(expand_w)[:, 0]  (lane-replicated, OFFLINE softmax)
R_EXP1 = 88      # [P, C]          softmax(expand_w)[:, 1]  (lane-replicated, OFFLINE softmax)
R_GN_W = 96      # [N, C]          GroupNorm weight per column (lane-replicated)
R_GN_B = 104     # [N, C]          GroupNorm bias per column (lane-replicated)
LP_ROWS = 112

# layer-invariant block (appended after the per-layer blocks):
G_XP = 0         # [P, C]          x_prompt parameter
G_AW = 8         # row 8           decoder attention weight   [1, C]
G_AB = 16        # row 16          decoder attention bias (replicated)
G_DW = 24        # [C, C]          decoder output weight (rows 24..55, lanes >= OUT zero)
G_DB = 56        # row 56          decoder output bias (lanes >= OUT zero)
GP_ROWS = 64

GLOB_OFF = NUM_LAYERS * LP_ROWS           # 224
TOTAL_ROWS = GLOB_OFF + GP_ROWS           # 288


# ---------- shared math helpers (pure-JAX reference path) ----------
def _softmax(x, axis):
    m = jnp.max(x, axis=axis, keepdims=True)
    e = jnp.exp(x - m)
    return e / jnp.sum(e, axis=axis, keepdims=True)


def _layer_norm(x, weight, bias):
    mu = jnp.mean(x, axis=-1, keepdims=True)
    var = jnp.mean((x - mu) ** 2, axis=-1, keepdims=True)
    return (x - mu) * jax.lax.rsqrt(var + EPS) * weight[None] + bias[None]


def _group_norm(x, weight, bias):
    # x: [B, NUM_COLS, C]; GroupNorm(NUM_GROUPS, num_channels=NUM_COLS)
    cols_per_group = NUM_COLS // NUM_GROUPS
    parts = []
    for g in range(NUM_GROUPS):
        xg = x[:, g * cols_per_group:(g + 1) * cols_per_group, :]
        mu = jnp.mean(xg, axis=(1, 2), keepdims=True)
        var = jnp.mean((xg - mu) ** 2, axis=(1, 2), keepdims=True)
        parts.append((xg - mu) * jax.lax.rsqrt(var + EPS))
    xn = jnp.concatenate(parts, axis=1)
    return xn * weight[None, :, :] + bias[None, :, :]


def _encode_layer(x_num, enc_w, enc_b, ln_w, ln_b):
    feat = x_num[:, :, None] * enc_w[None, :, :] + enc_b[None, :, :]
    feat = jnp.maximum(feat, 0.0)
    return _layer_norm(feat, ln_w, ln_b)


def _trompt_conv(feat, x_prompt, emb_col, lin_w, lin_b, expand_w, gn_w, gn_b):
    b = feat.shape[0]
    xp2 = x_prompt.reshape(b * NUM_PROMPTS, CHANNELS)
    xp_dense = jnp.maximum(
        jnp.dot(xp2, lin_w, preferred_element_type=jnp.float32) + lin_b, 0.0)
    xp_dense = xp_dense.reshape(b, NUM_PROMPTS, CHANNELS)
    w_se = _softmax(expand_w, axis=-1)                       # [P, 2]
    x_p = w_se[None, :, 0:1] * x_prompt + w_se[None, :, 1:2] * xp_dense
    m = jax.lax.dot_general(
        x_p.reshape(b * NUM_PROMPTS, CHANNELS), emb_col,
        (((1,), (1,)), ((), ())), preferred_element_type=jnp.float32)
    m = _softmax(m.reshape(b, NUM_PROMPTS, NUM_COLS), axis=-1)
    x_col = _group_norm(feat + emb_col[None, :, :], gn_w, gn_b)
    return jnp.einsum('bpn,bnc->bpc', m, x_col,
                      preferred_element_type=jnp.float32)


def _trompt_decode(x_prompt, attn_w, attn_b, out_w, out_b):
    b = x_prompt.shape[0]
    xp2 = x_prompt.reshape(b * NUM_PROMPTS, CHANNELS)
    a = jnp.dot(xp2, attn_w, preferred_element_type=jnp.float32) + attn_b
    a = _softmax(a.reshape(b, NUM_PROMPTS, 1), axis=1)
    pooled = jnp.sum(a * x_prompt, axis=1)
    return jnp.dot(pooled, out_w, preferred_element_type=jnp.float32) + out_b


# ------------------------------- Pallas kernel -------------------------------
def _fast_recip(x):
    # EUP approximate reciprocal + one Newton-Raphson step (~f32-accurate);
    # keeps the divide off the VALU slot.
    r = pl.reciprocal(x, approx=True)
    return r * (2.0 - x * r)


def _trompt_kernel(x_num_ref, p_ref, out_ref):
    B, N, C, P, O = BATCH, NUM_COLS, CHANNELS, NUM_PROMPTS, OUT_CHANNELS
    f32 = jnp.float32
    cg = N // NUM_GROUPS
    inv_cnt = 1.0 / (cg * C)

    # x_num lane-broadcast once for the whole kernel (single XLU broadcast).
    x_bc = jnp.broadcast_to(x_num_ref[...], (B, N, C))           # [B, N, C]

    # layer-invariant decoder params (full 32-lane padded MXU operands).
    g0 = GLOB_OFF
    attn_w3 = p_ref[g0 + G_AW:g0 + G_AW + 1, :][None, :, :]      # [1, 1, C]
    attn_b3 = p_ref[g0 + G_AB:g0 + G_AB + 1, 0:1][None, :, :]    # [1, 1, 1]
    dec_w = p_ref[g0 + G_DW:g0 + G_DW + C, :]                    # [C, C] (lanes >= O zero)
    dec_b = p_ref[g0 + G_DB:g0 + G_DB + 1, :]                    # [1, C] (lanes >= O zero)

    # prompt state broadcast over the batch, carried across unrolled layers.
    prompt3 = jnp.broadcast_to(
        p_ref[g0 + G_XP:g0 + G_XP + P, :][None, :, :], (B, P, C))

    col_idx = jax.lax.broadcasted_iota(jnp.int32, (1, N, 1), 1)

    pooled_sum = jnp.zeros((B, C), f32)

    for layer in range(NUM_LAYERS):          # static unroll: zero grid overhead
        b0 = layer * LP_ROWS

        # ---- StypeWiseFeatureEncoder: LinearEncoder + ReLU + LayerNorm(C) ----
        enc_w = p_ref[b0 + R_ENC_W:b0 + R_ENC_W + N, :]          # [N, C]
        enc_b = p_ref[b0 + R_ENC_B:b0 + R_ENC_B + N, :]
        ln_w = p_ref[b0 + R_LN_W:b0 + R_LN_W + 1, :]             # [1, C]
        ln_b = p_ref[b0 + R_LN_B:b0 + R_LN_B + 1, :]
        feat = jnp.maximum(x_bc * enc_w[None, :, :] + enc_b[None, :, :], 0.0)
        mu = jnp.mean(feat, axis=-1, keepdims=True)
        var = jnp.mean((feat - mu) ** 2, axis=-1, keepdims=True)
        feat = ((feat - mu) * jax.lax.rsqrt(var + EPS)
                * ln_w[None, :, :] + ln_b[None, :, :])

        # ---- fuse feature + column embeddings, two-stage GroupNorm ----
        emb_col = p_ref[b0 + R_EMB:b0 + R_EMB + N, :]            # [N, C]
        gn_w = p_ref[b0 + R_GN_W:b0 + R_GN_W + N, :]
        gn_b = p_ref[b0 + R_GN_B:b0 + R_GN_B + N, :]
        y = feat + emb_col[None, :, :]                           # [B, N, C]
        # stage 1: one lane-reduce to per-(batch, column) sums
        s_col = jnp.sum(y, axis=-1, keepdims=True)               # [B, N, 1]
        # stage 2: group means on the tiny [B, N, 1] tensor
        mu_col = jnp.zeros((B, N, 1), f32)
        for g in range(NUM_GROUPS):
            mk = jnp.logical_and(col_idx >= g * cg, col_idx < (g + 1) * cg)
            gmean = jnp.sum(jnp.where(mk, s_col, 0.0), axis=1,
                            keepdims=True) * inv_cnt             # [B, 1, 1]
            mu_col = mu_col + jnp.where(mk, gmean, 0.0)
        d = y - mu_col
        ss_col = jnp.sum(d * d, axis=-1, keepdims=True)          # [B, N, 1]
        var_col = jnp.zeros((B, N, 1), f32)
        for g in range(NUM_GROUPS):
            mk = jnp.logical_and(col_idx >= g * cg, col_idx < (g + 1) * cg)
            gvar = jnp.sum(jnp.where(mk, ss_col, 0.0), axis=1,
                           keepdims=True) * inv_cnt
            var_col = var_col + jnp.where(mk, gvar, 0.0)
        x_col = (d * jax.lax.rsqrt(var_col + EPS)
                 * gn_w[None, :, :] + gn_b[None, :, :])          # [B, N, C]

        # ---- prompt dense + ReLU: one MXU matmul on the flat [B*P, C] view ----
        lin_w = p_ref[b0 + R_LIN_W:b0 + R_LIN_W + C, :]          # [C, C]
        lin_b = p_ref[b0 + R_LIN_B:b0 + R_LIN_B + 1, :]          # [1, C]
        xp2 = prompt3.reshape(B * P, C)                          # tile-aligned merge (P == 8)
        dense2 = jnp.maximum(
            jnp.dot(xp2, lin_w, preferred_element_type=f32) + lin_b, 0.0)
        dense3 = dense2.reshape(B, P, C)

        # ---- mix previous prompts and dense(prompts) with OFFLINE-softmaxed weights ----
        w0 = p_ref[b0 + R_EXP0:b0 + R_EXP0 + P, :]               # [P, C] lane-replicated
        w1 = p_ref[b0 + R_EXP1:b0 + R_EXP1 + P, :]
        mixed3 = w0[None, :, :] * prompt3 + w1[None, :, :] * dense3

        # ---- feature importance: softmax over columns of (prompt . column_emb) ----
        m2 = jax.lax.dot_general(mixed3.reshape(B * P, C), emb_col,
                                 (((1,), (1,)), ((), ())),
                                 preferred_element_type=f32)     # [B*P, N]
        m2 = jnp.exp(m2 - jnp.max(m2, axis=-1, keepdims=True))
        m2 = m2 * _fast_recip(jnp.sum(m2, axis=-1, keepdims=True))
        m3 = m2.reshape(B, P, N)

        # ---- importance-weighted combination on the (idle) MXU: batched matmul ----
        new3 = jnp.einsum('bpn,bnc->bpc', m3, x_col,
                          preferred_element_type=f32)            # [B, P, C]
        prompt3 = new3

        # ---- TromptDecoder attention pooling (projection hoisted out of loop) ----
        a = jnp.sum(new3 * attn_w3, axis=-1, keepdims=True) + attn_b3   # [B, P, 1]
        a = jnp.exp(a - jnp.max(a, axis=1, keepdims=True))
        a = a * _fast_recip(jnp.sum(a, axis=1, keepdims=True))
        pooled_sum = pooled_sum + jnp.sum(a * new3, axis=1)              # [B, C]

    # single decoder projection of the layer-mean pooled vector, written once.
    pooled_mean = pooled_sum * (1.0 / NUM_LAYERS)
    res = jnp.dot(pooled_mean, dec_w, preferred_element_type=jnp.float32) + dec_b
    out_ref[...] = res[:, :O]


@jax.jit
def trompt_forward(x_num, packed_params):
    vmem = pl.BlockSpec(memory_space=pltpu.MemorySpace.VMEM)
    return pl.pallas_call(
        _trompt_kernel,
        out_shape=jax.ShapeDtypeStruct((BATCH, OUT_CHANNELS), jnp.float32),
        in_specs=[vmem, vmem],
        out_specs=vmem,
    )(x_num[:, :, None], packed_params)


# ----------------------- parameter packing (one-time, offline) -----------------------
def pack_params(params):
    L, N, C, P = NUM_LAYERS, NUM_COLS, CHANNELS, NUM_PROMPTS

    def pad_rows_l(x, rows):   # [L, r, C] -> [L, rows, C]
        return jnp.concatenate(
            [x, jnp.zeros((L, rows - x.shape[1], C), jnp.float32)], axis=1)

    def rep_lanes(x):          # [..., 1] -> [..., C]
        return jnp.broadcast_to(x, x.shape[:-1] + (C,))

    # expand_w softmax is parameter-only math -> done offline.
    w_se = _softmax(params["expand_w"], axis=-1)               # [L, P, 2]

    layer_blocks = [
        params["enc_w"],                                   # rows   0..7
        params["enc_b"],                                   # rows   8..15
        pad_rows_l(params["enc_ln_w"], 8),                 # rows  16..23
        pad_rows_l(params["enc_ln_b"], 8),                 # rows  24..31
        params["emb_col"],                                 # rows  32..39
        params["lin_w"],                                   # rows  40..71
        pad_rows_l(params["lin_b"], 8),                    # rows  72..79
        rep_lanes(w_se[:, :, 0:1]),                        # rows  80..87
        rep_lanes(w_se[:, :, 1:2]),                        # rows  88..95
        rep_lanes(params["gn_w"]),                         # rows  96..103
        rep_lanes(params["gn_b"]),                         # rows 104..111
    ]
    layer_params = jnp.concatenate(layer_blocks, axis=1).astype(jnp.float32)
    assert layer_params.shape == (L, LP_ROWS, C)

    def pad_rows(x, rows):     # [r, C] -> [rows, C]
        return jnp.concatenate(
            [x, jnp.zeros((rows - x.shape[0], x.shape[1]), jnp.float32)], axis=0)

    def pad_lanes(x):          # [r, w] -> [r, C]
        return jnp.concatenate(
            [x, jnp.zeros((x.shape[0], C - x.shape[1]), jnp.float32)], axis=1)

    glob_blocks = [
        params["x_prompt"],                                           # rows  0..7
        pad_rows(params["dec_attn_w"].T, 8),                          # rows  8..15
        pad_rows(jnp.broadcast_to(params["dec_attn_b"], (1, C)), 8),  # rows 16..23
        pad_lanes(params["dec_w"]),                                   # rows 24..55
        pad_rows(pad_lanes(params["dec_b"]), 8),                      # rows 56..63
    ]
    glob = jnp.concatenate(glob_blocks, axis=0).astype(jnp.float32)
    assert glob.shape == (GP_ROWS, C)

    # Single packed parameter array: per-layer blocks followed by the
    # layer-invariant block -> one DMA for all parameters.
    packed = jnp.concatenate([layer_params.reshape(L * LP_ROWS, C), glob], axis=0)
    assert packed.shape == (TOTAL_ROWS, C)
    return packed


# ------------------------------ pure-JAX reference ------------------------------
def trompt_reference(x_num, params):
    b = x_num.shape[0]
    x_prompt = jnp.broadcast_to(params["x_prompt"][None],
                                (b, NUM_PROMPTS, CHANNELS))
    outs = []
    for l in range(NUM_LAYERS):
        feat = _encode_layer(x_num, params["enc_w"][l], params["enc_b"][l],
                             params["enc_ln_w"][l], params["enc_ln_b"][l])
        x_prompt = _trompt_conv(feat, x_prompt, params["emb_col"][l],
                                params["lin_w"][l], params["lin_b"][l],
                                params["expand_w"][l],
                                params["gn_w"][l], params["gn_b"][l])
        outs.append(_trompt_decode(x_prompt, params["dec_attn_w"],
                                   params["dec_attn_b"], params["dec_w"],
                                   params["dec_b"]))
    return jnp.mean(jnp.stack(outs, axis=1), axis=1)


def init_params(key):
    ks = jax.random.split(key, 8)

    def nrm(k, shape, std):
        return (std * jax.random.normal(k, shape)).astype(jnp.float32)

    inv_sqrt_c = 1.0 / np.sqrt(CHANNELS)
    return {
        "x_prompt": nrm(ks[0], (NUM_PROMPTS, CHANNELS), 0.01),
        "enc_w": nrm(ks[1], (NUM_LAYERS, NUM_COLS, CHANNELS), 0.5),
        "enc_b": nrm(ks[2], (NUM_LAYERS, NUM_COLS, CHANNELS), 0.1),
        "enc_ln_w": jnp.ones((NUM_LAYERS, 1, CHANNELS), jnp.float32),
        "enc_ln_b": jnp.zeros((NUM_LAYERS, 1, CHANNELS), jnp.float32),
        "emb_col": nrm(ks[3], (NUM_LAYERS, NUM_COLS, CHANNELS), 0.01),
        "lin_w": nrm(ks[4], (NUM_LAYERS, CHANNELS, CHANNELS), inv_sqrt_c),
        "lin_b": jnp.zeros((NUM_LAYERS, 1, CHANNELS), jnp.float32),
        "expand_w": nrm(ks[5], (NUM_LAYERS, NUM_PROMPTS, 2), 0.01),
        "gn_w": jnp.ones((NUM_LAYERS, NUM_COLS, 1), jnp.float32),
        "gn_b": jnp.zeros((NUM_LAYERS, NUM_COLS, 1), jnp.float32),
        "dec_attn_w": nrm(ks[6], (CHANNELS, 1), inv_sqrt_c),
        "dec_attn_b": jnp.zeros((1, 1), jnp.float32),
        "dec_w": nrm(ks[7], (CHANNELS, OUT_CHANNELS), inv_sqrt_c),
        "dec_b": jnp.zeros((1, OUT_CHANNELS), jnp.float32),
    }


if __name__ == "__main__":
    key = jax.random.PRNGKey(0)
    kx, kp = jax.random.split(key)
    x_num = jax.random.normal(kx, (BATCH, NUM_COLS), jnp.float32)
    params = init_params(kp)

    packed = jax.block_until_ready(pack_params(params))   # one-time offline packing

    out = trompt_forward(x_num, packed)
    out = jax.block_until_ready(out)
    assert out.shape == (BATCH, OUT_CHANNELS), out.shape

    ref = trompt_reference(x_num, params)
    np.testing.assert_allclose(np.asarray(out), np.asarray(ref),
                               rtol=2e-3, atol=5e-4)
    print("KERNEL_OK")
</pallas_src>

<mosaic_0001>
module attributes {stable_mosaic.version = 11 : i64} {
  func.func @_trompt_kernel(%arg0: memref<8x8x1xf32, #tpu.memory_space<vmem>>, %arg1: memref<288x32xf32, #tpu.memory_space<vmem>>, %arg2: memref<8x8xf32, #tpu.memory_space<vmem>>) attributes {dimension_semantics = [], scalar_prefetch = 0 : i64, scratch_operands = 0 : i64, tpu.core_type = #tpu.core_type<tc>} {
    %c0 = arith.constant 0 : index
    %c0_0 = arith.constant 0 : index
    %c0_1 = arith.constant 0 : index
    %0 = vector.load %arg0[%c0, %c0_0, %c0_1] : memref<8x8x1xf32, #tpu.memory_space<vmem>>, vector<8x8x1xf32>
    %1 = vector.shape_cast %0 : vector<8x8x1xf32> to vector<8x8x1xf32>
    %2 = vector.broadcast %1 : vector<8x8x1xf32> to vector<8x8x32xf32>
    %c232 = arith.constant 232 : index
    %c0_2 = arith.constant 0 : index
    %3 = vector.load %arg1[%c232, %c0_2] : memref<288x32xf32, #tpu.memory_space<vmem>>, vector<1x32xf32>
    %4 = vector.shape_cast %3 : vector<1x32xf32> to vector<1x1x32xf32>
    %c240 = arith.constant 240 : index
    %c0_3 = arith.constant 0 : index
    %5 = vector.load %arg1[%c240, %c0_3] : memref<288x32xf32, #tpu.memory_space<vmem>>, vector<1x1xf32>
    %6 = vector.shape_cast %5 : vector<1x1xf32> to vector<1x1x1xf32>
    %c248 = arith.constant 248 : index
    %c0_4 = arith.constant 0 : index
    %7 = vector.load %arg1[%c248, %c0_4] : memref<288x32xf32, #tpu.memory_space<vmem>>, vector<32x32xf32>
    %c280 = arith.constant 280 : index
    %c0_5 = arith.constant 0 : index
    %8 = vector.load %arg1[%c280, %c0_5] : memref<288x32xf32, #tpu.memory_space<vmem>>, vector<1x32xf32>
    %c224 = arith.constant 224 : index
    %c0_6 = arith.constant 0 : index
    %9 = vector.load %arg1[%c224, %c0_6] : memref<288x32xf32, #tpu.memory_space<vmem>>, vector<8x32xf32>
    %10 = vector.shape_cast %9 : vector<8x32xf32> to vector<1x8x32xf32>
    %11 = vector.shape_cast %10 : vector<1x8x32xf32> to vector<1x8x32xf32>
    %12 = vector.broadcast %11 : vector<1x8x32xf32> to vector<8x8x32xf32>
    %13 = tpu.iota {dimensions = array<i32: 1>} : vector<1x8x1xi32>
    %cst = arith.constant 0.000000e+00 : f32
    %14 = vector.broadcast %cst : f32 to vector<8x32xf32>
    %c0_7 = arith.constant 0 : index
    %c0_8 = arith.constant 0 : index
    %15 = vector.load %arg1[%c0_7, %c0_8] : memref<288x32xf32, #tpu.memory_space<vmem>>, vector<8x32xf32>
    %c8 = arith.constant 8 : index
    %c0_9 = arith.constant 0 : index
    %16 = vector.load %arg1[%c8, %c0_9] : memref<288x32xf32, #tpu.memory_space<vmem>>, vector<8x32xf32>
    %c16 = arith.constant 16 : index
    %c0_10 = arith.constant 0 : index
    %17 = vector.load %arg1[%c16, %c0_10] : memref<288x32xf32, #tpu.memory_space<vmem>>, vector<1x32xf32>
    %c24 = arith.constant 24 : index
    %c0_11 = arith.constant 0 : index
    %18 = vector.load %arg1[%c24, %c0_11] : memref<288x32xf32, #tpu.memory_space<vmem>>, vector<1x32xf32>
    %19 = vector.shape_cast %15 : vector<8x32xf32> to vector<1x8x32xf32>
    %20 = vector.broadcast %19 : vector<1x8x32xf32> to vector<8x8x32xf32>
    %21 = arith.mulf %2, %20 : vector<8x8x32xf32>
    %22 = vector.shape_cast %16 : vector<8x32xf32> to vector<1x8x32xf32>
    %23 = vector.broadcast %22 : vector<1x8x32xf32> to vector<8x8x32xf32>
    %24 = arith.addf %21, %23 : vector<8x8x32xf32>
    %cst_12 = arith.constant 0.000000e+00 : f32
    %25 = vector.broadcast %cst_12 : f32 to vector<8x8x32xf32>
    %26 = arith.maximumf %24, %25 : vector<8x8x32xf32>
    %cst_13 = arith.constant dense<0.000000e+00> : vector<8x8xf32>
    %27 = vector.multi_reduction <add>, %26, %cst_13 [2] : vector<8x8x32xf32> to vector<8x8xf32>
    %28 = vector.shape_cast %27 : vector<8x8xf32> to vector<8x8x1xf32>
    %cst_14 = arith.constant 3.200000e+01 : f32
    %29 = vector.broadcast %cst_14 : f32 to vector<8x8x1xf32>
    %30 = arith.divf %28, %29 : vector<8x8x1xf32>
    %31 = vector.broadcast %30 : vector<8x8x1xf32> to vector<8x8x32xf32>
    %32 = arith.subf %26, %31 : vector<8x8x32xf32>
    %33 = arith.mulf %32, %32 : vector<8x8x32xf32>
    %cst_15 = arith.constant dense<0.000000e+00> : vector<8x8xf32>
    %34 = vector.multi_reduction <add>, %33, %cst_15 [2] : vector<8x8x32xf32> to vector<8x8xf32>
    %35 = vector.shape_cast %34 : vector<8x8xf32> to vector<8x8x1xf32>
    %cst_16 = arith.constant 3.200000e+01 : f32
    %36 = vector.broadcast %cst_16 : f32 to vector<8x8x1xf32>
    %37 = arith.divf %35, %36 : vector<8x8x1xf32>
    %38 = vector.broadcast %30 : vector<8x8x1xf32> to vector<8x8x32xf32>
    %39 = arith.subf %26, %38 : vector<8x8x32xf32>
    %cst_17 = arith.constant 9.99999974E-6 : f32
    %40 = vector.broadcast %cst_17 : f32 to vector<8x8x1xf32>
    %41 = arith.addf %37, %40 : vector<8x8x1xf32>
    %42 = math.rsqrt %41 : vector<8x8x1xf32>
    %43 = vector.broadcast %42 : vector<8x8x1xf32> to vector<8x8x32xf32>
    %44 = arith.mulf %39, %43 : vector<8x8x32xf32>
    %45 = vector.shape_cast %17 : vector<1x32xf32> to vector<1x1x32xf32>
    %46 = vector.broadcast %45 : vector<1x1x32xf32> to vector<8x8x32xf32>
    %47 = arith.mulf %44, %46 : vector<8x8x32xf32>
    %48 = vector.shape_cast %18 : vector<1x32xf32> to vector<1x1x32xf32>
    %49 = vector.broadcast %48 : vector<1x1x32xf32> to vector<8x8x32xf32>
    %50 = arith.addf %47, %49 : vector<8x8x32xf32>
    %c32 = arith.constant 32 : index
    %c0_18 = arith.constant 0 : index
    %51 = vector.load %arg1[%c32, %c0_18] : memref<288x32xf32, #tpu.memory_space<vmem>>, vector<8x32xf32>
    %c96 = arith.constant 96 : index
    %c0_19 = arith.constant 0 : index
    %52 = vector.load %arg1[%c96, %c0_19] : memref<288x32xf32, #tpu.memory_space<vmem>>, vector<8x32xf32>
    %c104 = arith.constant 104 : index
    %c0_20 = arith.constant 0 : index
    %53 = vector.load %arg1[%c104, %c0_20] : memref<288x32xf32, #tpu.memory_space<vmem>>, vector<8x32xf32>
    %54 = vector.shape_cast %51 : vector<8x32xf32> to vector<1x8x32xf32>
    %55 = vector.broadcast %54 : vector<1x8x32xf32> to vector<8x8x32xf32>
    %56 = arith.addf %50, %55 : vector<8x8x32xf32>
    %cst_21 = arith.constant dense<0.000000e+00> : vector<8x8xf32>
    %57 = vector.multi_reduction <add>, %56, %cst_21 [2] : vector<8x8x32xf32> to vector<8x8xf32>
    %58 = vector.shape_cast %57 : vector<8x8xf32> to vector<8x8x1xf32>
    %cst_22 = arith.constant 0.000000e+00 : f32
    %59 = vector.broadcast %cst_22 : f32 to vector<8x8x1xf32>
    %c0_i32 = arith.constant 0 : i32
    %60 = vector.broadcast %c0_i32 : i32 to vector<1x8x1xi32>
    %61 = arith.cmpi sge, %13, %60 : vector<1x8x1xi32>
    %c4_i32 = arith.constant 4 : i32
    %62 = vector.broadcast %c4_i32 : i32 to vector<1x8x1xi32>
    %63 = arith.cmpi slt, %13, %62 : vector<1x8x1xi32>
    %64 = arith.andi %61, %63 : vector<1x8x1xi1>
    %cst_23 = arith.constant 0.000000e+00 : f32
    %65 = vector.shape_cast %64 : vector<1x8x1xi1> to vector<1x8x1xi1>
    %66 = vector.broadcast %65 : vector<1x8x1xi1> to vector<8x8x1xi1>
    %67 = vector.broadcast %cst_23 : f32 to vector<8x8x1xf32>
    %68 = arith.select %66, %58, %67 : vector<8x8x1xi1>, vector<8x8x1xf32>
    %cst_24 = arith.constant dense<0.000000e+00> : vector<8x1xf32>
    %69 = vector.multi_reduction <add>, %68, %cst_24 [1] : vector<8x8x1xf32> to vector<8x1xf32>
    %70 = vector.shape_cast %69 : vector<8x1xf32> to vector<8x1x1xf32>
    %cst_25 = arith.constant 7.812500e-03 : f32
    %71 = vector.broadcast %cst_25 : f32 to vector<8x1x1xf32>
    %72 = arith.mulf %70, %71 : vector<8x1x1xf32>
    %cst_26 = arith.constant 0.000000e+00 : f32
    %73 = vector.shape_cast %64 : vector<1x8x1xi1> to vector<1x8x1xi1>
    %74 = vector.broadcast %73 : vector<1x8x1xi1> to vector<8x8x1xi1>
    %75 = vector.shape_cast %72 : vector<8x1x1xf32> to vector<8x1x1xf32>
    %76 = vector.broadcast %75 : vector<8x1x1xf32> to vector<8x8x1xf32>
    %77 = vector.broadcast %cst_26 : f32 to vector<8x8x1xf32>
    %78 = arith.select %74, %76, %77 : vector<8x8x1xi1>, vector<8x8x1xf32>
    %79 = arith.addf %59, %78 : vector<8x8x1xf32>
    %c4_i32_27 = arith.constant 4 : i32
    %80 = vector.broadcast %c4_i32_27 : i32 to vector<1x8x1xi32>
    %81 = arith.cmpi sge, %13, %80 : vector<1x8x1xi32>
    %c8_i32 = arith.constant 8 : i32
    %82 = vector.broadcast %c8_i32 : i32 to vector<1x8x1xi32>
    %83 = arith.cmpi slt, %13, %82 : vector<1x8x1xi32>
    %84 = arith.andi %81, %83 : vector<1x8x1xi1>
    %cst_28 = arith.constant 0.000000e+00 : f32
    %85 = vector.shape_cast %84 : vector<1x8x1xi1> to vector<1x8x1xi1>
    %86 = vector.broadcast %85 : vector<1x8x1xi1> to vector<8x8x1xi1>
    %87 = vector.broadcast %cst_28 : f32 to vector<8x8x1xf32>
    %88 = arith.select %86, %58, %87 : vector<8x8x1xi1>, vector<8x8x1xf32>
    %cst_29 = arith.constant dense<0.000000e+00> : vector<8x1xf32>
    %89 = vector.multi_reduction <add>, %88, %cst_29 [1] : vector<8x8x1xf32> to vector<8x1xf32>
    %90 = vector.shape_cast %89 : vector<8x1xf32> to vector<8x1x1xf32>
    %cst_30 = arith.constant 7.812500e-03 : f32
    %91 = vector.broadcast %cst_30 : f32 to vector<8x1x1xf32>
    %92 = arith.mulf %90, %91 : vector<8x1x1xf32>
    %cst_31 = arith.constant 0.000000e+00 : f32
    %93 = vector.shape_cast %84 : vector<1x8x1xi1> to vector<1x8x1xi1>
    %94 = vector.broadcast %93 : vector<1x8x1xi1> to vector<8x8x1xi1>
    %95 = vector.shape_cast %92 : vector<8x1x1xf32> to vector<8x1x1xf32>
    %96 = vector.broadcast %95 : vector<8x1x1xf32> to vector<8x8x1xf32>
    %97 = vector.broadcast %cst_31 : f32 to vector<8x8x1xf32>
    %98 = arith.select %94, %96, %97 : vector<8x8x1xi1>, vector<8x8x1xf32>
    %99 = arith.addf %79, %98 : vector<8x8x1xf32>
    %100 = vector.broadcast %99 : vector<8x8x1xf32> to vector<8x8x32xf32>
    %101 = arith.subf %56, %100 : vector<8x8x32xf32>
    %102 = arith.mulf %101, %101 : vector<8x8x32xf32>
    %cst_32 = arith.constant dense<0.000000e+00> : vector<8x8xf32>
    %103 = vector.multi_reduction <add>, %102, %cst_32 [2] : vector<8x8x32xf32> to vector<8x8xf32>
    %104 = vector.shape_cast %103 : vector<8x8xf32> to vector<8x8x1xf32>
    %cst_33 = arith.constant 0.000000e+00 : f32
    %105 = vector.broadcast %cst_33 : f32 to vector<8x8x1xf32>
    %c0_i32_34 = arith.constant 0 : i32
    %106 = vector.broadcast %c0_i32_34 : i32 to vector<1x8x1xi32>
    %107 = arith.cmpi sge, %13, %106 : vector<1x8x1xi32>
    %c4_i32_35 = arith.constant 4 : i32
    %108 = vector.broadcast %c4_i32_35 : i32 to vector<1x8x1xi32>
    %109 = arith.cmpi slt, %13, %108 : vector<1x8x1xi32>
    %110 = arith.andi %107, %109 : vector<1x8x1xi1>
    %cst_36 = arith.constant 0.000000e+00 : f32
    %111 = vector.shape_cast %110 : vector<1x8x1xi1> to vector<1x8x1xi1>
    %112 = vector.broadcast %111 : vector<1x8x1xi1> to vector<8x8x1xi1>
    %113 = vector.broadcast %cst_36 : f32 to vector<8x8x1xf32>
    %114 = arith.select %112, %104, %113 : vector<8x8x1xi1>, vector<8x8x1xf32>
    %cst_37 = arith.constant dense<0.000000e+00> : vector<8x1xf32>
    %115 = vector.multi_reduction <add>, %114, %cst_37 [1] : vector<8x8x1xf32> to vector<8x1xf32>
    %116 = vector.shape_cast %115 : vector<8x1xf32> to vector<8x1x1xf32>
    %cst_38 = arith.constant 7.812500e-03 : f32
    %117 = vector.broadcast %cst_38 : f32 to vector<8x1x1xf32>
    %118 = arith.mulf %116, %117 : vector<8x1x1xf32>
    %cst_39 = arith.constant 0.000000e+00 : f32
    %119 = vector.shape_cast %110 : vector<1x8x1xi1> to vector<1x8x1xi1>
    %120 = vector.broadcast %119 : vector<1x8x1xi1> to vector<8x8x1xi1>
    %121 = vector.shape_cast %118 : vector<8x1x1xf32> to vector<8x1x1xf32>
    %122 = vector.broadcast %121 : vector<8x1x1xf32> to vector<8x8x1xf32>
    %123 = vector.broadcast %cst_39 : f32 to vector<8x8x1xf32>
    %124 = arith.select %120, %122, %123 : vector<8x8x1xi1>, vector<8x8x1xf32>
    %125 = arith.addf %105, %124 : vector<8x8x1xf32>
    %c4_i32_40 = arith.constant 4 : i32
    %126 = vector.broadcast %c4_i32_40 : i32 to vector<1x8x1xi32>
    %127 = arith.cmpi sge, %13, %126 : vector<1x8x1xi32>
    %c8_i32_41 = arith.constant 8 : i32
    %128 = vector.broadcast %c8_i32_41 : i32 to vector<1x8x1xi32>
    %129 = arith.cmpi slt, %13, %128 : vector<1x8x1xi32>
    %130 = arith.andi %127, %129 : vector<1x8x1xi1>
    %cst_42 = arith.constant 0.000000e+00 : f32
    %131 = vector.shape_cast %130 : vector<1x8x1xi1> to vector<1x8x1xi1>
    %132 = vector.broadcast %131 : vector<1x8x1xi1> to vector<8x8x1xi1>
    %133 = vector.broadcast %cst_42 : f32 to vector<8x8x1xf32>
    %134 = arith.select %132, %104, %133 : vector<8x8x1xi1>, vector<8x8x1xf32>
    %cst_43 = arith.constant dense<0.000000e+00> : vector<8x1xf32>
    %135 = vector.multi_reduction <add>, %134, %cst_43 [1] : vector<8x8x1xf32> to vector<8x1xf32>
    %136 = vector.shape_cast %135 : vector<8x1xf32> to vector<8x1x1xf32>
    %cst_44 = arith.constant 7.812500e-03 : f32
    %137 = vector.broadcast %cst_44 : f32 to vector<8x1x1xf32>
    %138 = arith.mulf %136, %137 : vector<8x1x1xf32>
    %cst_45 = arith.constant 0.000000e+00 : f32
    %139 = vector.shape_cast %130 : vector<1x8x1xi1> to vector<1x8x1xi1>
    %140 = vector.broadcast %139 : vector<1x8x1xi1> to vector<8x8x1xi1>
    %141 = vector.shape_cast %138 : vector<8x1x1xf32> to vector<8x1x1xf32>
    %142 = vector.broadcast %141 : vector<8x1x1xf32> to vector<8x8x1xf32>
    %143 = vector.broadcast %cst_45 : f32 to vector<8x8x1xf32>
    %144 = arith.select %140, %142, %143 : vector<8x8x1xi1>, vector<8x8x1xf32>
    %145 = arith.addf %125, %144 : vector<8x8x1xf32>
    %cst_46 = arith.constant 9.99999974E-6 : f32
    %146 = vector.broadcast %cst_46 : f32 to vector<8x8x1xf32>
    %147 = arith.addf %145, %146 : vector<8x8x1xf32>
    %148 = math.rsqrt %147 : vector<8x8x1xf32>
    %149 = vector.broadcast %148 : vector<8x8x1xf32> to vector<8x8x32xf32>
    %150 = arith.mulf %101, %149 : vector<8x8x32xf32>
    %151 = vector.shape_cast %52 : vector<8x32xf32> to vector<1x8x32xf32>
    %152 = vector.broadcast %151 : vector<1x8x32xf32> to vector<8x8x32xf32>
    %153 = arith.mulf %150, %152 : vector<8x8x32xf32>
    %154 = vector.shape_cast %53 : vector<8x32xf32> to vector<1x8x32xf32>
    %155 = vector.broadcast %154 : vector<1x8x32xf32> to vector<8x8x32xf32>
    %156 = arith.addf %153, %155 : vector<8x8x32xf32>
    %c40 = arith.constant 40 : index
    %c0_47 = arith.constant 0 : index
    %157 = vector.load %arg1[%c40, %c0_47] : memref<288x32xf32, #tpu.memory_space<vmem>>, vector<32x32xf32>
    %c72 = arith.constant 72 : index
    %c0_48 = arith.constant 0 : index
    %158 = vector.load %arg1[%c72, %c0_48] : memref<288x32xf32, #tpu.memory_space<vmem>>, vector<1x32xf32>
    %159 = vector.shape_cast %12 : vector<8x8x32xf32> to vector<64x32xf32>
    %cst_49 = arith.constant dense<0.000000e+00> : vector<64x32xf32>
    %160 = tpu.matmul %159, %157, %cst_49 {dimension_numbers = #tpu.dot_dimension_numbers<[1], [0], [0], [1], [0, 0, 1, 1], [], []>} : vector<64x32xf32>, vector<32x32xf32>, vector<64x32xf32> -> vector<64x32xf32>
    %161 = vector.broadcast %158 : vector<1x32xf32> to vector<64x32xf32>
    %162 = arith.addf %160, %161 : vector<64x32xf32>
    %cst_50 = arith.constant 0.000000e+00 : f32
    %163 = vector.broadcast %cst_50 : f32 to vector<64x32xf32>
    %164 = arith.maximumf %162, %163 : vector<64x32xf32>
    %165 = vector.shape_cast %164 : vector<64x32xf32> to vector<8x8x32xf32>
    %c80 = arith.constant 80 : index
    %c0_51 = arith.constant 0 : index
    %166 = vector.load %arg1[%c80, %c0_51] : memref<288x32xf32, #tpu.memory_space<vmem>>, vector<8x32xf32>
    %c88 = arith.constant 88 : index
    %c0_52 = arith.constant 0 : index
    %167 = vector.load %arg1[%c88, %c0_52] : memref<288x32xf32, #tpu.memory_space<vmem>>, vector<8x32xf32>
    %168 = vector.shape_cast %166 : vector<8x32xf32> to vector<1x8x32xf32>
    %169 = vector.broadcast %168 : vector<1x8x32xf32> to vector<8x8x32xf32>
    %170 = arith.mulf %169, %12 : vector<8x8x32xf32>
    %171 = vector.shape_cast %167 : vector<8x32xf32> to vector<1x8x32xf32>
    %172 = vector.broadcast %171 : vector<1x8x32xf32> to vector<8x8x32xf32>
    %173 = arith.mulf %172, %165 : vector<8x8x32xf32>
    %174 = arith.addf %170, %173 : vector<8x8x32xf32>
    %175 = vector.shape_cast %174 : vector<8x8x32xf32> to vector<64x32xf32>
    %cst_53 = arith.constant dense<0.000000e+00> : vector<64x8xf32>
    %176 = tpu.matmul %175, %51, %cst_53 {dimension_numbers = #tpu.dot_dimension_numbers<[1], [1], [0], [0], [0, 0, 1, 0], [], []>} : vector<64x32xf32>, vector<8x32xf32>, vector<64x8xf32> -> vector<64x8xf32>
    %cst_54 = arith.constant dense<0xFF800000> : vector<64xf32>
    %177 = vector.multi_reduction <maximumf>, %176, %cst_54 [1] : vector<64x8xf32> to vector<64xf32>
    %178 = vector.shape_cast %177 : vector<64xf32> to vector<64x1xf32>
    %179 = vector.broadcast %178 : vector<64x1xf32> to vector<64x8xf32>
    %180 = arith.subf %176, %179 : vector<64x8xf32>
    %181 = math.exp %180 : vector<64x8xf32>
    %cst_55 = arith.constant dense<0.000000e+00> : vector<64xf32>
    %182 = vector.multi_reduction <add>, %181, %cst_55 [1] : vector<64x8xf32> to vector<64xf32>
    %183 = vector.shape_cast %182 : vector<64xf32> to vector<64x1xf32>
    %184 = tpu.reciprocal %183 {approx = true} : vector<64x1xf32> -> vector<64x1xf32>
    %185 = arith.mulf %183, %184 : vector<64x1xf32>
    %cst_56 = arith.constant 2.000000e+00 : f32
    %186 = vector.broadcast %cst_56 : f32 to vector<64x1xf32>
    %187 = arith.subf %186, %185 : vector<64x1xf32>
    %188 = arith.mulf %184, %187 : vector<64x1xf32>
    %189 = vector.broadcast %188 : vector<64x1xf32> to vector<64x8xf32>
    %190 = arith.mulf %181, %189 : vector<64x8xf32>
    %191 = vector.shape_cast %190 : vector<64x8xf32> to vector<8x8x8xf32>
    "tpu.trace_start"() <{level = 10 : i32, message = "bpn,bnc->bpc"}> : () -> ()
    %cst_57 = arith.constant dense<0.000000e+00> : vector<8x8x32xf32>
    %192 = tpu.matmul %191, %156, %cst_57 {dimension_numbers = #tpu.dot_dimension_numbers<[2], [1], [1], [2], [0, 0, 0, 1, 1, 2], [0], [0]>} : vector<8x8x8xf32>, vector<8x8x32xf32>, vector<8x8x32xf32> -> vector<8x8x32xf32>
    "tpu.trace_stop"() : () -> ()
    %193 = vector.broadcast %4 : vector<1x1x32xf32> to vector<8x8x32xf32>
    %194 = arith.mulf %192, %193 : vector<8x8x32xf32>
    %cst_58 = arith.constant dense<0.000000e+00> : vector<8x8xf32>
    %195 = vector.multi_reduction <add>, %194, %cst_58 [2] : vector<8x8x32xf32> to vector<8x8xf32>
    %196 = vector.shape_cast %195 : vector<8x8xf32> to vector<8x8x1xf32>
    %197 = vector.broadcast %6 : vector<1x1x1xf32> to vector<8x8x1xf32>
    %198 = arith.addf %196, %197 : vector<8x8x1xf32>
    %cst_59 = arith.constant dense<0xFF800000> : vector<8x1xf32>
    %199 = vector.multi_reduction <maximumf>, %198, %cst_59 [1] : vector<8x8x1xf32> to vector<8x1xf32>
    %200 = vector.shape_cast %199 : vector<8x1xf32> to vector<8x1x1xf32>
    %201 = vector.broadcast %200 : vector<8x1x1xf32> to vector<8x8x1xf32>
    %202 = arith.subf %198, %201 : vector<8x8x1xf32>
    %203 = math.exp %202 : vector<8x8x1xf32>
    %cst_60 = arith.constant dense<0.000000e+00> : vector<8x1xf32>
    %204 = vector.multi_reduction <add>, %203, %cst_60 [1] : vector<8x8x1xf32> to vector<8x1xf32>
    %205 = vector.shape_cast %204 : vector<8x1xf32> to vector<8x1x1xf32>
    %206 = tpu.reciprocal %205 {approx = true} : vector<8x1x1xf32> -> vector<8x1x1xf32>
    %207 = arith.mulf %205, %206 : vector<8x1x1xf32>
    %cst_61 = arith.constant 2.000000e+00 : f32
    %208 = vector.broadcast %cst_61 : f32 to vector<8x1x1xf32>
    %209 = arith.subf %208, %207 : vector<8x1x1xf32>
    %210 = arith.mulf %206, %209 : vector<8x1x1xf32>
    %211 = vector.broadcast %210 : vector<8x1x1xf32> to vector<8x8x1xf32>
    %212 = arith.mulf %203, %211 : vector<8x8x1xf32>
    %213 = vector.broadcast %212 : vector<8x8x1xf32> to vector<8x8x32xf32>
    %214 = arith.mulf %213, %192 : vector<8x8x32xf32>
    %cst_62 = arith.constant dense<0.000000e+00> : vector<8x32xf32>
    %215 = vector.multi_reduction <add>, %214, %cst_62 [1] : vector<8x8x32xf32> to vector<8x32xf32>
    %216 = arith.addf %14, %215 : vector<8x32xf32>
    %c112 = arith.constant 112 : index
    %c0_63 = arith.constant 0 : index
    %217 = vector.load %arg1[%c112, %c0_63] : memref<288x32xf32, #tpu.memory_space<vmem>>, vector<8x32xf32>
    %c120 = arith.constant 120 : index
    %c0_64 = arith.constant 0 : index
    %218 = vector.load %arg1[%c120, %c0_64] : memref<288x32xf32, #tpu.memory_space<vmem>>, vector<8x32xf32>
    %c128 = arith.constant 128 : index
    %c0_65 = arith.constant 0 : index
    %219 = vector.load %arg1[%c128, %c0_65] : memref<288x32xf32, #tpu.memory_space<vmem>>, vector<1x32xf32>
    %c136 = arith.constant 136 : index
    %c0_66 = arith.constant 0 : index
    %220 = vector.load %arg1[%c136, %c0_66] : memref<288x32xf32, #tpu.memory_space<vmem>>, vector<1x32xf32>
    %221 = vector.shape_cast %217 : vector<8x32xf32> to vector<1x8x32xf32>
    %222 = vector.broadcast %221 : vector<1x8x32xf32> to vector<8x8x32xf32>
    %223 = arith.mulf %2, %222 : vector<8x8x32xf32>
    %224 = vector.shape_cast %218 : vector<8x32xf32> to vector<1x8x32xf32>
    %225 = vector.broadcast %224 : vector<1x8x32xf32> to vector<8x8x32xf32>
    %226 = arith.addf %223, %225 : vector<8x8x32xf32>
    %cst_67 = arith.constant 0.000000e+00 : f32
    %227 = vector.broadcast %cst_67 : f32 to vector<8x8x32xf32>
    %228 = arith.maximumf %226, %227 : vector<8x8x32xf32>
    %cst_68 = arith.constant dense<0.000000e+00> : vector<8x8xf32>
    %229 = vector.multi_reduction <add>, %228, %cst_68 [2] : vector<8x8x32xf32> to vector<8x8xf32>
    %230 = vector.shape_cast %229 : vector<8x8xf32> to vector<8x8x1xf32>
    %cst_69 = arith.constant 3.200000e+01 : f32
    %231 = vector.broadcast %cst_69 : f32 to vector<8x8x1xf32>
    %232 = arith.divf %230, %231 : vector<8x8x1xf32>
    %233 = vector.broadcast %232 : vector<8x8x1xf32> to vector<8x8x32xf32>
    %234 = arith.subf %228, %233 : vector<8x8x32xf32>
    %235 = arith.mulf %234, %234 : vector<8x8x32xf32>
    %cst_70 = arith.constant dense<0.000000e+00> : vector<8x8xf32>
    %236 = vector.multi_reduction <add>, %235, %cst_70 [2] : vector<8x8x32xf32> to vector<8x8xf32>
    %237 = vector.shape_cast %236 : vector<8x8xf32> to vector<8x8x1xf32>
    %cst_71 = arith.constant 3.200000e+01 : f32
    %238 = vector.broadcast %cst_71 : f32 to vector<8x8x1xf32>
    %239 = arith.divf %237, %238 : vector<8x8x1xf32>
    %240 = vector.broadcast %232 : vector<8x8x1xf32> to vector<8x8x32xf32>
    %241 = arith.subf %228, %240 : vector<8x8x32xf32>
    %cst_72 = arith.constant 9.99999974E-6 : f32
    %242 = vector.broadcast %cst_72 : f32 to vector<8x8x1xf32>
    %243 = arith.addf %239, %242 : vector<8x8x1xf32>
    %244 = math.rsqrt %243 : vector<8x8x1xf32>
    %245 = vector.broadcast %244 : vector<8x8x1xf32> to vector<8x8x32xf32>
    %246 = arith.mulf %241, %245 : vector<8x8x32xf32>
    %247 = vector.shape_cast %219 : vector<1x32xf32> to vector<1x1x32xf32>
    %248 = vector.broadcast %247 : vector<1x1x32xf32> to vector<8x8x32xf32>
    %249 = arith.mulf %246, %248 : vector<8x8x32xf32>
    %250 = vector.shape_cast %220 : vector<1x32xf32> to vector<1x1x32xf32>
    %251 = vector.broadcast %250 : vector<1x1x32xf32> to vector<8x8x32xf32>
    %252 = arith.addf %249, %251 : vector<8x8x32xf32>
    %c144 = arith.constant 144 : index
    %c0_73 = arith.constant 0 : index
    %253 = vector.load %arg1[%c144, %c0_73] : memref<288x32xf32, #tpu.memory_space<vmem>>, vector<8x32xf32>
    %c208 = arith.constant 208 : index
    %c0_74 = arith.constant 0 : index
    %254 = vector.load %arg1[%c208, %c0_74] : memref<288x32xf32, #tpu.memory_space<vmem>>, vector<8x32xf32>
    %c216 = arith.constant 216 : index
    %c0_75 = arith.constant 0 : index
    %255 = vector.load %arg1[%c216, %c0_75] : memref<288x32xf32, #tpu.memory_space<vmem>>, vector<8x32xf32>
    %256 = vector.shape_cast %253 : vector<8x32xf32> to vector<1x8x32xf32>
    %257 = vector.broadcast %256 : vector<1x8x32xf32> to vector<8x8x32xf32>
    %258 = arith.addf %252, %257 : vector<8x8x32xf32>
    %cst_76 = arith.constant dense<0.000000e+00> : vector<8x8xf32>
    %259 = vector.multi_reduction <add>, %258, %cst_76 [2] : vector<8x8x32xf32> to vector<8x8xf32>
    %260 = vector.shape_cast %259 : vector<8x8xf32> to vector<8x8x1xf32>
    %cst_77 = arith.constant 0.000000e+00 : f32
    %261 = vector.broadcast %cst_77 : f32 to vector<8x8x1xf32>
    %c0_i32_78 = arith.constant 0 : i32
    %262 = vector.broadcast %c0_i32_78 : i32 to vector<1x8x1xi32>
    %263 = arith.cmpi sge, %13, %262 : vector<1x8x1xi32>
    %c4_i32_79 = arith.constant 4 : i32
    %264 = vector.broadcast %c4_i32_79 : i32 to vector<1x8x1xi32>
    %265 = arith.cmpi slt, %13, %264 : vector<1x8x1xi32>
    %266 = arith.andi %263, %265 : vector<1x8x1xi1>
    %cst_80 = arith.constant 0.000000e+00 : f32
    %267 = vector.shape_cast %266 : vector<1x8x1xi1> to vector<1x8x1xi1>
    %268 = vector.broadcast %267 : vector<1x8x1xi1> to vector<8x8x1xi1>
    %269 = vector.broadcast %cst_80 : f32 to vector<8x8x1xf32>
    %270 = arith.select %268, %260, %269 : vector<8x8x1xi1>, vector<8x8x1xf32>
    %cst_81 = arith.constant dense<0.000000e+00> : vector<8x1xf32>
    %271 = vector.multi_reduction <add>, %270, %cst_81 [1] : vector<8x8x1xf32> to vector<8x1xf32>
    %272 = vector.shape_cast %271 : vector<8x1xf32> to vector<8x1x1xf32>
    %cst_82 = arith.constant 7.812500e-03 : f32
    %273 = vector.broadcast %cst_82 : f32 to vector<8x1x1xf32>
    %274 = arith.mulf %272, %273 : vector<8x1x1xf32>
    %cst_83 = arith.constant 0.000000e+00 : f32
    %275 = vector.shape_cast %266 : vector<1x8x1xi1> to vector<1x8x1xi1>
    %276 = vector.broadcast %275 : vector<1x8x1xi1> to vector<8x8x1xi1>
    %277 = vector.shape_cast %274 : vector<8x1x1xf32> to vector<8x1x1xf32>
    %278 = vector.broadcast %277 : vector<8x1x1xf32> to vector<8x8x1xf32>
    %279 = vector.broadcast %cst_83 : f32 to vector<8x8x1xf32>
    %280 = arith.select %276, %278, %279 : vector<8x8x1xi1>, vector<8x8x1xf32>
    %281 = arith.addf %261, %280 : vector<8x8x1xf32>
    %c4_i32_84 = arith.constant 4 : i32
    %282 = vector.broadcast %c4_i32_84 : i32 to vector<1x8x1xi32>
    %283 = arith.cmpi sge, %13, %282 : vector<1x8x1xi32>
    %c8_i32_85 = arith.constant 8 : i32
    %284 = vector.broadcast %c8_i32_85 : i32 to vector<1x8x1xi32>
    %285 = arith.cmpi slt, %13, %284 : vector<1x8x1xi32>
    %286 = arith.andi %283, %285 : vector<1x8x1xi1>
    %cst_86 = arith.constant 0.000000e+00 : f32
    %287 = vector.shape_cast %286 : vector<1x8x1xi1> to vector<1x8x1xi1>
    %288 = vector.broadcast %287 : vector<1x8x1xi1> to vector<8x8x1xi1>
    %289 = vector.broadcast %cst_86 : f32 to vector<8x8x1xf32>
    %290 = arith.select %288, %260, %289 : vector<8x8x1xi1>, vector<8x8x1xf32>
    %cst_87 = arith.constant dense<0.000000e+00> : vector<8x1xf32>
    %291 = vector.multi_reduction <add>, %290, %cst_87 [1] : vector<8x8x1xf32> to vector<8x1xf32>
    %292 = vector.shape_cast %291 : vector<8x1xf32> to vector<8x1x1xf32>
    %cst_88 = arith.constant 7.812500e-03 : f32
    %293 = vector.broadcast %cst_88 : f32 to vector<8x1x1xf32>
    %294 = arith.mulf %292, %293 : vector<8x1x1xf32>
    %cst_89 = arith.constant 0.000000e+00 : f32
    %295 = vector.shape_cast %286 : vector<1x8x1xi1> to vector<1x8x1xi1>
    %296 = vector.broadcast %295 : vector<1x8x1xi1> to vector<8x8x1xi1>
    %297 = vector.shape_cast %294 : vector<8x1x1xf32> to vector<8x1x1xf32>
    %298 = vector.broadcast %297 : vector<8x1x1xf32> to vector<8x8x1xf32>
    %299 = vector.broadcast %cst_89 : f32 to vector<8x8x1xf32>
    %300 = arith.select %296, %298, %299 : vector<8x8x1xi1>, vector<8x8x1xf32>
    %301 = arith.addf %281, %300 : vector<8x8x1xf32>
    %302 = vector.broadcast %301 : vector<8x8x1xf32> to vector<8x8x32xf32>
    %303 = arith.subf %258, %302 : vector<8x8x32xf32>
    %304 = arith.mulf %303, %303 : vector<8x8x32xf32>
    %cst_90 = arith.constant dense<0.000000e+00> : vector<8x8xf32>
    %305 = vector.multi_reduction <add>, %304, %cst_90 [2] : vector<8x8x32xf32> to vector<8x8xf32>
    %306 = vector.shape_cast %305 : vector<8x8xf32> to vector<8x8x1xf32>
    %cst_91 = arith.constant 0.000000e+00 : f32
    %307 = vector.broadcast %cst_91 : f32 to vector<8x8x1xf32>
    %c0_i32_92 = arith.constant 0 : i32
    %308 = vector.broadcast %c0_i32_92 : i32 to vector<1x8x1xi32>
    %309 = arith.cmpi sge, %13, %308 : vector<1x8x1xi32>
    %c4_i32_93 = arith.constant 4 : i32
    %310 = vector.broadcast %c4_i32_93 : i32 to vector<1x8x1xi32>
    %311 = arith.cmpi slt, %13, %310 : vector<1x8x1xi32>
    %312 = arith.andi %309, %311 : vector<1x8x1xi1>
    %cst_94 = arith.constant 0.000000e+00 : f32
    %313 = vector.shape_cast %312 : vector<1x8x1xi1> to vector<1x8x1xi1>
    %314 = vector.broadcast %313 : vector<1x8x1xi1> to vector<8x8x1xi1>
    %315 = vector.broadcast %cst_94 : f32 to vector<8x8x1xf32>
    %316 = arith.select %314, %306, %315 : vector<8x8x1xi1>, vector<8x8x1xf32>
    %cst_95 = arith.constant dense<0.000000e+00> : vector<8x1xf32>
    %317 = vector.multi_reduction <add>, %316, %cst_95 [1] : vector<8x8x1xf32> to vector<8x1xf32>
    %318 = vector.shape_cast %317 : vector<8x1xf32> to vector<8x1x1xf32>
    %cst_96 = arith.constant 7.812500e-03 : f32
    %319 = vector.broadcast %cst_96 : f32 to vector<8x1x1xf32>
    %320 = arith.mulf %318, %319 : vector<8x1x1xf32>
    %cst_97 = arith.constant 0.000000e+00 : f32
    %321 = vector.shape_cast %312 : vector<1x8x1xi1> to vector<1x8x1xi1>
    %322 = vector.broadcast %321 : vector<1x8x1xi1> to vector<8x8x1xi1>
    %323 = vector.shape_cast %320 : vector<8x1x1xf32> to vector<8x1x1xf32>
    %324 = vector.broadcast %323 : vector<8x1x1xf32> to vector<8x8x1xf32>
    %325 = vector.broadcast %cst_97 : f32 to vector<8x8x1xf32>
    %326 = arith.select %322, %324, %325 : vector<8x8x1xi1>, vector<8x8x1xf32>
    %327 = arith.addf %307, %326 : vector<8x8x1xf32>
    %c4_i32_98 = arith.constant 4 : i32
    %328 = vector.broadcast %c4_i32_98 : i32 to vector<1x8x1xi32>
    %329 = arith.cmpi sge, %13, %328 : vector<1x8x1xi32>
    %c8_i32_99 = arith.constant 8 : i32
    %330 = vector.broadcast %c8_i32_99 : i32 to vector<1x8x1xi32>
    %331 = arith.cmpi slt, %13, %330 : vector<1x8x1xi32>
    %332 = arith.andi %329, %331 : vector<1x8x1xi1>
    %cst_100 = arith.constant 0.000000e+00 : f32
    %333 = vector.shape_cast %332 : vector<1x8x1xi1> to vector<1x8x1xi1>
    %334 = vector.broadcast %333 : vector<1x8x1xi1> to vector<8x8x1xi1>
    %335 = vector.broadcast %cst_100 : f32 to vector<8x8x1xf32>
    %336 = arith.select %334, %306, %335 : vector<8x8x1xi1>, vector<8x8x1xf32>
    %cst_101 = arith.constant dense<0.000000e+00> : vector<8x1xf32>
    %337 = vector.multi_reduction <add>, %336, %cst_101 [1] : vector<8x8x1xf32> to vector<8x1xf32>
    %338 = vector.shape_cast %337 : vector<8x1xf32> to vector<8x1x1xf32>
    %cst_102 = arith.constant 7.812500e-03 : f32
    %339 = vector.broadcast %cst_102 : f32 to vector<8x1x1xf32>
    %340 = arith.mulf %338, %339 : vector<8x1x1xf32>
    %cst_103 = arith.constant 0.000000e+00 : f32
    %341 = vector.shape_cast %332 : vector<1x8x1xi1> to vector<1x8x1xi1>
    %342 = vector.broadcast %341 : vector<1x8x1xi1> to vector<8x8x1xi1>
    %343 = vector.shape_cast %340 : vector<8x1x1xf32> to vector<8x1x1xf32>
    %344 = vector.broadcast %343 : vector<8x1x1xf32> to vector<8x8x1xf32>
    %345 = vector.broadcast %cst_103 : f32 to vector<8x8x1xf32>
    %346 = arith.select %342, %344, %345 : vector<8x8x1xi1>, vector<8x8x1xf32>
    %347 = arith.addf %327, %346 : vector<8x8x1xf32>
    %cst_104 = arith.constant 9.99999974E-6 : f32
    %348 = vector.broadcast %cst_104 : f32 to vector<8x8x1xf32>
    %349 = arith.addf %347, %348 : vector<8x8x1xf32>
    %350 = math.rsqrt %349 : vector<8x8x1xf32>
    %351 = vector.broadcast %350 : vector<8x8x1xf32> to vector<8x8x32xf32>
    %352 = arith.mulf %303, %351 : vector<8x8x32xf32>
    %353 = vector.shape_cast %254 : vector<8x32xf32> to vector<1x8x32xf32>
    %354 = vector.broadcast %353 : vector<1x8x32xf32> to vector<8x8x32xf32>
    %355 = arith.mulf %352, %354 : vector<8x8x32xf32>
    %356 = vector.shape_cast %255 : vector<8x32xf32> to vector<1x8x32xf32>
    %357 = vector.broadcast %356 : vector<1x8x32xf32> to vector<8x8x32xf32>
    %358 = arith.addf %355, %357 : vector<8x8x32xf32>
    %c152 = arith.constant 152 : index
    %c0_105 = arith.constant 0 : index
    %359 = vector.load %arg1[%c152, %c0_105] : memref<288x32xf32, #tpu.memory_space<vmem>>, vector<32x32xf32>
    %c184 = arith.constant 184 : index
    %c0_106 = arith.constant 0 : index
    %360 = vector.load %arg1[%c184, %c0_106] : memref<288x32xf32, #tpu.memory_space<vmem>>, vector<1x32xf32>
    %361 = vector.shape_cast %192 : vector<8x8x32xf32> to vector<64x32xf32>
    %cst_107 = arith.constant dense<0.000000e+00> : vector<64x32xf32>
    %362 = tpu.matmul %361, %359, %cst_107 {dimension_numbers = #tpu.dot_dimension_numbers<[1], [0], [0], [1], [0, 0, 1, 1], [], []>} : vector<64x32xf32>, vector<32x32xf32>, vector<64x32xf32> -> vector<64x32xf32>
    %363 = vector.broadcast %360 : vector<1x32xf32> to vector<64x32xf32>
    %364 = arith.addf %362, %363 : vector<64x32xf32>
    %cst_108 = arith.constant 0.000000e+00 : f32
    %365 = vector.broadcast %cst_108 : f32 to vector<64x32xf32>
    %366 = arith.maximumf %364, %365 : vector<64x32xf32>
    %367 = vector.shape_cast %366 : vector<64x32xf32> to vector<8x8x32xf32>
    %c192 = arith.constant 192 : index
    %c0_109 = arith.constant 0 : index
    %368 = vector.load %arg1[%c192, %c0_109] : memref<288x32xf32, #tpu.memory_space<vmem>>, vector<8x32xf32>
    %c200 = arith.constant 200 : index
    %c0_110 = arith.constant 0 : index
    %369 = vector.load %arg1[%c200, %c0_110] : memref<288x32xf32, #tpu.memory_space<vmem>>, vector<8x32xf32>
    %370 = vector.shape_cast %368 : vector<8x32xf32> to vector<1x8x32xf32>
    %371 = vector.broadcast %370 : vector<1x8x32xf32> to vector<8x8x32xf32>
    %372 = arith.mulf %371, %192 : vector<8x8x32xf32>
    %373 = vector.shape_cast %369 : vector<8x32xf32> to vector<1x8x32xf32>
    %374 = vector.broadcast %373 : vector<1x8x32xf32> to vector<8x8x32xf32>
    %375 = arith.mulf %374, %367 : vector<8x8x32xf32>
    %376 = arith.addf %372, %375 : vector<8x8x32xf32>
    %377 = vector.shape_cast %376 : vector<8x8x32xf32> to vector<64x32xf32>
    %cst_111 = arith.constant dense<0.000000e+00> : vector<64x8xf32>
    %378 = tpu.matmul %377, %253, %cst_111 {dimension_numbers = #tpu.dot_dimension_numbers<[1], [1], [0], [0], [0, 0, 1, 0], [], []>} : vector<64x32xf32>, vector<8x32xf32>, vector<64x8xf32> -> vector<64x8xf32>
    %cst_112 = arith.constant dense<0xFF800000> : vector<64xf32>
    %379 = vector.multi_reduction <maximumf>, %378, %cst_112 [1] : vector<64x8xf32> to vector<64xf32>
    %380 = vector.shape_cast %379 : vector<64xf32> to vector<64x1xf32>
    %381 = vector.broadcast %380 : vector<64x1xf32> to vector<64x8xf32>
    %382 = arith.subf %378, %381 : vector<64x8xf32>
    %383 = math.exp %382 : vector<64x8xf32>
    %cst_113 = arith.constant dense<0.000000e+00> : vector<64xf32>
    %384 = vector.multi_reduction <add>, %383, %cst_113 [1] : vector<64x8xf32> to vector<64xf32>
    %385 = vector.shape_cast %384 : vector<64xf32> to vector<64x1xf32>
    %386 = tpu.reciprocal %385 {approx = true} : vector<64x1xf32> -> vector<64x1xf32>
    %387 = arith.mulf %385, %386 : vector<64x1xf32>
    %cst_114 = arith.constant 2.000000e+00 : f32
    %388 = vector.broadcast %cst_114 : f32 to vector<64x1xf32>
    %389 = arith.subf %388, %387 : vector<64x1xf32>
    %390 = arith.mulf %386, %389 : vector<64x1xf32>
    %391 = vector.broadcast %390 : vector<64x1xf32> to vector<64x8xf32>
    %392 = arith.mulf %383, %391 : vector<64x8xf32>
    %393 = vector.shape_cast %392 : vector<64x8xf32> to vector<8x8x8xf32>
    "tpu.trace_start"() <{level = 10 : i32, message = "bpn,bnc->bpc"}> : () -> ()
    %cst_115 = arith.constant dense<0.000000e+00> : vector<8x8x32xf32>
    %394 = tpu.matmul %393, %358, %cst_115 {dimension_numbers = #tpu.dot_dimension_numbers<[2], [1], [1], [2], [0, 0, 0, 1, 1, 2], [0], [0]>} : vector<8x8x8xf32>, vector<8x8x32xf32>, vector<8x8x32xf32> -> vector<8x8x32xf32>
    "tpu.trace_stop"() : () -> ()
    %395 = vector.broadcast %4 : vector<1x1x32xf32> to vector<8x8x32xf32>
    %396 = arith.mulf %394, %395 : vector<8x8x32xf32>
    %cst_116 = arith.constant dense<0.000000e+00> : vector<8x8xf32>
    %397 = vector.multi_reduction <add>, %396, %cst_116 [2] : vector<8x8x32xf32> to vector<8x8xf32>
    %398 = vector.shape_cast %397 : vector<8x8xf32> to vector<8x8x1xf32>
    %399 = vector.broadcast %6 : vector<1x1x1xf32> to vector<8x8x1xf32>
    %400 = arith.addf %398, %399 : vector<8x8x1xf32>
    %cst_117 = arith.constant dense<0xFF800000> : vector<8x1xf32>
    %401 = vector.multi_reduction <maximumf>, %400, %cst_117 [1] : vector<8x8x1xf32> to vector<8x1xf32>
    %402 = vector.shape_cast %401 : vector<8x1xf32> to vector<8x1x1xf32>
    %403 = vector.broadcast %402 : vector<8x1x1xf32> to vector<8x8x1xf32>
    %404 = arith.subf %400, %403 : vector<8x8x1xf32>
    %405 = math.exp %404 : vector<8x8x1xf32>
    %cst_118 = arith.constant dense<0.000000e+00> : vector<8x1xf32>
    %406 = vector.multi_reduction <add>, %405, %cst_118 [1] : vector<8x8x1xf32> to vector<8x1xf32>
    %407 = vector.shape_cast %406 : vector<8x1xf32> to vector<8x1x1xf32>
    %408 = tpu.reciprocal %407 {approx = true} : vector<8x1x1xf32> -> vector<8x1x1xf32>
    %409 = arith.mulf %407, %408 : vector<8x1x1xf32>
    %cst_119 = arith.constant 2.000000e+00 : f32
    %410 = vector.broadcast %cst_119 : f32 to vector<8x1x1xf32>
    %411 = arith.subf %410, %409 : vector<8x1x1xf32>
    %412 = arith.mulf %408, %411 : vector<8x1x1xf32>
    %413 = vector.broadcast %412 : vector<8x1x1xf32> to vector<8x8x1xf32>
    %414 = arith.mulf %405, %413 : vector<8x8x1xf32>
    %415 = vector.broadcast %414 : vector<8x8x1xf32> to vector<8x8x32xf32>
    %416 = arith.mulf %415, %394 : vector<8x8x32xf32>
    %cst_120 = arith.constant dense<0.000000e+00> : vector<8x32xf32>
    %417 = vector.multi_reduction <add>, %416, %cst_120 [1] : vector<8x8x32xf32> to vector<8x32xf32>
    %418 = arith.addf %216, %417 : vector<8x32xf32>
    %cst_121 = arith.constant 5.000000e-01 : f32
    %419 = vector.broadcast %cst_121 : f32 to vector<8x32xf32>
    %420 = arith.mulf %418, %419 : vector<8x32xf32>
    %cst_122 = arith.constant dense<0.000000e+00> : vector<8x32xf32>
    %421 = tpu.matmul %420, %7, %cst_122 {dimension_numbers = #tpu.dot_dimension_numbers<[1], [0], [0], [1], [0, 0, 1, 1], [], []>} : vector<8x32xf32>, vector<32x32xf32>, vector<8x32xf32> -> vector<8x32xf32>
    %422 = vector.broadcast %8 : vector<1x32xf32> to vector<8x32xf32>
    %423 = arith.addf %421, %422 : vector<8x32xf32>
    %424 = vector.extract_strided_slice %423 {offsets = [0, 0], sizes = [8, 8], strides = [1, 1]} : vector<8x32xf32> to vector<8x8xf32>
    %c0_123 = arith.constant 0 : index
    %c0_124 = arith.constant 0 : index
    %425 = vector.load %arg2[%c0_123, %c0_124] : memref<8x8xf32, #tpu.memory_space<vmem>>, vector<8x8xf32>
    tpu.vector_store %arg2[%c0_123, %c0_124], %424 {strides = array<i32>} : memref<8x8xf32, #tpu.memory_space<vmem>>, vector<8x8xf32>,
    return
  }
}

</mosaic_0001>

<bundles_post_ra>
// kernel: trompt_forward.1
= control target key start
LH: loop header
LB: loop body
LE: loop exit
PB: predicated region body
PF: predicated region fallthrough
CT: control target
= control target key end

     0   :  { %v3472_v2 = vmov 0   ;;  %s5341_s0 = inlined_call_operand.vmem [shape: f32[8,8,1], index: 0, kind: input, shape index: {}]   ;;  %s5342_s1 = inlined_call_operand.vmem [shape: f32[288,32], index: 1, kind: input, shape index: {}]   ;;  %s5343_s2 = inlined_call_operand.hbm [shape: f32[8,8], index: 2, kind: output, shape index: {}]  }
   0x1   :  { %v14_v0 = vld [vmem:[%s5341_s0 + $0x10] sm:$0xff]  ;;  %v12_v1 = vld [vmem:[%s5341_s0] sm:$0xff]  ;;  %3241 = vset.pattern.permute.xlu1 %v3472_v2  ;;  %3240 = vset.pattern.permute.xlu0 %v3472_v2 }
   0x2   :  { %32 = vperm.xlu1 %3241, %v14_v0   ;;  %22 = vperm.xlu0 %3240, %v12_v1   ;;  %v16_v3 = vld [vmem:[%s5341_s0 + $0x20] sm:$0xff] }
   0x3   :  { %3242 = vset.pattern.permute.xlu2 %v3472_v2 }
   0x4   :  { %42 = vperm.xlu2 %3242, %v16_v3  }
   0x5   :  { %7 = vsyncpa [#allocation3], 0  ;;  %v15_v4 = vld [vmem:[%s5341_s0 + $0x18] sm:$0xff]  ;;  %v13_v5 = vld [vmem:[%s5341_s0 + $0x8] sm:$0xff]  ;;  %vm98_vm0 = vcmask 261120   ;;  %v3473_v56 = vmov 32.0  }
   0x6   :  { %v17_v6 = vld [vmem:[%s5341_s0 + $0x28] sm:$0xff]  ;;  %v18_v7 = vld [vmem:[%s5341_s0 + $0x30] sm:$0xff]  ;;  %v19_v8 = vld [vmem:[%s5341_s0 + $0x38] sm:$0xff]  ;;  %3252 = vrcp.f32 %v3473_v56  ;;  %s3474_s10 = smov [#allocation2]   ;;  %s3177_s14 = sshll.u32 %s5343_s2, 4  ;;  %s3178_s14 = int_to_ptr.hbm [resolvable:$true] %s3177_s14 }
   0x7   :  { %v820_v9 = vld [vmem:[%s5342_s1 + $0x40] sm:$0xff]  ;;  %v819_v10 = vld [vmem:[%s5342_s1 + $0x38] sm:$0xff]  ;;  %v818_v11 = vld [vmem:[%s5342_s1 + $0x30] sm:$0xff]  ;;  %s3175_s11 = sshll.u32 %s3474_s10, 4  ;;  %s3176_s11 = int_to_ptr.vmem [resolvable:$true] %s3175_s11 }
   0x8   :  { %838 = vmatpush.msra.mxu0 %v820_v9  ;;  %v817_v12 = vld [vmem:[%s5342_s1 + $0x28] sm:$0xff]  ;;  %v70_v13 = vld [vmem:[%s5342_s1] sm:$0xff] }
   0x9   :  { %v71_v17 = vld [vmem:[%s5342_s1 + $0x8] sm:$0xff]  ;;  %v3541_v18 = vld [vmem:[%s5342_s1 + $0xe0] sm:$0xff] }
   0xa   :  { %37 = vperm.xlu1 %3241, %v15_v4   ;;  %27 = vperm.xlu0 %3240, %v13_v5   ;;  %v3628_v3 = vld [vmem:[%s5342_s1 + $0x48] ss:$0 sm:$0xff] }
   0xb   :  { %839 = vmatpush.msra.mxu0 %v819_v10  ;;  %v3642_v10 = vld [vmem:[%s5342_s1 + $0x58] sm:$0xff] }
   0xc   :  { %47 = vperm.xlu2 %3242, %v17_v6   ;;  %v3253_v57 = vpop.eup %3252 }
   0xd   :  { %840 = vmatpush.msra.mxu0 %v818_v11  ;;  %v124_v58 = vmul.f32 32.0, %v3253_v57  ;;  %vm128_vm1 = vweird.f32 %v3253_v57 }
   0xf   :  { %841 = vmatpush.msra.mxu0 %v817_v12  ;;  %v125_v59 = vsub.f32 1.0, %v124_v58 }
  0x10   :  { %3186 = vmatmul.msk.f32.vlgmr.msra.gmra.mxu0 %vm98_vm0, %v3541_v18 }
  0x11   :  { %v126_v60 = vmul.f32 %v3253_v57, %v125_v59 }
  0x12   :  { %52 = vperm.xlu1 %3241, %v18_v7  }
  0x13   :  { %v127_v61 = vadd.f32 %v3253_v57, %v126_v60 }
  0x15   :  { %v3621_v62 = vsel %vm128_vm1, %v3253_v57, %v127_v61 }
  0x18   :  { %3187 = vmatmul.msk.f32.gmra.mxu0 %vm98_vm0, %v3541_v18 }
  0x1a   :  { %57 = vperm.xlu1 %3241, %v19_v8  }
  0x20   :  { %3188 = vmatmul.msk.f32.gmra.mxu0 %vm98_vm0, %v3541_v18 }
  0x28   :  { %3189 = vmatmul.msk.f32.gmra.mxu0 %vm98_vm0, %v3541_v18 }
  0x30   :  { %3190 = vmatmul.msk.f32.gmra.mxu0 %vm98_vm0, %v3541_v18 }
  0x38   :  { %3191 = vmatmul.msk.f32.gmra.mxu0 %vm98_vm0, %v3541_v18 }
  0x40   :  { %3192 = vmatmul.msk.f32.gmra.mxu0 %vm98_vm0, %v3541_v18 }
  0x48   :  { %3193 = vmatmul.msk.f32.gmra.mxu0 %vm98_vm0, %v3541_v18 }
  0x5e   :  { %v3529_v14 = vpop.permute.xlu2 %42 }
  0x5f   :  { %v78_v21 = vmul.f32 %v70_v13, %v3529_v14 }
  0x61   :  { %v3554_v26 = vadd.f32 %v78_v21, %v71_v17 }
  0x63   :  { %v94_v33 = vmax.f32 %v3554_v26, 0.0 }
  0x65   :  { %v111_v35 = vsel %vm98_vm0, %v94_v33, 0.0 }
  0x66   :  { %v3575_v38 = vpop.permute.xlu2 %47 }
  0x67   :  { %v79_v41 = vmul.f32 %v70_v13, %v3575_v38 }
  0x69   :  { %v3589_v44 = vadd.f32 %v79_v41, %v71_v17 }
  0x6b   :  { %v95_v47 = vmax.f32 %v3589_v44, 0.0 }
  0x6d   :  { %v114_v51 = vsel %vm98_vm0, %v95_v47, 0.0 }
  0x74   :  { %v3531_v15 = vpop.permute.xlu1 %32  ;;  %v3533_v16 = vpop.permute.xlu0 %22 }
  0x75   :  { %v76_v19 = vmul.f32 %v70_v13, %v3531_v15  ;;  %v74_v20 = vmul.f32 %v70_v13, %v3533_v16 }
  0x77   :  { %v3548_v22 = vadd.f32 %v76_v19, %v71_v17  ;;  %v3550_v23 = vadd.f32 %v74_v20, %v71_v17 }
  0x79   :  { %v92_v24 = vmax.f32 %v3548_v22, 0.0  ;;  %v90_v25 = vmax.f32 %v3550_v23, 0.0  ;;  %v3653_v22 = vld [vmem:[%s5342_s1 + $0x20] sm:$0xff] }
  0x7a   :  { %3194 = vmatpush.xpose.msk.msra.mxu1 %vm98_vm0, %v3653_v22 }
  0x7b   :  { %v105_v27 = vsel %vm98_vm0, %v92_v24, 0.0  ;;  %v99_v28 = vsel %vm98_vm0, %v90_v25, 0.0 }
  0x7c   :  { %106 = vadd.xlane.f32.xlu1 %v105_v27  ;;  %v3558_v29 = vpop.permute.xlu1 %37  ;;  %100 = vadd.xlane.f32.xlu0 %v99_v28  ;;  %v3560_v30 = vpop.permute.xlu0 %27 }
  0x7d   :  { %v77_v31 = vmul.f32 %v70_v13, %v3558_v29  ;;  %v75_v32 = vmul.f32 %v70_v13, %v3560_v30 }
  0x7f   :  { %v3567_v34 = vadd.f32 %v75_v32, %v71_v17  ;;  %v3573_v37 = vadd.f32 %v77_v31, %v71_v17 }
  0x81   :  { %v91_v36 = vmax.f32 %v3567_v34, 0.0  ;;  %v93_v42 = vmax.f32 %v3573_v37, 0.0 }
  0x83   :  { %v102_v39 = vsel %vm98_vm0, %v91_v36, 0.0  ;;  %v108_v43 = vsel %vm98_vm0, %v93_v42, 0.0 }
  0x84   :  { %v3580_v40 = vpop.permute.xlu1 %52  ;;  %112 = vadd.xlane.f32.xlu0 %v111_v35  ;;  %103 = vadd.xlane.f32.xlu2 %v102_v39 }
  0x85   :  { %v80_v48 = vmul.f32 %v70_v13, %v3580_v40 }
  0x87   :  { %v3607_v53 = vadd.f32 %v80_v48, %v71_v17 }
  0x89   :  { %v96_v54 = vmax.f32 %v3607_v53, 0.0 }
  0x8b   :  { %v117_v55 = vsel %vm98_vm0, %v96_v54, 0.0 }
  0x8c   :  { %v3591_v45 = vpop.permute.xlu1 %57  ;;  %109 = vadd.xlane.f32.xlu2 %v108_v43 }
  0x8d   :  { %v81_v46 = vmul.f32 %v70_v13, %v3591_v45  ;;  %v843_v6 = vpop.f32.mrf.mxu0 }
  0x8e   :  { %v844_v7 = vadd.f32 %v3628_v3, %v843_v6 }
  0x8f   :  { %v3598_v49 = vadd.f32 %v81_v46, %v71_v17  ;;  %v875_v17 = vld [vmem:[%s5342_s1 + $0x50] sm:$0xff] }
  0x90   :  { %v867_v11 = vmax.f32 %v844_v7, 0.0  ;;  %v3656_v23 = vmul.f32 %v875_v17, %v3541_v18 }
  0x91   :  { %v97_v50 = vmax.f32 %v3598_v49, 0.0 }
  0x92   :  { %v878_v21 = vmul.f32 %v3642_v10, %v867_v11 }
  0x93   :  { %v120_v52 = vsel %vm98_vm0, %v97_v50, 0.0 }
  0x94   :  { %121 = vadd.xlane.f32.xlu1 %v120_v52  ;;  %115 = vadd.xlane.f32.xlu2 %v114_v51  ;;  %v886_v27 = vadd.f32 %v878_v21, %v3656_v23 }
  0x95   :  { %v846_v32 = vpop.f32.mrf.mxu0 }
  0x96   :  { %v847_v18 = vadd.f32 %v3628_v3, %v846_v32  ;;  %3195 = vmatmul.msk.f32.vlgmr.msra.gmra.mxu1 %vm98_vm0, %v886_v27 }
  0x98   :  { %v868_v41 = vmax.f32 %v847_v18, 0.0 }
  0x9a   :  { %v879_v26 = vmul.f32 %v3642_v10, %v868_v41 }
  0x9c   :  { %118 = vadd.xlane.f32.xlu2 %v117_v55  ;;  %v887_v46 = vadd.f32 %v879_v26, %v3656_v23 }
  0x9d   :  { %v849_v51 = vpop.f32.mrf.mxu0 }
  0x9e   :  { %v850_v52 = vadd.f32 %v3628_v3, %v849_v51  ;;  %3196 = vmatmul.msk.f32.gmra.mxu1 %vm98_vm0, %v887_v46 }
  0xa0   :  { %v869_v56 = vmax.f32 %v850_v52, 0.0 }
  0xa2   :  { %v880_v60 = vmul.f32 %v3642_v10, %v869_v56 }
  0xa4   :  { %v888_v61 = vadd.f32 %v880_v60, %v3656_v23 }
  0xa6   :  { %3197 = vmatmul.msk.f32.gmra.mxu1 %vm98_vm0, %v888_v61 }
  0xef   :  { %v107_v63 = vpop.xlane.xlu1 %106  ;;  %v101_v0 = vpop.xlane.xlu0 %100 }
  0xf0   :  { %v132_v1 = vmul.f32 %v3621_v62, %v107_v63  ;;  %v130_v2 = vmul.f32 %v3621_v62, %v101_v0 }
  0xf2   :  { %v3630_v4 = vsub.f32 %v92_v24, %v132_v1  ;;  %v3632_v5 = vsub.f32 %v90_v25, %v130_v2  ;;  %v852_v1 = vpop.f32.mrf.mxu0 }
  0xf3   :  { %v853_v2 = vadd.f32 %v3628_v3, %v852_v1 }
  0xf4   :  { %v148_v8 = vmul.f32 %v3630_v4, %v3630_v4  ;;  %v146_v9 = vmul.f32 %v3632_v5, %v3632_v5 }
  0xf6   :  { %v160_v12 = vsel %vm98_vm0, %v148_v8, 0.0  ;;  %v154_v13 = vsel %vm98_vm0, %v146_v9, 0.0  ;;  %v870_v8 = vmax.f32 %v853_v2, 0.0 }
  0xf7   :  { %161 = vadd.xlane.f32.xlu2 %v160_v12  ;;  %v104_v19 = vpop.xlane.xlu2 %103  ;;  %155 = vadd.xlane.f32.xlu0 %v154_v13  ;;  %v113_v20 = vpop.xlane.xlu0 %112 }
  0xf8   :  { %v131_v24 = vmul.f32 %v3621_v62, %v104_v19  ;;  %v134_v25 = vmul.f32 %v3621_v62, %v113_v20 }
  0xfa   :  { %v3665_v28 = vsub.f32 %v91_v36, %v131_v24  ;;  %v3669_v31 = vsub.f32 %v94_v33, %v134_v25  ;;  %v855_v19 = vpop.f32.mrf.mxu0 }
  0xfb   :  { %v856_v20 = vadd.f32 %v3628_v3, %v855_v19 }
  0xfc   :  { %v147_v35 = vmul.f32 %v3665_v28, %v3665_v28  ;;  %v150_v39 = vmul.f32 %v3669_v31, %v3669_v31 }
  0xfd   :  { %v871_v21 = vmax.f32 %v856_v20, 0.0 }
  0xfe   :  { %v157_v34 = vsel %vm98_vm0, %v147_v35, 0.0  ;;  %v166_v36 = vsel %vm98_vm0, %v150_v39, 0.0 }
  0xff   :  { %v110_v43 = vpop.xlane.xlu2 %109  ;;  %158 = vadd.xlane.f32.xlu0 %v157_v34  ;;  %167 = vadd.xlane.f32.xlu1 %v166_v36 }
 0x100   :  { %v133_v33 = vmul.f32 %v3621_v62, %v110_v43 }
 0x102   :  { %v3684_v48 = vsub.f32 %v93_v42, %v133_v33  ;;  %v858_v39 = vpop.f32.mrf.mxu0 }
 0x103   :  { %v859_v41 = vadd.f32 %v3628_v3, %v858_v39  ;;  %v3765_v39 = vld [vmem:[%s5342_s1 + $0x18] ss:$0 sm:$0xff] }
 0x104   :  { %v149_v55 = vmul.f32 %v3684_v48, %v3684_v48 }
 0x105   :  { %v872_v43 = vmax.f32 %v859_v41, 0.0 }
 0x106   :  { %v163_v57 = vsel %vm98_vm0, %v149_v55, 0.0 }
 0x107   :  { %v122_v58 = vpop.xlane.xlu1 %121  ;;  %v116_v59 = vpop.xlane.xlu2 %115  ;;  %164 = vadd.xlane.f32.xlu0 %v163_v57  ;;  %v883_v46 = vmul.f32 %v3642_v10, %v872_v43 }
 0x108   :  { %v137_v37 = vmul.f32 %v3621_v62, %v122_v58  ;;  %v135_v42 = vmul.f32 %v3621_v62, %v116_v59 }
 0x109   :  { %v891_v58 = vadd.f32 %v883_v46, %v3656_v23 }
 0x10a   :  { %v3697_v63 = vsub.f32 %v97_v50, %v137_v37  ;;  %v3701_v0 = vsub.f32 %v95_v47, %v135_v42  ;;  %v881_v47 = vmul.f32 %v3642_v10, %v870_v8  ;;  %v861_v60 = vpop.f32.mrf.mxu0 }
 0x10b   :  { %v862_v42 = vadd.f32 %v3628_v3, %v861_v60 }
 0x10c   :  { %v151_v6 = vmul.f32 %v3701_v0, %v3701_v0  ;;  %v153_v7 = vmul.f32 %v3697_v63, %v3697_v63  ;;  %v889_v11 = vadd.f32 %v881_v47, %v3656_v23 }
 0x10e   :  { %v169_v49 = vsel %vm98_vm0, %v151_v6, 0.0  ;;  %v175_v50 = vsel %vm98_vm0, %v153_v7, 0.0  ;;  %3198 = vmatmul.msk.f32.gmra.mxu1 %vm98_vm0, %v889_v11  ;;  %v873_v6 = vmax.f32 %v862_v42, 0.0 }
 0x10f   :  { %170 = vadd.xlane.f32.xlu2 %v169_v49  ;;  %v119_v44 = vpop.xlane.xlu2 %118  ;;  %176 = vadd.xlane.f32.xlu1 %v175_v50 }
 0x110   :  { %v136_v9 = vmul.f32 %v3621_v62, %v119_v44  ;;  %v884_v50 = vmul.f32 %v3642_v10, %v873_v6 }
 0x112   :  { %v3716_v12 = vsub.f32 %v96_v54, %v136_v9  ;;  %v882_v54 = vmul.f32 %v3642_v10, %v871_v21  ;;  %v892_v19 = vadd.f32 %v884_v50, %v3656_v23 }
 0x114   :  { %v152_v13 = vmul.f32 %v3716_v12, %v3716_v12  ;;  %v890_v35 = vadd.f32 %v882_v54, %v3656_v23 }
 0x116   :  { %v172_v17 = vsel %vm98_vm0, %v152_v13, 0.0  ;;  %3199 = vmatmul.msk.f32.gmra.mxu1 %vm98_vm0, %v890_v35 }
 0x117   :  { %173 = vadd.xlane.f32.xlu0 %v172_v17 }
 0x11e   :  { %3200 = vmatmul.msk.f32.gmra.mxu1 %vm98_vm0, %v891_v58 }
 0x126   :  { %3201 = vmatmul.msk.f32.gmra.mxu1 %vm98_vm0, %v892_v19 }
 0x16a   :  { %v162_v24 = vpop.xlane.xlu2 %161  ;;  %v156_v25 = vpop.xlane.xlu0 %155 }
 0x16b   :  { %v180_v27 = vmul.f32 %v162_v24, %v3621_v62  ;;  %v178_v53 = vmul.f32 %v156_v25, %v3621_v62  ;;  %v3755_v24 = vld [vmem:[%s5342_s1 + $0x10] ss:$0 sm:$0xff]  ;;  %v864_v25 = vpop.f32.mrf.mxu0 }
 0x16c   :  { %v865_v54 = vadd.f32 %v3628_v3, %v864_v25 }
 0x16d   :  { %v188_v32 = vadd.f32 1e-05, %v180_v27  ;;  %v186_v18 = vadd.f32 1e-05, %v178_v53 }
 0x16f   :  { %3254 = vrsqrt.f32 %v188_v32  ;;  %vm220_vm4 = vweird.f32 %v188_v32  ;;  %vm200_vm6 = vweird.f32 %v186_v18 }
 0x170   :  { %3256 = vrsqrt.f32 %v186_v18 }
 0x172   :  { %v168_v34 = vpop.xlane.xlu1 %167  ;;  %v159_v36 = vpop.xlane.xlu0 %158 }
 0x173   :  { %v182_v26 = vmul.f32 %v168_v34, %v3621_v62  ;;  %v179_v33 = vmul.f32 %v159_v36, %v3621_v62 }
 0x175   :  { %v3255_v51 = vpop.eup %3254  ;;  %v3732_v52 = vadd.f32 1e-05, %v182_v26  ;;  %v3734_v55 = vadd.f32 1e-05, %v179_v33  ;;  %v874_v26 = vmax.f32 %v865_v54, 0.0  ;;  %v3815_v54 = vpop.f32.mrf.mxu1 }
 0x176   :  { %v3257_v56 = vpop.eup %3256  ;;  %v215_v57 = vmul.f32 %v3255_v51, %v188_v32  ;;  %vm221_vm2 = vweird.f32 %v3255_v51 }
 0x177   :  { %v195_v59 = vmul.f32 %v3257_v56, %v186_v18  ;;  %3258 = vrsqrt.f32 %v3732_v52  ;;  %vm201_vm3 = vweird.f32 %v3257_v56  ;;  %vm222_vm5 = vmor %vm220_vm4, %vm221_vm2  ;;  %vm240_vm10 = vweird.f32 %v3732_v52 }
 0x178   :  { %v216_v37 = vmul.f32 %v3255_v51, %v215_v57  ;;  %3260 = vrsqrt.f32 %v3734_v55  ;;  %vm202_vm7 = vmor %vm200_vm6, %vm201_vm3  ;;  %v885_v57 = vmul.f32 %v3642_v10, %v874_v26  ;;  %vm210_vm12 = vweird.f32 %v3734_v55 }
 0x179   :  { %v196_v61 = vmul.f32 %v3257_v56, %v195_v59 }
 0x17a   :  { %v217_v1 = vmul.f32 0.5, %v216_v37  ;;  %v165_v2 = vpop.xlane.xlu0 %164 }
 0x17b   :  { %v197_v7 = vmul.f32 0.5, %v196_v61  ;;  %v181_v8 = vmul.f32 %v165_v2, %v3621_v62 }
 0x17c   :  { %v218_v49 = vsub.f32 1.5, %v217_v1 }
 0x17d   :  { %v3743_v44 = vpop.eup %3258  ;;  %v198_v47 = vsub.f32 1.5, %v197_v7  ;;  %v3745_v9 = vadd.f32 1e-05, %v181_v8  ;;  %v3836_v10 = vpop.f32.mrf.mxu1 }
 0x17e   :  { %v3261_v11 = vpop.eup %3260  ;;  %v219_v13 = vmul.f32 %v3255_v51, %v218_v49  ;;  %v235_v17 = vmul.f32 %v3743_v44, %v3732_v52  ;;  %vm241_vm8 = vweird.f32 %v3743_v44 }
 0x17f   :  { %v199_v20 = vmul.f32 %v3257_v56, %v198_v47  ;;  %v205_v21 = vmul.f32 %v3261_v11, %v3734_v55  ;;  %3262 = vrsqrt.f32 %v3745_v9  ;;  %vm211_vm9 = vweird.f32 %v3261_v11  ;;  %vm3785_vm11 = vmor %vm240_vm10, %vm241_vm8 }
 0x180   :  { %v223_v27 = vsel %vm222_vm5, %v3255_v51, %v219_v13  ;;  %v236_v53 = vmul.f32 %v3743_v44, %v235_v17  ;;  %vm212_vm13 = vmor %vm210_vm12, %vm211_vm9  ;;  %v893_v55 = vadd.f32 %v885_v57, %v3656_v23  ;;  %vm230_vm15 = vweird.f32 %v3745_v9 }
 0x181   :  { %v203_v32 = vsel %vm202_vm7, %v3257_v56, %v199_v20  ;;  %v206_v18 = vmul.f32 %v3261_v11, %v205_v21  ;;  %v276_v35 = vmul.f32 %v223_v27, %v3630_v4  ;;  %vm962_vm9 = vcmask 64512  }
 0x182   :  { %v237_v41 = vmul.f32 0.5, %v236_v53  ;;  %v171_v34 = vpop.xlane.xlu2 %170  ;;  %v177_v36 = vpop.xlane.xlu1 %176  ;;  %v274_v43 = vmul.f32 %v203_v32, %v3632_v5  ;;  %3202 = vmatmul.msk.f32.gmra.mxu1 %vm98_vm0, %v893_v55 }
 0x183   :  { %v207_v3 = vmul.f32 0.5, %v206_v18  ;;  %v183_v33 = vmul.f32 %v171_v34, %v3621_v62  ;;  %v185_v46 = vmul.f32 %v177_v36, %v3621_v62  ;;  %v285_v4 = vmul.f32 %v3755_v24, %v276_v35 }
 0x184   :  { %v238_v51 = vsub.f32 1.5, %v237_v41  ;;  %v283_v56 = vmul.f32 %v3755_v24, %v274_v43 }
 0x185   :  { %v3263_v58 = vpop.eup %3262  ;;  %v208_v59 = vsub.f32 1.5, %v207_v3  ;;  %v3774_v60 = vadd.f32 1e-05, %v183_v33  ;;  %v3776_v37 = vadd.f32 1e-05, %v185_v46  ;;  %v294_v5 = vadd.f32 %v3765_v39, %v285_v4 }
 0x186   :  { %v239_v42 = vmul.f32 %v3743_v44, %v238_v51  ;;  %v225_v61 = vmul.f32 %v3263_v58, %v3745_v9  ;;  %v292_v1 = vadd.f32 %v3765_v39, %v283_v56  ;;  %vm231_vm14 = vweird.f32 %v3263_v58 }
 0x187   :  { %v209_v2 = vmul.f32 %v3261_v11, %v208_v59  ;;  %3264 = vrsqrt.f32 %v3774_v60  ;;  %v3797_v7 = vadd.f32 %v3653_v22, %v294_v5  ;;  %vm232_vm1 = vmor %vm230_vm15, %vm231_vm14  ;;  %vm250_vm4 = vweird.f32 %v3774_v60 }
 0x188   :  { %v243_v6 = vsel %vm3785_vm11, %v3743_v44, %v239_v42  ;;  %v226_v52 = vmul.f32 %v3263_v58, %v225_v61  ;;  %3266 = vrsqrt.f32 %v3776_v37  ;;  %v3800_v49 = vadd.f32 %v3653_v22, %v292_v1 }
 0x189   :  { %v213_v8 = vsel %vm212_vm13, %v3261_v11, %v209_v2  ;;  %v317_v47 = vsel %vm98_vm0, %v3797_v7, 0.0  ;;  %v278_v17 = vmul.f32 %v243_v6, %v3669_v31  ;;  %vm270_vm6 = vweird.f32 %v3776_v37 }
 0x18a   :  { %v227_v50 = vmul.f32 0.5, %v226_v52  ;;  %v174_v13 = vpop.xlane.xlu0 %173  ;;  %v275_v44 = vmul.f32 %v213_v8, %v3665_v28  ;;  %318 = vadd.xlane.f32.xlu1 %v317_v47  ;;  %v311_v19 = vsel %vm98_vm0, %v3800_v49, 0.0 }
 0x18b   :  { %v184_v11 = vmul.f32 %v174_v13, %v3621_v62  ;;  %312 = vadd.xlane.f32.xlu2 %v311_v19  ;;  %v287_v32 = vmul.f32 %v3755_v24, %v278_v17  ;;  %v963_v17 = vsel %vm962_vm9, %v3815_v54, -inf }
 0x18c   :  { %v228_v20 = vsub.f32 1.5, %v227_v50  ;;  %v284_v23 = vmul.f32 %v3755_v24, %v275_v44 }
 0x18d   :  { %v3265_v21 = vpop.eup %3264  ;;  %v192_v25 = vadd.f32 1e-05, %v184_v11  ;;  %v296_v3 = vadd.f32 %v3765_v39, %v287_v32 }
 0x18e   :  { %v3267_v28 = vpop.eup %3266  ;;  %v229_v27 = vmul.f32 %v3263_v58, %v228_v20  ;;  %v245_v31 = vmul.f32 %v3265_v21, %v3774_v60  ;;  %v293_v53 = vadd.f32 %v3765_v39, %v284_v23  ;;  %vm251_vm2 = vweird.f32 %v3265_v21  ;;  %v3856_v23 = vpop.f32.mrf.mxu1 }
 0x18f   :  { %v265_v18 = vmul.f32 %v3267_v28, %v3776_v37  ;;  %3268 = vrsqrt.f32 %v192_v25  ;;  %vm271_vm3 = vweird.f32 %v3267_v28  ;;  %v3830_v59 = vadd.f32 %v3653_v22, %v296_v3  ;;  %vm252_vm5 = vmor %vm250_vm4, %vm251_vm2 }
 0x190   :  { %v233_v35 = vsel %vm232_vm1, %v3263_v58, %v229_v27  ;;  %v246_v41 = vmul.f32 %v3265_v21, %v245_v31  ;;  %v3820_v34 = vadd.f32 %v3653_v22, %v293_v53  ;;  %vm272_vm7 = vmor %vm270_vm6, %vm271_vm3  ;;  %vm260_vm10 = vweird.f32 %v192_v25 }
 0x191   :  { %v266_v9 = vmul.f32 %v3267_v28, %v265_v18  ;;  %v277_v36 = vmul.f32 %v233_v35, %v3684_v48  ;;  %v323_v8 = vsel %vm98_vm0, %v3830_v59, 0.0  ;;  %v966_v27 = vsel %vm962_vm9, %v3836_v10, -inf }
 0x192   :  { %v247_v43 = vmul.f32 0.5, %v246_v41  ;;  %v314_v26 = vsel %vm98_vm0, %v3820_v34, 0.0  ;;  %v969_v32 = vsel %vm962_vm9, %v3856_v23, -inf }
 0x193   :  { %v267_v33 = vmul.f32 0.5, %v266_v9  ;;  %315 = vadd.xlane.f32.xlu0 %v314_v26  ;;  %v286_v46 = vmul.f32 %v3755_v24, %v277_v36 }
 0x194   :  { %v248_v4 = vsub.f32 1.5, %v247_v43 }
 0x195   :  { %v3269_v51 = vpop.eup %3268  ;;  %v268_v56 = vsub.f32 1.5, %v267_v33  ;;  %v295_v57 = vadd.f32 %v3765_v39, %v286_v46 }
 0x196   :  { %v249_v58 = vmul.f32 %v3265_v21, %v248_v4  ;;  %v255_v48 = vmul.f32 %v3269_v51, %v192_v25  ;;  %vm261_vm8 = vweird.f32 %v3269_v51 }
 0x197   :  { %v269_v5 = vmul.f32 %v3267_v28, %v268_v56  ;;  %v3834_v42 = vadd.f32 %v3653_v22, %v295_v57  ;;  %vm262_vm11 = vmor %vm260_vm10, %vm261_vm8 }
 0x198   :  { %v253_v61 = vsel %vm252_vm5, %v3265_v21, %v249_v58  ;;  %v256_v1 = vmul.f32 %v3269_v51, %v255_v48 }
 0x199   :  { %v273_v2 = vsel %vm272_vm7, %v3267_v28, %v269_v5  ;;  %v320_v60 = vsel %vm98_vm0, %v3834_v42, 0.0  ;;  %v279_v6 = vmul.f32 %v253_v61, %v3701_v0 }
 0x19a   :  { %v257_v52 = vmul.f32 0.5, %v256_v1  ;;  %321 = vadd.xlane.f32.xlu2 %v320_v60  ;;  %v281_v37 = vmul.f32 %v273_v2, %v3697_v63 }
 0x19b   :  { %324 = vadd.xlane.f32.xlu0 %v323_v8  ;;  %v288_v55 = vmul.f32 %v3755_v24, %v279_v6 }
 0x19c   :  { %v258_v50 = vsub.f32 1.5, %v257_v52  ;;  %v290_v13 = vmul.f32 %v3755_v24, %v281_v37 }
 0x19d   :  { %v297_v47 = vadd.f32 %v3765_v39, %v288_v55 }
 0x19e   :  { %v259_v44 = vmul.f32 %v3269_v51, %v258_v50  ;;  %v299_v11 = vadd.f32 %v3765_v39, %v290_v13 }
 0x19f   :  { %v3848_v0 = vadd.f32 %v3653_v22, %v297_v47 }
 0x1a0   :  { %v263_v63 = vsel %vm262_vm11, %v3269_v51, %v259_v44  ;;  %v3860_v25 = vadd.f32 %v3653_v22, %v299_v11 }
 0x1a1   :  { %v326_v19 = vsel %vm98_vm0, %v3848_v0, 0.0  ;;  %v280_v20 = vmul.f32 %v263_v63, %v3716_v12 }
 0x1a2   :  { %327 = vadd.xlane.f32.xlu1 %v326_v19  ;;  %964 = vmax.xlane.f32.xlu2 %v963_v17  ;;  %v332_v12 = vsel %vm98_vm0, %v3860_v25, 0.0 }
 0x1a3   :  { %v289_v21 = vmul.f32 %v3755_v24, %v280_v20  ;;  %v3872_v24 = vpop.f32.mrf.mxu1 }
 0x1a5   :  { %v298_v28 = vadd.f32 %v3765_v39, %v289_v21  ;;  %v972_v39 = vsel %vm962_vm9, %v3872_v24, -inf }
 0x1a7   :  { %v3866_v31 = vadd.f32 %v3653_v22, %v298_v28  ;;  %v68_v22 = vlaneseq }
 0x1a9   :  { %v329_v53 = vsel %vm98_vm0, %v3866_v31, 0.0  ;;  %v3878_v18 = vshrl.u32 %v68_v22, 7 }
 0x1aa   :  { %967 = vmax.xlane.f32.xlu1 %v966_v27  ;;  %333 = vadd.xlane.f32.xlu2 %v332_v12 }
 0x1ab   :  { %330 = vadd.xlane.f32.xlu0 %v329_v53  ;;  %vm336_vm12 = vcmp.lt.s32.totalorder %v3878_v18, 4  ;;  %vm420_vm13 = vcmp.ge.s32.totalorder %v3878_v18, 4  ;;  %v3894_v17 = vpop.f32.mrf.mxu1 }
 0x1b2   :  { %973 = vmax.xlane.f32.xlu2 %v972_v39 }
 0x1b3   :  { %970 = vmax.xlane.f32.xlu0 %v969_v32 }
 0x1fd   :  { %v319_v35 = vpop.xlane.xlu1 %318 }
 0x1fe   :  { %v342_v41 = vsel %vm336_vm12, %v319_v35, 0.0  ;;  %v427_v9 = vsel %vm420_vm13, %v319_v35, 0.0  ;;  %v313_v36 = vpop.xlane.xlu2 %312 }
 0x1ff   :  { %v360_v43 = vrot.slane %v342_v41, 4  ;;  %v445_v26 = vrot.slane %v427_v9, 4  ;;  %v340_v3 = vsel %vm336_vm12, %v313_v36, 0.0  ;;  %v425_v33 = vsel %vm420_vm13, %v313_v36, 0.0 }
 0x200   :  { %v348_v46 = vrot.slane %v340_v3, 4  ;;  %v433_v4 = vrot.slane %v425_v33, 4 }
 0x201   :  { %v361_v51 = vadd.f32 %v360_v43, %v342_v41  ;;  %v446_v56 = vadd.f32 %v445_v26, %v427_v9 }
 0x202   :  { %v349_v57 = vadd.f32 %v348_v46, %v340_v3  ;;  %v434_v58 = vadd.f32 %v433_v4, %v425_v33 }
 0x203   :  { %v362_v48 = vrot.slane %v361_v51, 2  ;;  %v447_v5 = vrot.slane %v446_v56, 2 }
 0x204   :  { %v350_v61 = vrot.slane %v349_v57, 2  ;;  %v435_v1 = vrot.slane %v434_v58, 2 }
 0x205   :  { %v363_v2 = vadd.f32 %v362_v48, %v361_v51  ;;  %v448_v60 = vadd.f32 %v447_v5, %v446_v56 }
 0x206   :  { %v316_v6 = vpop.xlane.xlu0 %315  ;;  %v351_v52 = vadd.f32 %v350_v61, %v349_v57  ;;  %v436_v8 = vadd.f32 %v435_v1, %v434_v58 }
 0x207   :  { %v341_v37 = vsel %vm336_vm12, %v316_v6, 0.0  ;;  %v426_v55 = vsel %vm420_vm13, %v316_v6, 0.0  ;;  %v364_v50 = vrot.slane %v363_v2, 1  ;;  %v449_v47 = vrot.slane %v448_v60, 1 }
 0x208   :  { %v354_v13 = vrot.slane %v341_v37, 4  ;;  %v439_v44 = vrot.slane %v426_v55, 4  ;;  %v352_v63 = vrot.slane %v351_v52, 1  ;;  %v437_v19 = vrot.slane %v436_v8, 1 }
 0x209   :  { %v365_v11 = vadd.f32 %v364_v50, %v363_v2  ;;  %v450_v20 = vadd.f32 %v449_v47, %v448_v60 }
 0x20a   :  { %v355_v21 = vadd.f32 %v354_v13, %v341_v37  ;;  %v440_v28 = vadd.f32 %v439_v44, %v426_v55  ;;  %v353_v27 = vadd.f32 %v352_v63, %v351_v52  ;;  %v438_v12 = vadd.f32 %v437_v19, %v436_v8  ;;  %v3908_v8 = vpop.f32.mrf.mxu1 }
 0x20b   :  { %v398_v32 = vmul.f32 0.0078125, %v365_v11  ;;  %v483_v22 = vmul.f32 0.0078125, %v450_v20 }
 0x20c   :  { %v356_v53 = vrot.slane %v355_v21, 2  ;;  %v441_v39 = vrot.slane %v440_v28, 2  ;;  %v396_v35 = vmul.f32 0.0078125, %v353_v27  ;;  %v481_v41 = vmul.f32 0.0078125, %v438_v12 }
 0x20d   :  { %v322_v9 = vpop.xlane.xlu2 %321  ;;  %v406_v19 = vsel %vm336_vm12, %v398_v32, 0.0  ;;  %v491_v27 = vsel %vm420_vm13, %v483_v22, 0.0 }
 0x20e   :  { %v357_v36 = vadd.f32 %v356_v53, %v355_v21  ;;  %v442_v43 = vadd.f32 %v441_v39, %v440_v28  ;;  %v343_v26 = vsel %vm336_vm12, %v322_v9, 0.0  ;;  %v428_v3 = vsel %vm420_vm13, %v322_v9, 0.0  ;;  %v325_v33 = vpop.xlane.xlu0 %324 }
 0x20f   :  { %v366_v46 = vrot.slane %v343_v26, 4  ;;  %v451_v4 = vrot.slane %v428_v3, 4  ;;  %v344_v51 = vsel %vm336_vm12, %v325_v33, 0.0  ;;  %v429_v56 = vsel %vm420_vm13, %v325_v33, 0.0 }
 0x210   :  { %v358_v57 = vrot.slane %v357_v36, 1  ;;  %v443_v58 = vrot.slane %v442_v43, 1  ;;  %v372_v48 = vrot.slane %v344_v51, 4  ;;  %v457_v5 = vrot.slane %v429_v56, 4 }
 0x211   :  { %v367_v61 = vadd.f32 %v366_v46, %v343_v26  ;;  %v452_v1 = vadd.f32 %v451_v4, %v428_v3  ;;  %v404_v2 = vsel %vm336_vm12, %v396_v35, 0.0  ;;  %v489_v60 = vsel %vm420_vm13, %v481_v41, 0.0 }
 0x212   :  { %v373_v6 = vadd.f32 %v372_v48, %v344_v51  ;;  %v458_v52 = vadd.f32 %v457_v5, %v429_v56  ;;  %v359_v37 = vadd.f32 %v358_v57, %v357_v36  ;;  %v497_v47 = vadd.f32 %v489_v60, %v404_v2  ;;  %v3931_v2 = vpop.f32.mrf.mxu1 }
 0x213   :  { %v368_v55 = vrot.slane %v367_v61, 2  ;;  %v453_v50 = vrot.slane %v452_v1, 2  ;;  %v444_v13 = vadd.f32 %v443_v58, %v442_v43  ;;  %v499_v26 = vadd.f32 %v491_v27, %v406_v19 }
 0x214   :  { %v374_v44 = vrot.slane %v373_v6, 2  ;;  %v459_v63 = vrot.slane %v458_v52, 2  ;;  %v3913_v28 = vsub.f32 %v3800_v49, %v497_v47  ;;  %v397_v3 = vmul.f32 0.0078125, %v359_v37 }
 0x215   :  { %v369_v11 = vadd.f32 %v368_v55, %v367_v61  ;;  %v454_v20 = vadd.f32 %v453_v50, %v452_v1  ;;  %v328_v21 = vpop.xlane.xlu1 %327  ;;  %v3917_v12 = vpop.xlane.xlu2 %964  ;;  %v482_v22 = vmul.f32 0.0078125, %v444_v13  ;;  %v3927_v56 = vsub.f32 %v3797_v7, %v499_v26 }
 0x216   :  { %v375_v53 = vadd.f32 %v374_v44, %v373_v6  ;;  %v345_v39 = vsel %vm336_vm12, %v328_v21, 0.0  ;;  %v430_v35 = vsel %vm420_vm13, %v328_v21, 0.0  ;;  %v460_v41 = vadd.f32 %v459_v63, %v458_v52 }
 0x217   :  { %v378_v32 = vrot.slane %v345_v39, 4  ;;  %v463_v9 = vrot.slane %v430_v35, 4  ;;  %v370_v36 = vrot.slane %v369_v11, 1  ;;  %v455_v43 = vrot.slane %v454_v20, 1 }
 0x218   :  { %v513_v49 = vmul.f32 %v3913_v28, %v3913_v28  ;;  %v376_v4 = vrot.slane %v375_v53, 1  ;;  %v461_v61 = vrot.slane %v460_v41, 1  ;;  %v515_v1 = vmul.f32 %v3927_v56, %v3927_v56 }
 0x219   :  { %v379_v33 = vadd.f32 %v378_v32, %v345_v39  ;;  %v464_v46 = vadd.f32 %v463_v9, %v430_v35  ;;  %v371_v48 = vadd.f32 %v370_v36, %v369_v11  ;;  %v456_v5 = vadd.f32 %v455_v43, %v454_v20 }
 0x21a   :  { %v521_v51 = vsel %vm98_vm0, %v513_v49, 0.0  ;;  %v405_v37 = vsel %vm336_vm12, %v397_v3, 0.0  ;;  %v490_v7 = vsel %vm420_vm13, %v482_v22, 0.0  ;;  %v377_v55 = vadd.f32 %v376_v4, %v375_v53 }
 0x21b   :  { %v380_v57 = vrot.slane %v379_v33, 2  ;;  %v465_v58 = vrot.slane %v464_v46, 2  ;;  %522 = vadd.xlane.f32.xlu1 %v521_v51  ;;  %v527_v50 = vsel %vm98_vm0, %v515_v1, 0.0  ;;  %v975_v47 = vsel %vm962_vm9, %v3894_v17, -inf }
 0x21c   :  { %528 = vadd.xlane.f32.xlu2 %v527_v50  ;;  %v981_v19 = vsel %vm962_vm9, %v3931_v2, -inf  ;;  %v399_v21 = vmul.f32 0.0078125, %v371_v48  ;;  %v462_v27 = vadd.f32 %v461_v61, %v460_v41  ;;  %v498_v39 = vadd.f32 %v490_v7, %v405_v37  ;;  %v3962_v50 = vpop.f32.mrf.mxu1 }
 0x21d   :  { %v381_v60 = vadd.f32 %v380_v57, %v379_v33  ;;  %v466_v6 = vadd.f32 %v465_v58, %v464_v46  ;;  %v334_v52 = vpop.xlane.xlu2 %333  ;;  %v484_v35 = vmul.f32 0.0078125, %v456_v5  ;;  %v400_v43 = vmul.f32 0.0078125, %v377_v55 }
 0x21e   :  { %v347_v13 = vsel %vm336_vm12, %v334_v52, 0.0  ;;  %v331_v44 = vpop.xlane.xlu0 %330  ;;  %v432_v20 = vsel %vm420_vm13, %v334_v52, 0.0  ;;  %v3949_v26 = vsub.f32 %v3820_v34, %v498_v39  ;;  %v987_v33 = vsub.f32 %v3815_v54, %v3917_v12  ;;  %v968_v39 = vpop.xlane.xlu1 %967 }
 0x21f   :  { %v382_v63 = vrot.slane %v381_v60, 1  ;;  %v390_v11 = vrot.slane %v347_v13, 4  ;;  %v475_v53 = vrot.slane %v432_v20, 4  ;;  %v467_v32 = vrot.slane %v466_v6, 1 }
 0x220   :  { %v346_v36 = vsel %vm336_vm12, %v331_v44, 0.0  ;;  %v431_v46 = vsel %vm420_vm13, %v331_v44, 0.0  ;;  %v514_v51 = vmul.f32 %v3949_v26, %v3949_v26  ;;  %v407_v34 = vsel %vm336_vm12, %v399_v21, 0.0 }
 0x221   :  { %v391_v9 = vadd.f32 %v390_v11, %v347_v13  ;;  %v476_v49 = vadd.f32 %v475_v53, %v432_v20  ;;  %v384_v3 = vrot.slane %v346_v36, 4  ;;  %v383_v22 = vadd.f32 %v382_v63, %v381_v60 }
 0x222   :  { %v469_v58 = vrot.slane %v431_v46, 4  ;;  %v468_v48 = vadd.f32 %v467_v32, %v466_v6  ;;  %v492_v61 = vsel %vm420_vm13, %v484_v35, 0.0  ;;  %v524_v12 = vsel %vm98_vm0, %v514_v51, 0.0 }
 0x223   :  { %976 = vmax.xlane.f32.xlu1 %v975_v47  ;;  %v392_v41 = vrot.slane %v391_v9, 2  ;;  %v477_v4 = vrot.slane %v476_v49, 2  ;;  %v385_v57 = vadd.f32 %v384_v3, %v346_v36  ;;  %v485_v37 = vmul.f32 0.0078125, %v462_v27  ;;  %525 = vadd.xlane.f32.xlu0 %v524_v12 }
 0x224   :  { %v470_v60 = vadd.f32 %v469_v58, %v431_v46  ;;  %v995_v7 = vmul.f32 1.442695, %v987_v33  ;;  %982 = vmax.xlane.f32.xlu2 %v981_v19  ;;  %v500_v6 = vadd.f32 %v492_v61, %v407_v34  ;;  %v401_v11 = vmul.f32 0.0078125, %v383_v22 }
 0x225   :  { %v393_v5 = vadd.f32 %v392_v41, %v391_v9  ;;  %v478_v54 = vadd.f32 %v477_v4, %v476_v49  ;;  %v386_v1 = vrot.slane %v385_v57, 2  ;;  %v486_v20 = vmul.f32 0.0078125, %v468_v48  ;;  %v974_v61 = vpop.xlane.xlu2 %973 }
 0x226   :  { %v971_v52 = vpop.xlane.xlu0 %970  ;;  %v471_v44 = vrot.slane %v470_v60, 2  ;;  %v3966_v53 = vsub.f32 %v3834_v42, %v500_v6  ;;  %v984_v19 = vsel %vm962_vm9, %v3962_v50, -inf  ;;  %v978_v42 = vsel %vm962_vm9, %v3908_v8, -inf }
 0x227   :  { %v394_v55 = vrot.slane %v393_v5, 1  ;;  %v479_v47 = vrot.slane %v478_v54, 1  ;;  %v387_v13 = vadd.f32 %v386_v1, %v385_v57  ;;  %v989_v63 = vsub.f32 %v3856_v23, %v971_v52 }
 0x228   :  { %v472_v35 = vadd.f32 %v471_v44, %v470_v60  ;;  %v516_v49 = vmul.f32 %v3966_v53, %v3966_v53  ;;  %v408_v23 = vsel %vm336_vm12, %v400_v43, 0.0  ;;  %v988_v33 = vsub.f32 %v3836_v10, %v968_v39 }
 0x229   :  { %v395_v21 = vadd.f32 %v394_v55, %v393_v5  ;;  %v480_v27 = vadd.f32 %v479_v47, %v478_v54  ;;  %v999_v32 = vmul.f32 1.442695, %v989_v63  ;;  %v388_v36 = vrot.slane %v387_v13, 1 }
 0x22a   :  { %v473_v22 = vrot.slane %v472_v35, 1  ;;  %v530_v41 = vsel %vm98_vm0, %v516_v49, 0.0  ;;  %v493_v46 = vsel %vm420_vm13, %v485_v37, 0.0  ;;  %v409_v51 = vsel %vm336_vm12, %v401_v11, 0.0 }
 0x22b   :  { %v403_v9 = vmul.f32 0.0078125, %v395_v21  ;;  %v488_v3 = vmul.f32 0.0078125, %v480_v27  ;;  %3270 = vpow2.f32 %v999_v32  ;;  %531 = vadd.xlane.f32.xlu1 %v530_v41  ;;  %v501_v4 = vadd.f32 %v493_v46, %v408_v23  ;;  %979 = vmax.xlane.f32.xlu0 %v978_v42  ;;  %v1590_v23 = vld [vmem:[%s5342_s1 + $0x70] sm:$0xff] }
 0x22c   :  { %3272 = vpow2.f32 %v995_v7  ;;  %v494_v43 = vsel %vm420_vm13, %v486_v20, 0.0  ;;  %v389_v57 = vadd.f32 %v388_v36, %v387_v13  ;;  %v474_v58 = vadd.f32 %v473_v22, %v472_v35  ;;  %985 = vmax.xlane.f32.xlu2 %v984_v19  ;;  %v4041_v22 = vld [vmem:[%s5342_s1 + $0x78] sm:$0xff] }
 0x22d   :  { %v411_v10 = vsel %vm336_vm12, %v403_v9, 0.0  ;;  %v496_v48 = vsel %vm420_vm13, %v488_v3, 0.0  ;;  %v3989_v5 = vsub.f32 %v3830_v59, %v501_v4  ;;  %v997_v34 = vmul.f32 1.442695, %v988_v33 }
 0x22e   :  { %v502_v54 = vadd.f32 %v494_v43, %v409_v51  ;;  %v504_v60 = vadd.f32 %v496_v48, %v411_v10  ;;  %v402_v37 = vmul.f32 0.0078125, %v389_v57  ;;  %v487_v7 = vmul.f32 0.0078125, %v474_v58 }
 0x22f   :  { %v517_v1 = vmul.f32 %v3989_v5, %v3989_v5  ;;  %v990_v55 = vsub.f32 %v3872_v24, %v974_v61  ;;  %3274 = vpow2.f32 %v997_v34  ;;  %v1594_v3 = vmul.f32 %v1590_v23, %v3533_v16 }
 0x230   :  { %v4002_v47 = vsub.f32 %v3848_v0, %v502_v54  ;;  %v4007_v44 = vsub.f32 %v3860_v25, %v504_v60  ;;  %v410_v24 = vsel %vm336_vm12, %v402_v37, 0.0  ;;  %v495_v63 = vsel %vm420_vm13, %v487_v7, 0.0 }
 0x231   :  { %v3991_v12 = vpop.eup %3270  ;;  %v533_v59 = vsel %vm98_vm0, %v517_v1, 0.0  ;;  %v1001_v11 = vmul.f32 1.442695, %v990_v55  ;;  %v503_v21 = vadd.f32 %v495_v63, %v410_v24  ;;  %v1595_v41 = vmul.f32 %v1590_v23, %v3560_v30 }
 0x232   :  { %v3995_v52 = vpop.eup %3272  ;;  %v1017_v6 = vsel %vm962_vm9, %v3991_v12, 0.0  ;;  %v518_v0 = vmul.f32 %v4002_v47, %v4002_v47  ;;  %v520_v20 = vmul.f32 %v4007_v44, %v4007_v44  ;;  %v1597_v43 = vmul.f32 %v1590_v23, %v3558_v29 }
 0x233   :  { %v1011_v13 = vsel %vm962_vm9, %v3995_v52, 0.0  ;;  %534 = vadd.xlane.f32.xlu1 %v533_v59  ;;  %3276 = vpow2.f32 %v1001_v11  ;;  %v4024_v19 = vsub.f32 %v3866_v31, %v503_v21  ;;  %v1596_v31 = vmul.f32 %v1590_v23, %v3531_v15 }
 0x234   :  { %1012 = vadd.xlane.f32.xlu0 %v1011_v13  ;;  %1018 = vadd.xlane.f32.xlu2 %v1017_v6  ;;  %v536_v25 = vsel %vm98_vm0, %v518_v0, 0.0  ;;  %v542_v35 = vsel %vm98_vm0, %v520_v20, 0.0  ;;  %v4052_v15 = vadd.f32 %v1594_v3, %v4041_v22  ;;  %v4061_v61 = vadd.f32 %v1595_v41, %v4041_v22 }
 0x235   :  { %v4017_v39 = vpop.eup %3274  ;;  %v519_v9 = vmul.f32 %v4024_v19, %v4024_v19  ;;  %v4044_v33 = vadd.f32 %v1596_v31, %v4041_v22  ;;  %v4065_v7 = vmul.f32 %v1590_v23, %v3529_v14  ;;  %v4068_v55 = vmul.f32 %v1590_v23, %v3575_v38 }
 0x236   :  { %v1014_v27 = vsel %vm962_vm9, %v4017_v39, 0.0  ;;  %v5347_v54 = vmax.f32 %v4052_v15, 0.0  ;;  %v4071_v6 = vadd.f32 %v1597_v43, %v4041_v22  ;;  %v5349_v20 = vmax.f32 %v4061_v61, 0.0 }
 0x237   :  { %v539_v49 = vsel %vm98_vm0, %v519_v9, 0.0  ;;  %v5348_v48 = vmax.f32 %v4044_v33, 0.0  ;;  %v1600_v9 = vmul.f32 %v1590_v23, %v3580_v40 }
 0x238   :  { %5358 = vst [vmem:[#allocation5_spill] sm:$0xff] %v4071_v6  ;;  %v4083_v38 = vsel %vm98_vm0, %v5347_v54, 0.0 }
 0x239   :  { %v4026_v32 = vpop.eup %3276  ;;  %v4078_v14 = vsel %vm98_vm0, %v5348_v48, 0.0 }
 0x23a   :  { %v1020_v36 = vsel %vm962_vm9, %v4026_v32, 0.0 }
 0x23b   :  { %537 = vadd.xlane.f32.xlu1 %v536_v25 }
 0x23c   :  { %1015 = vadd.xlane.f32.xlu0 %v1014_v27  ;;  %543 = vadd.xlane.f32.xlu2 %v542_v35 }
 0x243   :  { %1021 = vadd.xlane.f32.xlu1 %v1020_v36 }
 0x244   :  { %540 = vadd.xlane.f32.xlu0 %v539_v49  ;;  %v5345_v49 = vmax.f32 %v4071_v6, 0.0 }
 0x28e   :  { %v523_v42 = vpop.xlane.xlu1 %522 }
 0x28f   :  { %v545_v46 = vsel %vm336_vm12, %v523_v42, 0.0  ;;  %v625_v4 = vsel %vm420_vm13, %v523_v42, 0.0  ;;  %v529_v10 = vpop.xlane.xlu2 %528 }
 0x290   :  { %v553_v16 = vrot.slane %v545_v46, 4  ;;  %v633_v51 = vrot.slane %v625_v4, 4  ;;  %v547_v30 = vsel %vm336_vm12, %v529_v10, 0.0  ;;  %v627_v34 = vsel %vm420_vm13, %v529_v10, 0.0 }
 0x291   :  { %v565_v37 = vrot.slane %v547_v30, 4  ;;  %v645_v29 = vrot.slane %v627_v34, 4 }
 0x292   :  { %v554_v57 = vadd.f32 %v553_v16, %v545_v46  ;;  %v634_v58 = vadd.f32 %v633_v51, %v625_v4 }
 0x293   :  { %v566_v24 = vadd.f32 %v565_v37, %v547_v30  ;;  %v646_v63 = vadd.f32 %v645_v29, %v627_v34  ;;  %v4094_v34 = vadd.f32 %v1600_v9, %v4041_v22 }
 0x294   :  { %v555_v1 = vrot.slane %v554_v57, 2  ;;  %v635_v60 = vrot.slane %v634_v58, 2 }
 0x295   :  { %v567_v27 = vrot.slane %v566_v24, 2  ;;  %v647_v35 = vrot.slane %v646_v63, 2  ;;  %5359 = vst [vmem:[#allocation6_spill] sm:$0xff] %v4094_v34 }
 0x296   :  { %v556_v59 = vadd.f32 %v555_v1, %v554_v57  ;;  %v636_v13 = vadd.f32 %v635_v60, %v634_v58  ;;  %v977_v11 = vpop.xlane.xlu1 %976  ;;  %v526_v4 = vpop.xlane.xlu0 %525 }
 0x297   :  { %v991_v0 = vsub.f32 %v3894_v17, %v977_v11  ;;  %v1601_v17 = vmul.f32 %v1590_v23, %v3591_v45  ;;  %v568_v42 = vadd.f32 %v567_v27, %v566_v24  ;;  %v648_v41 = vadd.f32 %v647_v35, %v646_v63  ;;  %v983_v46 = vpop.xlane.xlu2 %982 }
 0x298   :  { %v557_v21 = vrot.slane %v556_v59, 1  ;;  %v637_v25 = vrot.slane %v636_v13, 1  ;;  %v993_v16 = vsub.f32 %v3931_v2, %v983_v46  ;;  %v546_v51 = vsel %vm336_vm12, %v526_v4, 0.0 }
 0x299   :  { %v1003_v36 = vmul.f32 1.442695, %v991_v0  ;;  %v626_v40 = vsel %vm420_vm13, %v526_v4, 0.0  ;;  %v569_v23 = vrot.slane %v568_v42, 1  ;;  %v649_v57 = vrot.slane %v648_v41, 1 }
 0x29a   :  { %v558_v31 = vadd.f32 %v557_v21, %v556_v59  ;;  %v638_v3 = vadd.f32 %v637_v25, %v636_v13  ;;  %v1007_v58 = vmul.f32 1.442695, %v993_v16  ;;  %v559_v10 = vrot.slane %v546_v51, 4 }
 0x29b   :  { %3278 = vpow2.f32 %v1003_v36  ;;  %v639_v30 = vrot.slane %v626_v40, 4  ;;  %v570_v60 = vadd.f32 %v569_v23, %v568_v42  ;;  %v650_v37 = vadd.f32 %v649_v57, %v648_v41 }
 0x29c   :  { %v601_v43 = vmul.f32 0.0078125, %v558_v31  ;;  %v681_v45 = vmul.f32 0.0078125, %v638_v3  ;;  %3280 = vpow2.f32 %v1007_v58  ;;  %v560_v59 = vadd.f32 %v559_v10, %v546_v51 }
 0x29d   :  { %v640_v13 = vadd.f32 %v639_v30, %v626_v40  ;;  %v603_v24 = vmul.f32 0.0078125, %v570_v60  ;;  %v683_v63 = vmul.f32 0.0078125, %v650_v37  ;;  %v4103_v11 = vsel %vm98_vm0, %v5349_v20, 0.0 }
 0x29e   :  { %v609_v1 = vsel %vm336_vm12, %v601_v43, 0.0  ;;  %v689_v2 = vsel %vm420_vm13, %v681_v45, 0.0  ;;  %v4108_v0 = vsel %vm98_vm0, %v5345_v49, 0.0  ;;  %v561_v27 = vrot.slane %v560_v59, 2  ;;  %v532_v9 = vpop.xlane.xlu1 %531  ;;  %v980_v4 = vpop.xlane.xlu0 %979 }
 0x29f   :  { %v697_v29 = vadd.f32 %v689_v2, %v609_v1  ;;  %v641_v35 = vrot.slane %v640_v13, 2  ;;  %v4115_v36 = vadd.f32 %v1601_v17, %v4041_v22  ;;  %v611_v31 = vsel %vm336_vm12, %v603_v24, 0.0  ;;  %v986_v46 = vpop.xlane.xlu2 %985 }
 0x2a0   :  { %v691_v3 = vsel %vm420_vm13, %v683_v63, 0.0  ;;  %v548_v42 = vsel %vm336_vm12, %v532_v9, 0.0  ;;  %v628_v41 = vsel %vm420_vm13, %v532_v9, 0.0  ;;  %v562_v51 = vadd.f32 %v561_v27, %v560_v59 }
 0x2a1   :  { %v4110_v21 = vpop.eup %3278  ;;  %v4112_v25 = vadd.f32 1e-05, %v697_v29  ;;  %v699_v16 = vadd.f32 %v691_v3, %v611_v31  ;;  %v642_v40 = vadd.f32 %v641_v35, %v640_v13  ;;  %v5344_v17 = vmax.f32 %v4094_v34, 0.0 }
 0x2a2   :  { %v571_v43 = vrot.slane %v548_v42, 4  ;;  %v651_v45 = vrot.slane %v628_v41, 4  ;;  %v994_v23 = vsub.f32 %v3962_v50, %v986_v46  ;;  %v992_v57 = vsub.f32 %v3908_v8, %v980_v4  ;;  %v4128_v58 = vpop.eup %3280 }
 0x2a3   :  { %3282 = vrsqrt.f32 %v4112_v25  ;;  %v563_v10 = vrot.slane %v562_v51, 1  ;;  %v643_v30 = vrot.slane %v642_v40, 1  ;;  %v1023_v1 = vsel %vm962_vm9, %v4110_v21, 0.0 }
 0x2a4   :  { %v572_v2 = vadd.f32 %v571_v43, %v548_v42  ;;  %v652_v60 = vadd.f32 %v651_v45, %v628_v41  ;;  %v1009_v37 = vmul.f32 1.442695, %v994_v23  ;;  %v1005_v29 = vmul.f32 1.442695, %v992_v57  ;;  %1024 = vadd.xlane.f32.xlu0 %v1023_v1 }
 0x2a5   :  { %v564_v59 = vadd.f32 %v563_v10, %v562_v51  ;;  %v644_v13 = vadd.f32 %v643_v30, %v642_v40  ;;  %v1029_v50 = vsel %vm962_vm9, %v4128_v58, 0.0  ;;  %v5346_v8 = vmax.f32 %v4115_v36, 0.0 }
 0x2a6   :  { %v4136_v24 = vadd.f32 1e-05, %v699_v16  ;;  %v573_v63 = vrot.slane %v572_v2, 2  ;;  %v653_v27 = vrot.slane %v652_v60, 2  ;;  %3284 = vpow2.f32 %v1009_v37  ;;  %1030 = vadd.xlane.f32.xlu2 %v1029_v50  ;;  %v535_v31 = vpop.xlane.xlu1 %534 }
 0x2a7   :  { %v602_v35 = vmul.f32 0.0078125, %v564_v59  ;;  %v682_v9 = vmul.f32 0.0078125, %v644_v13  ;;  %3286 = vpow2.f32 %v1005_v29  ;;  %v4140_v3 = vadd.f32 %v4065_v7, %v4041_v22  ;;  %v4146_v16 = vpop.xlane.xlu0 %1012  ;;  %v4148_v51 = vpop.xlane.xlu2 %1018 }
 0x2a8   :  { %v574_v42 = vadd.f32 %v573_v63, %v572_v2  ;;  %v654_v41 = vadd.f32 %v653_v27, %v652_v60  ;;  %v549_v46 = vsel %vm336_vm12, %v535_v31, 0.0  ;;  %v629_v4 = vsel %vm420_vm13, %v535_v31, 0.0 }
 0x2a9   :  { %v4150_v40 = vpop.eup %3282  ;;  %v610_v43 = vsel %vm336_vm12, %v602_v35, 0.0  ;;  %v690_v7 = vsel %vm420_vm13, %v682_v9, 0.0  ;;  %v577_v45 = vrot.slane %v549_v46, 4  ;;  %v657_v23 = vrot.slane %v629_v4, 4 }
 0x2aa   :  { %3288 = vrsqrt.f32 %v4136_v24  ;;  %v575_v57 = vrot.slane %v574_v42, 1  ;;  %v655_v10 = vrot.slane %v654_v41, 1  ;;  %v4159_v30 = vadd.f32 %v4068_v55, %v4041_v22 }
 0x2ab   :  { %v578_v1 = vadd.f32 %v577_v45, %v549_v46  ;;  %v658_v2 = vadd.f32 %v657_v23, %v629_v4  ;;  %v5350_v60 = vmax.f32 %v4140_v3, 0.0  ;;  %v4165_v37 = vsel %vm98_vm0, %v5344_v17, 0.0 }
 0x2ac   :  { %5360 = vst [vmem:[#allocation7_spill] sm:$0xff] %v4159_v30  ;;  %v4167_v29 = vpop.eup %3284  ;;  %v698_v59 = vadd.f32 %v690_v7, %v610_v43  ;;  %v576_v13 = vadd.f32 %v575_v57, %v574_v42  ;;  %v656_v50 = vadd.f32 %v655_v10, %v654_v41  ;;  %3290 = vrcp.f32 %v4146_v16 }
 0x2ad   :  { %5361 = vst [vmem:[#allocation8_spill] sm:$0xff] %v4167_v29  ;;  %v4170_v63 = vpop.eup %3286  ;;  %v579_v22 = vrot.slane %v578_v1, 2  ;;  %v659_v55 = vrot.slane %v658_v2, 2  ;;  %v1032_v27 = vsel %vm962_vm9, %v4167_v29, 0.0  ;;  %v714_v35 = vmul.f32 %v4150_v40, %v4112_v25 }
 0x2ae   :  { %v604_v9 = vmul.f32 0.0078125, %v576_v13  ;;  %v684_v31 = vmul.f32 0.0078125, %v656_v50  ;;  %1033 = vadd.xlane.f32.xlu0 %v1032_v27  ;;  %1622 = vadd.xlane.f32.xlu2 %v4103_v11  ;;  %v1026_v42 = vsel %vm962_vm9, %v4170_v63, 0.0  ;;  %v5352_v41 = vmax.f32 %v4159_v30, 0.0  ;;  %v538_v43 = vpop.xlane.xlu1 %537 }
 0x2af   :  { %v580_v46 = vadd.f32 %v579_v22, %v578_v1  ;;  %v660_v4 = vadd.f32 %v659_v55, %v658_v2  ;;  %3292 = vrcp.f32 %v4148_v51  ;;  %1027 = vadd.xlane.f32.xlu1 %v1026_v42  ;;  %v4184_v7 = vsel %vm98_vm0, %v5346_v8, 0.0  ;;  %v1016_v1 = vpop.xlane.xlu0 %1015  ;;  %v544_v22 = vpop.xlane.xlu2 %543 }
 0x2b0   :  { %v4186_v45 = vpop.eup %3288  ;;  %v612_v11 = vsel %vm336_vm12, %v604_v9, 0.0  ;;  %v692_v23 = vsel %vm420_vm13, %v684_v31, 0.0  ;;  %v550_v57 = vsel %vm336_vm12, %v538_v43, 0.0  ;;  %v630_v10 = vsel %vm420_vm13, %v538_v43, 0.0 }
 0x2b1   :  { %v4196_v2 = vadd.f32 1e-05, %v698_v59  ;;  %v581_v13 = vrot.slane %v580_v46, 1  ;;  %v661_v50 = vrot.slane %v660_v4, 1  ;;  %v715_v55 = vmul.f32 %v4150_v40, %v714_v35 }
 0x2b2   :  { %v4199_v27 = vpop.eup %3290  ;;  %v583_v9 = vrot.slane %v550_v57, 4  ;;  %v663_v42 = vrot.slane %v630_v10, 4  ;;  %v1630_v31 = vsel %vm98_vm0, %v5350_v60, 0.0  ;;  %v1633_v43 = vsel %vm98_vm0, %v5352_v41, 0.0 }
 0x2b3   :  { %v4209_v59 = vmul.f32 %v4186_v45, %v4136_v24  ;;  %v700_v17 = vadd.f32 %v692_v23, %v612_v11  ;;  %v582_v49 = vadd.f32 %v581_v13, %v580_v46  ;;  %v662_v8 = vadd.f32 %v661_v50, %v660_v4 }
 0x2b4   :  { %v584_v35 = vadd.f32 %v583_v9, %v550_v57  ;;  %v664_v54 = vadd.f32 %v663_v42, %v630_v10  ;;  %3294 = vrcp.f32 %v1016_v1  ;;  %v552_v48 = vsel %vm336_vm12, %v544_v22, 0.0 }
 0x2b5   :  { %v4213_v20 = vpop.eup %3292  ;;  %3296 = vrsqrt.f32 %v4196_v2  ;;  %v605_v60 = vmul.f32 0.0078125, %v582_v49  ;;  %v685_v34 = vmul.f32 0.0078125, %v662_v8  ;;  %v716_v41 = vmul.f32 0.5, %v715_v55 }
 0x2b6   :  { %v4218_v29 = vmul.f32 %v4199_v27, %v4146_v16  ;;  %v585_v11 = vrot.slane %v584_v35, 2  ;;  %v665_v46 = vrot.slane %v664_v54, 2  ;;  %1625 = vadd.xlane.f32.xlu0 %v4078_v14  ;;  %1631 = vadd.xlane.f32.xlu2 %v1630_v31  ;;  %v595_v4 = vrot.slane %v552_v48, 4 }
 0x2b7   :  { %vm719_vm14 = vweird.f32 %v4112_v25  ;;  %v4222_v23 = vadd.f32 1e-05, %v700_v17  ;;  %v613_v57 = vsel %vm336_vm12, %v605_v60, 0.0  ;;  %v693_v49 = vsel %vm420_vm13, %v685_v34, 0.0  ;;  %1619 = vadd.xlane.f32.xlu1 %v4083_v38  ;;  %v541_v17 = vpop.xlane.xlu0 %540 }
 0x2b8   :  { %v632_v8 = vsel %vm420_vm13, %v544_v22, 0.0  ;;  %v701_v16 = vadd.f32 %v693_v49, %v613_v57  ;;  %v4233_v14 = vmul.f32 %v4213_v20, %v4148_v51  ;;  %v586_v10 = vadd.f32 %v585_v11, %v584_v35 }
 0x2b9   :  { %v666_v13 = vadd.f32 %v665_v46, %v664_v54  ;;  %v596_v50 = vadd.f32 %v595_v4, %v552_v48  ;;  %v675_v55 = vrot.slane %v632_v8, 4  ;;  %v717_v9 = vsub.f32 1.5, %v716_v41 }
 0x2ba   :  { %vm720_vm15 = vweird.f32 %v4150_v40  ;;  %v4236_v60 = vpop.eup %3294  ;;  %v4238_v34 = vadd.f32 1e-05, %v701_v16  ;;  %v587_v22 = vrot.slane %v586_v10, 1  ;;  %v551_v38 = vsel %vm336_vm12, %v541_v17, 0.0  ;;  %v4249_v16 = vpop.xlane.xlu1 %1021 }
 0x2bb   :  { %v667_v42 = vrot.slane %v666_v13, 1  ;;  %v4242_v31 = vpop.eup %3296  ;;  %3298 = vrsqrt.f32 %v4222_v23  ;;  %v597_v54 = vrot.slane %v596_v50, 2  ;;  %v676_v51 = vadd.f32 %v675_v55, %v632_v8  ;;  %vm4259_vm1 = vmor %vm719_vm14, %vm720_vm15 }
 0x2bc   :  { %v589_v48 = vrot.slane %v551_v38, 4  ;;  %3300 = vrsqrt.f32 %v4238_v34  ;;  %v1051_v41 = vsub.f32 2.0, %v4218_v29  ;;  %v1053_v35 = vsub.f32 2.0, %v4233_v14 }
 0x2bd   :  { %v588_v11 = vadd.f32 %v587_v22, %v586_v10  ;;  %v668_v46 = vadd.f32 %v667_v42, %v666_v13  ;;  %v1044_v4 = vmul.f32 %v4236_v60, %v1016_v1  ;;  %v598_v57 = vadd.f32 %v597_v54, %v596_v50 }
 0x2be   :  { %v677_v49 = vrot.slane %v676_v51, 2  ;;  %v590_v30 = vadd.f32 %v589_v48, %v551_v38  ;;  %v631_v8 = vsel %vm420_vm13, %v541_v17, 0.0  ;;  %v718_v55 = vmul.f32 %v4150_v40, %v717_v9  ;;  %1634 = vadd.xlane.f32.xlu0 %v1633_v43  ;;  %1640 = vadd.xlane.f32.xlu2 %v4184_v7 }
 0x2bf   :  { %v606_v6 = vmul.f32 0.0078125, %v588_v11  ;;  %v686_v29 = vmul.f32 0.0078125, %v668_v46  ;;  %v599_v14 = vrot.slane %v598_v57, 1  ;;  %v669_v13 = vrot.slane %v631_v8, 4  ;;  %1628 = vadd.xlane.f32.xlu1 %v4108_v0  ;;  %v4277_v0 = vld [vmem:[%s5342_s1 + $0x60] sm:$0xff] }
 0x2c0   :  { %v678_v10 = vadd.f32 %v677_v49, %v676_v51  ;;  %3302 = vrcp.f32 %v4249_v16  ;;  %v591_v7 = vrot.slane %v590_v30, 2  ;;  %v722_v43 = vsel %vm4259_vm1, %v4150_v40, %v718_v55 }
 0x2c1   :  { %v614_v17 = vsel %vm336_vm12, %v606_v6, 0.0  ;;  %v4270_v50 = vpop.eup %3298  ;;  %v694_v25 = vsel %vm420_vm13, %v686_v29, 0.0  ;;  %v600_v9 = vadd.f32 %v599_v14, %v598_v57  ;;  %v670_v42 = vadd.f32 %v669_v13, %v631_v8  ;;  %v4290_v29 = vld [vmem:[%s5342_s1 + $0x68] sm:$0xff] }
 0x2c2   :  { %v679_v22 = vrot.slane %v678_v10, 1  ;;  %v4279_v6 = vpop.eup %3300  ;;  %v1059_v38 = vmul.f32 %v4199_v27, %v1051_v41  ;;  %v702_v54 = vadd.f32 %v694_v25, %v614_v17  ;;  %v592_v51 = vadd.f32 %v591_v7, %v590_v30 }
 0x2c3   :  { %v793_v40 = vmul.f32 %v722_v43, %v3913_v28  ;;  %v754_v48 = vmul.f32 %v4279_v6, %v4238_v34  ;;  %v608_v11 = vmul.f32 0.0078125, %v600_v9  ;;  %v671_v57 = vrot.slane %v670_v42, 2 }
 0x2c4   :  { %v680_v46 = vadd.f32 %v679_v22, %v678_v10  ;;  %v4285_v49 = vadd.f32 1e-05, %v702_v54  ;;  %v1052_v8 = vsub.f32 2.0, %v1044_v4  ;;  %v593_v55 = vrot.slane %v592_v51, 1 }
 0x2c5   :  { %v801_v27 = vmul.f32 %v793_v40, %v4277_v0  ;;  %v755_v30 = vmul.f32 %v4279_v6, %v754_v48  ;;  %v616_v28 = vsel %vm336_vm12, %v608_v11, 0.0  ;;  %v672_v14 = vadd.f32 %v671_v57, %v670_v42 }
 0x2c6   :  { %v688_v41 = vmul.f32 0.0078125, %v680_v46  ;;  %v4296_v10 = vpop.eup %3302  ;;  %v744_v4 = vmul.f32 %v4270_v50, %v4222_v23  ;;  %v4301_v13 = vmul.f32 %v4213_v20, %v1053_v35  ;;  %3304 = vrsqrt.f32 %v4285_v49 }
 0x2c7   :  { %v594_v1 = vadd.f32 %v593_v55, %v592_v51  ;;  %vm739_vm2 = vweird.f32 %v4136_v24  ;;  %v756_v17 = vmul.f32 0.5, %v755_v30  ;;  %v673_v43 = vrot.slane %v672_v14, 1  ;;  %1637 = vadd.xlane.f32.xlu1 %v4165_v37 }
 0x2c8   :  { %v696_v7 = vsel %vm420_vm13, %v688_v41, 0.0  ;;  %v809_v25 = vadd.f32 %v801_v27, %v4290_v29  ;;  %v1067_v42 = vmul.f32 %v3995_v52, %v1059_v38  ;;  %v735_v20 = vmul.f32 %v4186_v45, %v4209_v59 }
 0x2c9   :  { %v704_v9 = vadd.f32 %v696_v7, %v616_v28  ;;  %v607_v22 = vmul.f32 0.0078125, %v594_v1  ;;  %vm759_vm3 = vweird.f32 %v4238_v34  ;;  %v4314_v35 = vmul.f32 %v4236_v60, %v1052_v8 }
 0x2ca   :  { %v674_v54 = vadd.f32 %v673_v43, %v672_v14  ;;  %1093 = vmatpush.msra.mxu2 %v809_v25  ;;  %v724_v51 = vmul.f32 %v4242_v31, %v4196_v2  ;;  %v757_v40 = vsub.f32 1.5, %v756_v17  ;;  %v4322_v37 = vmul.f32 %v4296_v10, %v4249_v16 }
 0x2cb   :  { %v4318_v48 = vadd.f32 1e-05, %v704_v9  ;;  %3203 = vmatmul.msk.f32.vlgmr.msra.gmra.mxu2 %vm962_vm9, %v1067_v42  ;;  %v736_v52 = vmul.f32 0.5, %v735_v20  ;;  %v615_v59 = vsel %vm336_vm12, %v607_v22, 0.0  ;;  %vm740_vm4 = vweird.f32 %v4186_v45 }
 0x2cc   :  { %v687_v60 = vmul.f32 0.0078125, %v674_v54  ;;  %v725_v38 = vmul.f32 %v4242_v31, %v724_v51  ;;  %v3305_v11 = vpop.eup %3304  ;;  %vm729_vm5 = vweird.f32 %v4196_v2  ;;  %v745_v16 = vmul.f32 %v4270_v50, %v744_v4  ;;  %vm741_vm8 = vmor %vm739_vm2, %vm740_vm4 }
 0x2cd   :  { %3306 = vrsqrt.f32 %v4318_v48  ;;  %v737_v46 = vsub.f32 1.5, %v736_v52  ;;  %v764_v57 = vmul.f32 %v3305_v11, %v4285_v49  ;;  %vm730_vm6 = vweird.f32 %v4242_v31 }
 0x2ce   :  { %v695_v8 = vsel %vm420_vm13, %v687_v60, 0.0  ;;  %v726_v55 = vmul.f32 0.5, %v725_v38  ;;  %v746_v28 = vmul.f32 0.5, %v745_v16  ;;  %vm749_vm7 = vweird.f32 %v4222_v23  ;;  %vm731_vm15 = vmor %vm729_vm5, %vm730_vm6 }
 0x2cf   :  { %v703_v27 = vadd.f32 %v695_v8, %v615_v59  ;;  %v738_v30 = vmul.f32 %v4186_v45, %v737_v46  ;;  %v765_v41 = vmul.f32 %v3305_v11, %v764_v57  ;;  %v758_v4 = vmul.f32 %v4279_v6, %v757_v40 }
 0x2d0   :  { %v727_v14 = vsub.f32 1.5, %v726_v55  ;;  %vm760_vm10 = vweird.f32 %v4279_v6  ;;  %v747_v7 = vsub.f32 1.5, %v746_v28  ;;  %vm750_vm11 = vweird.f32 %v4270_v50 }
 0x2d1   :  { %v4344_v1 = vadd.f32 1e-05, %v703_v27  ;;  %v742_v17 = vsel %vm741_vm8, %v4186_v45, %v738_v30  ;;  %vm761_vm14 = vmor %vm759_vm3, %vm760_vm10  ;;  %v766_v43 = vmul.f32 0.5, %v765_v41  ;;  %vm770_vm1 = vweird.f32 %v3305_v11 }
 0x2d2   :  { %v795_v25 = vmul.f32 %v742_v17, %v3927_v56  ;;  %v728_v24 = vmul.f32 %v4242_v31, %v727_v14  ;;  %v762_v9 = vsel %vm761_vm14, %v4279_v6, %v758_v4  ;;  %v748_v45 = vmul.f32 %v4270_v50, %v747_v7  ;;  %vm751_vm2 = vmor %vm749_vm7, %vm750_vm11 }
 0x2d3   :  { %v3307_v22 = vpop.eup %3306  ;;  %3308 = vrsqrt.f32 %v4344_v1  ;;  %v797_v34 = vmul.f32 %v762_v9, %v3989_v5  ;;  %v767_v42 = vsub.f32 1.5, %v766_v43  ;;  %vm769_vm3 = vweird.f32 %v4285_v49 }
 0x2d4   :  { %v784_v56 = vmul.f32 %v3307_v22, %v4318_v48  ;;  %v803_v20 = vmul.f32 %v795_v25, %v4277_v0  ;;  %v732_v6 = vsel %vm731_vm15, %v4242_v31, %v728_v24  ;;  %v752_v54 = vsel %vm751_vm2, %v4270_v50, %v748_v45  ;;  %vm771_vm4 = vmor %vm769_vm3, %vm770_vm1 }
 0x2d5   :  { %v794_v2 = vmul.f32 %v732_v6, %v3949_v26  ;;  %v805_v5 = vmul.f32 %v797_v34, %v4277_v0  ;;  %v796_v52 = vmul.f32 %v752_v54, %v3966_v53  ;;  %v768_v59 = vmul.f32 %v3305_v11, %v767_v42 }
 0x2d6   :  { %v785_v51 = vmul.f32 %v3307_v22, %v784_v56  ;;  %v811_v40 = vadd.f32 %v803_v20, %v4290_v29  ;;  %v1069_v31 = vmul.f32 %v3991_v12, %v4301_v13  ;;  %v1054_v46 = vsub.f32 2.0, %v4322_v37 }
 0x2d7   :  { %v802_v23 = vmul.f32 %v794_v2, %v4277_v0  ;;  %v813_v60 = vadd.f32 %v805_v5, %v4290_v29  ;;  %v804_v50 = vmul.f32 %v796_v52, %v4277_v0  ;;  %v772_v49 = vsel %vm771_vm4, %v3305_v11, %v768_v59  ;;  %v2322_v2 = vld [vmem:[%s5342_s1 + $0xb0] sm:$0xff]  ;;  %v2321_v5 = vld [vmem:[%s5342_s1 + $0xa8] sm:$0xff] }
 0x2d8   :  { %v786_v26 = vmul.f32 0.5, %v785_v51  ;;  %1139 = vmatpush.msrb.mxu2 %v811_v40  ;;  %v1068_v16 = vmul.f32 %v4017_v39, %v4314_v35  ;;  %v798_v12 = vmul.f32 %v772_v49, %v4002_v47  ;;  %vm790_vm5 = vweird.f32 %v3307_v22 }
 0x2d9   :  { %v3309_v38 = vpop.eup %3308  ;;  %v810_v53 = vadd.f32 %v802_v23, %v4290_v29  ;;  %3205 = vmatmul.msk.f32.vlgmr.msrb.gmra.mxu2 %vm962_vm9, %v1069_v31  ;;  %v812_v8 = vadd.f32 %v804_v50, %v4290_v29  ;;  %vm789_vm6 = vweird.f32 %v4318_v48  ;;  %v1062_v47 = vmul.f32 %v4296_v10, %v1054_v46  ;;  %v2320_v31 = vld [vmem:[%s5342_s1 + $0xa0] sm:$0xff] }
 0x2da   :  { %v787_v13 = vsub.f32 1.5, %v786_v26  ;;  %v774_v57 = vmul.f32 %v3309_v38, %v4344_v1  ;;  %1185 = vmatpush.msra.mxu2 %v813_v60  ;;  %v806_v11 = vmul.f32 %v798_v12, %v4277_v0  ;;  %vm791_vm7 = vmor %vm789_vm6, %vm790_vm5  ;;  %vm780_vm8 = vweird.f32 %v3309_v38 }
 0x2db   :  { %1116 = vmatpush.msra.mxu3 %v810_v53  ;;  %v1070_v48 = vmul.f32 %v4026_v32, %v1062_v47  ;;  %vm779_vm10 = vweird.f32 %v4344_v1  ;;  %v5365_v53 = vmax.f32 %v4140_v3, 0.0  ;;  %v5366_v12 = vmax.f32 %v4044_v33, 0.0  ;;  %v2319_v33 = vld [vmem:[%s5342_s1 + $0x98] sm:$0xff] }
 0x2dc   :  { %v775_v37 = vmul.f32 %v3309_v38, %v774_v57  ;;  %3204 = vmatmul.msk.f32.vlgmr.msra.gmra.mxu3 %vm962_vm9, %v1068_v16  ;;  %v788_v39 = vmul.f32 %v3307_v22, %v787_v13  ;;  %v814_v35 = vadd.f32 %v806_v11, %v4290_v29  ;;  %vm781_vm11 = vmor %vm779_vm10, %vm780_vm8 }
 0x2dd   :  { %1162 = vmatpush.msrb.mxu3 %v812_v8  ;;  %v5367_v8 = vmax.f32 %v4052_v15, 0.0 }
 0x2de   :  { %v776_v55 = vmul.f32 0.5, %v775_v37  ;;  %v792_v27 = vsel %vm791_vm7, %v3307_v22, %v788_v39 }
 0x2df   :  { %1208 = vmatpush.msra.mxu3 %v814_v35  ;;  %v800_v30 = vmul.f32 %v792_v27, %v4007_v44 }
 0x2e0   :  { %v777_v28 = vsub.f32 1.5, %v776_v55 }
 0x2e1   :  { %v808_v41 = vmul.f32 %v800_v30, %v4277_v0 }
 0x2e2   :  { %v778_v14 = vmul.f32 %v3309_v38, %v777_v28 }
 0x2e3   :  { %v816_v4 = vadd.f32 %v808_v41, %v4290_v29 }
 0x2e4   :  { %3206 = vmatmul.msk.f32.vlgmr.msrb.gmra.mxu3 %vm962_vm9, %v1070_v48  ;;  %v782_v10 = vsel %vm781_vm11, %v3309_v38, %v778_v14 }
 0x2e5   :  { %1254 = vmatpush.msrb.mxu3 %v816_v4  ;;  %v799_v17 = vmul.f32 %v782_v10, %v4024_v19  ;;  %v5368_v10 = vmax.f32 %v4115_v36, 0.0  ;;  %v5373_v36 = vld [vmem:[#allocation8_spill] sm:$0xff] }
 0x2e7   :  { %v807_v44 = vmul.f32 %v799_v17, %v4277_v0  ;;  %v5364_v0 = vmax.f32 %v4061_v61, 0.0 }
 0x2e9   :  { %v815_v7 = vadd.f32 %v807_v44, %v4290_v29  ;;  %v5369_v44 = vld [vmem:[#allocation7_spill] sm:$0xff] }
 0x2eb   :  { %1231 = vmatpush.msrb.mxu2 %v815_v7  ;;  %v5370_v7 = vmax.f32 %v5369_v44, 0.0 }
 0x317   :  { %v1025_v43 = vpop.xlane.xlu0 %1024 }
 0x318   :  { %3310 = vrcp.f32 %v1025_v43 }
 0x319   :  { %v1031_v32 = vpop.xlane.xlu2 %1030 }
 0x31a   :  { %3312 = vrcp.f32 %v1031_v32 }
 0x31e   :  { %v3311_v1 = vpop.eup %3310 }
 0x31f   :  { %v1047_v25 = vmul.f32 %v3311_v1, %v1025_v43 }
 0x320   :  { %v3313_v24 = vpop.eup %3312 }
 0x321   :  { %v1049_v9 = vmul.f32 %v3313_v24, %v1031_v32  ;;  %v1055_v22 = vsub.f32 2.0, %v1047_v25  ;;  %v1623_v45 = vpop.xlane.xlu2 %1622  ;;  %v1034_v34 = vpop.xlane.xlu0 %1033  ;;  %v5371_v32 = vld [vmem:[#allocation5_spill] sm:$0xff] }
 0x322   :  { %v1643_v42 = vmul.f32 %v1623_v45, %v3621_v62  ;;  %v1028_v56 = vpop.xlane.xlu1 %1027  ;;  %3314 = vrcp.f32 %v1034_v34 }
 0x323   :  { %v1063_v19 = vmul.f32 %v3311_v1, %v1055_v22  ;;  %3316 = vrcp.f32 %v1028_v56  ;;  %v1057_v20 = vsub.f32 2.0, %v1049_v9  ;;  %v5372_v1 = vmax.f32 %v5371_v32, 0.0 }
 0x324   :  { %v4404_v29 = vsub.f32 %v5364_v0, %v1643_v42 }
 0x325   :  { %v1071_v6 = vmul.f32 %v4110_v21, %v1063_v19  ;;  %v1065_v52 = vmul.f32 %v3313_v24, %v1057_v20  ;;  %v5374_v20 = vld [vmem:[#allocation6_spill] sm:$0xff] }
 0x326   :  { %v1659_v54 = vmul.f32 %v4404_v29, %v4404_v29 }
 0x327   :  { %3207 = vmatmul.msk.f32.vlgmr.msra.gmra.mxu2 %vm962_vm9, %v1071_v6  ;;  %v1073_v57 = vmul.f32 %v4128_v58, %v1065_v52  ;;  %v5375_v6 = vmax.f32 %v5374_v20, 0.0  ;;  %v4570_v20 = vld [vmem:[%s5342_s1 + $0x88] ss:$0 sm:$0xff] }
 0x328   :  { %v3315_v51 = vpop.eup %3314  ;;  %v1669_v61 = vsel %vm98_vm0, %v1659_v54, 0.0  ;;  %2361 = vmatpush.msra.mxu2 %v2322_v2 }
 0x329   :  { %v3317_v40 = vpop.eup %3316  ;;  %v1632_v21 = vpop.xlane.xlu2 %1631  ;;  %1670 = vadd.xlane.f32.xlu1 %v1669_v61  ;;  %v1050_v46 = vmul.f32 %v3315_v51, %v1034_v34 }
 0x32a   :  { %v1626_v59 = vpop.xlane.xlu0 %1625  ;;  %v1048_v23 = vmul.f32 %v3317_v40, %v1028_v56  ;;  %v1646_v60 = vmul.f32 %v1632_v21, %v3621_v62  ;;  %v1620_v26 = vpop.xlane.xlu1 %1619  ;;  %2362 = vmatpush.msra.mxu2 %v2321_v5 }
 0x32b   :  { %v1644_v50 = vmul.f32 %v1626_v59, %v3621_v62  ;;  %v1642_v49 = vmul.f32 %v1620_v26, %v3621_v62  ;;  %v1058_v58 = vsub.f32 2.0, %v1050_v46 }
 0x32c   :  { %v1056_v38 = vsub.f32 2.0, %v1048_v23  ;;  %v4425_v16 = vsub.f32 %v5365_v53, %v1646_v60  ;;  %2363 = vmatpush.msra.mxu2 %v2320_v31 }
 0x32d   :  { %v4429_v13 = vsub.f32 %v5366_v12, %v1644_v50  ;;  %v4434_v11 = vsub.f32 %v5367_v8, %v1642_v49  ;;  %v1066_v4 = vmul.f32 %v3315_v51, %v1058_v58 }
 0x32e   :  { %v1064_v37 = vmul.f32 %v3317_v40, %v1056_v38  ;;  %v1662_v39 = vmul.f32 %v4425_v16, %v4425_v16  ;;  %2364 = vmatpush.msra.mxu2 %v2319_v33 }
 0x32f   :  { %v1660_v3 = vmul.f32 %v4429_v13, %v4429_v13  ;;  %v1658_v35 = vmul.f32 %v4434_v11, %v4434_v11  ;;  %3209 = vmatmul.msk.f32.vlgmr.msrb.gmra.mxu2 %vm962_vm9, %v1073_v57  ;;  %v1074_v45 = vmul.f32 %v5373_v36, %v1066_v4  ;;  %v4559_v36 = vld [vmem:[%s5342_s1 + $0x80] ss:$0 sm:$0xff] }
 0x330   :  { %v1072_v15 = vmul.f32 %v4170_v63, %v1064_v37  ;;  %v1678_v47 = vsel %vm98_vm0, %v1662_v39, 0.0 }
 0x331   :  { %v1672_v55 = vsel %vm98_vm0, %v1660_v3, 0.0  ;;  %v1641_v27 = vpop.xlane.xlu2 %1640  ;;  %1679 = vadd.xlane.f32.xlu1 %v1678_v47  ;;  %v1666_v30 = vsel %vm98_vm0, %v1658_v35, 0.0 }
 0x332   :  { %1673 = vadd.xlane.f32.xlu2 %v1672_v55  ;;  %v1635_v28 = vpop.xlane.xlu0 %1634  ;;  %v1649_v41 = vmul.f32 %v1641_v27, %v3621_v62  ;;  %1667 = vadd.xlane.f32.xlu0 %v1666_v30  ;;  %v1629_v48 = vpop.xlane.xlu1 %1628  ;;  %v4523_v55 = vld [vmem:[%s5342_s1 + $0x90] sm:$0xff] }
 0x333   :  { %3208 = vmatmul.msk.f32.vlgmr.msra.gmra.mxu3 %vm962_vm9, %v1072_v15  ;;  %v1647_v63 = vmul.f32 %v1635_v28, %v3621_v62  ;;  %v1645_v14 = vmul.f32 %v1629_v48, %v3621_v62 }
 0x334   :  { %v4456_v17 = vsub.f32 %v5368_v10, %v1649_v41  ;;  %3219 = vmatpush.xpose.msk.msra.mxu3 %vm98_vm0, %v4523_v55 }
 0x335   :  { %v4460_v43 = vsub.f32 %v5370_v7, %v1647_v63  ;;  %v4464_v25 = vsub.f32 %v5372_v1, %v1645_v14 }
 0x336   :  { %v1665_v24 = vmul.f32 %v4456_v17, %v4456_v17 }
 0x337   :  { %v1663_v9 = vmul.f32 %v4460_v43, %v4460_v43  ;;  %v1661_v22 = vmul.f32 %v4464_v25, %v4464_v25 }
 0x338   :  { %v1687_v34 = vsel %vm98_vm0, %v1665_v24, 0.0 }
 0x339   :  { %v1681_v42 = vsel %vm98_vm0, %v1663_v9, 0.0  ;;  %1688 = vadd.xlane.f32.xlu1 %v1687_v34  ;;  %v1675_v56 = vsel %vm98_vm0, %v1661_v22, 0.0 }
 0x33a   :  { %1682 = vadd.xlane.f32.xlu2 %v1681_v42  ;;  %1676 = vadd.xlane.f32.xlu0 %v1675_v56  ;;  %v1638_v19 = vpop.xlane.xlu1 %1637 }
 0x33b   :  { %3210 = vmatmul.msk.f32.vlgmr.msrb.gmra.mxu3 %vm962_vm9, %v1074_v45  ;;  %v1648_v0 = vmul.f32 %v1638_v19, %v3621_v62 }
 0x33d   :  { %v4480_v2 = vsub.f32 %v5375_v6, %v1648_v0 }
 0x33f   :  { %v1664_v54 = vmul.f32 %v4480_v2, %v4480_v2 }
 0x341   :  { %v1684_v5 = vsel %vm98_vm0, %v1664_v54, 0.0 }
 0x342   :  { %1685 = vadd.xlane.f32.xlu0 %v1684_v5 }
 0x34e   :  { %v4485_v51 = vpop.f32.mrf.mxu2 }
 0x34f   :  { %3211 = vmatmul.msk.f32.vlgmr.msra.gmra.mxu2 %vm98_vm0, %v4485_v51 }
 0x35c   :  { %v4493_v40 = vpop.f32.mrf.mxu2 }
 0x35f   :  { %v4489_v61 = vpop.f32.mrf.mxu3 }
 0x360   :  { %3212 = vmatmul.msk.f32.gmra.mxu2 %vm98_vm0, %v4489_v61 }
 0x367   :  { %v4497_v52 = vpop.f32.mrf.mxu3 }
 0x368   :  { %3213 = vmatmul.msk.f32.gmra.mxu2 %vm98_vm0, %v4493_v40 }
 0x370   :  { %3214 = vmatmul.msk.f32.gmra.mxu2 %vm98_vm0, %v4497_v52 }
 0x39c   :  { %v1671_v21 = vpop.xlane.xlu1 %1670 }
 0x39d   :  { %v1691_v59 = vmul.f32 %v1671_v21, %v3621_v62 }
 0x39f   :  { %v1699_v31 = vadd.f32 1e-05, %v1691_v59 }
 0x3a1   :  { %3318 = vrsqrt.f32 %v1699_v31  ;;  %vm1722_vm15 = vweird.f32 %v1699_v31 }
 0x3a4   :  { %v1680_v23 = vpop.xlane.xlu1 %1679 }
 0x3a5   :  { %v1674_v60 = vpop.xlane.xlu2 %1673  ;;  %v1694_v26 = vmul.f32 %v1680_v23, %v3621_v62  ;;  %v1668_v49 = vpop.xlane.xlu0 %1667 }
 0x3a6   :  { %v1692_v50 = vmul.f32 %v1674_v60, %v3621_v62  ;;  %v1690_v38 = vmul.f32 %v1668_v49, %v3621_v62 }
 0x3a7   :  { %v3319_v46 = vpop.eup %3318  ;;  %v4505_v53 = vadd.f32 1e-05, %v1694_v26 }
 0x3a8   :  { %v4507_v12 = vadd.f32 1e-05, %v1692_v50  ;;  %v1717_v57 = vmul.f32 %v3319_v46, %v1699_v31  ;;  %v4509_v8 = vadd.f32 1e-05, %v1690_v38  ;;  %vm1723_vm14 = vweird.f32 %v3319_v46 }
 0x3a9   :  { %3320 = vrsqrt.f32 %v4505_v53  ;;  %vm4542_vm1 = vmor %vm1722_vm15, %vm1723_vm14  ;;  %vm1752_vm2 = vweird.f32 %v4505_v53 }
 0x3aa   :  { %v1718_v37 = vmul.f32 %v3319_v46, %v1717_v57  ;;  %3322 = vrsqrt.f32 %v4507_v12  ;;  %v4513_v39 = vpop.f32.mrf.mxu2  ;;  %vm1732_vm4 = vweird.f32 %v4507_v12  ;;  %vm1712_vm8 = vweird.f32 %v4509_v8 }
 0x3ab   :  { %3324 = vrsqrt.f32 %v4509_v8  ;;  %3215 = vmatmul.msk.f32.gmra.mxu2 %vm98_vm0, %v4513_v39 }
 0x3ac   :  { %v1719_v3 = vmul.f32 0.5, %v1718_v37  ;;  %v1689_v33 = vpop.xlane.xlu1 %1688 }
 0x3ad   :  { %v1683_v35 = vpop.xlane.xlu2 %1682  ;;  %v1697_v15 = vmul.f32 %v1689_v33, %v3621_v62  ;;  %v1677_v47 = vpop.xlane.xlu0 %1676 }
 0x3ae   :  { %v1695_v58 = vmul.f32 %v1683_v35, %v3621_v62  ;;  %v1720_v27 = vsub.f32 1.5, %v1719_v3  ;;  %v1693_v30 = vmul.f32 %v1677_v47, %v3621_v62 }
 0x3af   :  { %v4528_v28 = vpop.eup %3320  ;;  %v4530_v41 = vadd.f32 1e-05, %v1697_v15 }
 0x3b0   :  { %v4532_v48 = vadd.f32 1e-05, %v1695_v58  ;;  %v4534_v63 = vpop.eup %3322  ;;  %v1721_v14 = vmul.f32 %v3319_v46, %v1720_v27  ;;  %v1747_v4 = vmul.f32 %v4528_v28, %v4505_v53  ;;  %v4538_v10 = vadd.f32 1e-05, %v1693_v30 }
 0x3b1   :  { %v4540_v44 = vpop.eup %3324  ;;  %v1727_v32 = vmul.f32 %v4534_v63, %v4507_v12  ;;  %3326 = vrsqrt.f32 %v4530_v41  ;;  %vm1753_vm3 = vweird.f32 %v4528_v28  ;;  %vm1733_vm5 = vweird.f32 %v4534_v63 }
 0x3b2   :  { %v1725_v1 = vsel %vm4542_vm1, %v3319_v46, %v1721_v14  ;;  %v1748_v24 = vmul.f32 %v4528_v28, %v1747_v4  ;;  %v1707_v9 = vmul.f32 %v4540_v44, %v4509_v8  ;;  %3328 = vrsqrt.f32 %v4532_v48  ;;  %vm4589_vm7 = vmor %vm1752_vm2, %vm1753_vm3  ;;  %v4627_v30 = vpop.f32.mrf.mxu2 }
 0x3b3   :  { %v1728_v22 = vmul.f32 %v4534_v63, %v1727_v32  ;;  %3330 = vrsqrt.f32 %v4538_v10  ;;  %v1787_v0 = vmul.f32 %v1725_v1, %v4404_v29  ;;  %vm1713_vm6 = vweird.f32 %v4540_v44  ;;  %vm4603_vm10 = vmor %vm1732_vm4, %vm1733_vm5 }
 0x3b4   :  { %v1749_v45 = vmul.f32 0.5, %v1748_v24  ;;  %v1708_v34 = vmul.f32 %v4540_v44, %v1707_v9  ;;  %vm4616_vm11 = vmor %vm1712_vm8, %vm1713_vm6  ;;  %vm1782_vm14 = vweird.f32 %v4530_v41  ;;  %vm1762_vm4 = vweird.f32 %v4532_v48 }
 0x3b5   :  { %v1729_v42 = vmul.f32 0.5, %v1728_v22  ;;  %v1686_v19 = vpop.xlane.xlu0 %1685  ;;  %v1796_v29 = vmul.f32 %v4559_v36, %v1787_v0  ;;  %vm1742_vm6 = vweird.f32 %v4538_v10 }
 0x3b6   :  { %v4564_v56 = vpop.f32.mrf.mxu3  ;;  %v1750_v6 = vsub.f32 1.5, %v1749_v45  ;;  %v1709_v54 = vmul.f32 0.5, %v1708_v34  ;;  %v1696_v5 = vmul.f32 %v1686_v19, %v3621_v62 }
 0x3b7   :  { %3216 = vmatmul.msk.f32.gmra.mxu2 %vm98_vm0, %v4564_v56  ;;  %v4576_v21 = vpop.eup %3326  ;;  %v1730_v59 = vsub.f32 1.5, %v1729_v42  ;;  %v1805_v38 = vadd.f32 %v4570_v20, %v1796_v29 }
 0x3b8   :  { %v1751_v31 = vmul.f32 %v4528_v28, %v1750_v6  ;;  %v1710_v23 = vsub.f32 1.5, %v1709_v54  ;;  %v1777_v62 = vmul.f32 %v4576_v21, %v4530_v41  ;;  %v4585_v60 = vpop.eup %3328  ;;  %v4595_v49 = vadd.f32 1e-05, %v1696_v5 }
 0x3b9   :  { %v1731_v50 = vmul.f32 %v4534_v63, %v1730_v59  ;;  %v3331_v46 = vpop.eup %3330  ;;  %v1757_v8 = vmul.f32 %v4585_v60, %v4532_v48  ;;  %vm1783_vm15 = vweird.f32 %v4576_v21  ;;  %vm1763_vm1 = vweird.f32 %v4585_v60 }
 0x3ba   :  { %v1755_v57 = vsel %vm4589_vm7, %v4528_v28, %v1751_v31  ;;  %v1711_v37 = vmul.f32 %v4540_v44, %v1710_v23  ;;  %v1778_v3 = vmul.f32 %v4576_v21, %v1777_v62  ;;  %v1737_v12 = vmul.f32 %v3331_v46, %v4538_v10  ;;  %vm4646_vm2 = vmor %vm1782_vm14, %vm1783_vm15 }
 0x3bb   :  { %v1735_v33 = vsel %vm4603_vm10, %v4534_v63, %v1731_v50  ;;  %v1758_v47 = vmul.f32 %v4585_v60, %v1757_v8  ;;  %3332 = vrsqrt.f32 %v4595_v49  ;;  %v4630_v28 = vadd.f32 %v4523_v55, %v1805_v38  ;;  %vm1764_vm5 = vmor %vm1762_vm4, %vm1763_vm1 }
 0x3bc   :  { %v1715_v15 = vsel %vm4616_vm11, %v4540_v44, %v1711_v37  ;;  %v1779_v58 = vmul.f32 0.5, %v1778_v3  ;;  %v1738_v27 = vmul.f32 %v3331_v46, %v1737_v12  ;;  %v1790_v63 = vmul.f32 %v1755_v57, %v4425_v16 }
 0x3bd   :  { %v1759_v4 = vmul.f32 0.5, %v1758_v47  ;;  %v1788_v44 = vmul.f32 %v1735_v33, %v4429_v13  ;;  %v1826_v32 = vsel %vm98_vm0, %v4630_v28, 0.0  ;;  %v1786_v24 = vmul.f32 %v1715_v15, %v4434_v11 }
 0x3be   :  { %v1780_v14 = vsub.f32 1.5, %v1779_v58  ;;  %v1739_v7 = vmul.f32 0.5, %v1738_v27  ;;  %v1799_v1 = vmul.f32 %v4559_v36, %v1790_v63  ;;  %1827 = vadd.xlane.f32.xlu0 %v1826_v32  ;;  %vm1743_vm3 = vweird.f32 %v3331_v46  ;;  %v4669_v62 = vpop.f32.mrf.mxu3  ;;  %v3248_v63 = vld [vmem:[%s5342_s1 + $0xb8] ss:$0 sm:$0xff] }
 0x3bf   :  { %3217 = vmatmul.msk.f32.gmra.mxu2 %vm98_vm0, %v4627_v30  ;;  %v1760_v16 = vsub.f32 1.5, %v1759_v4  ;;  %v1797_v22 = vmul.f32 %v4559_v36, %v1788_v44  ;;  %v1795_v11 = vmul.f32 %v4559_v36, %v1786_v24  ;;  %vm1744_vm7 = vmor %vm1742_vm6, %vm1743_vm3  ;;  %vm1772_vm10 = vweird.f32 %v4595_v49  ;;  %v2399_v24 = vld [vmem:[%s5342_s1 + $0xc8] sm:$0xff] }
 0x3c0   :  { %v1781_v9 = vmul.f32 %v4576_v21, %v1780_v14  ;;  %v1740_v45 = vsub.f32 1.5, %v1739_v7  ;;  %v1808_v34 = vadd.f32 %v4570_v20, %v1799_v1  ;;  %v2398_v1 = vld [vmem:[%s5342_s1 + $0xc0] sm:$0xff] }
 0x3c1   :  { %v3333_v42 = vpop.eup %3332  ;;  %v1761_v0 = vmul.f32 %v4585_v60, %v1760_v16  ;;  %v1806_v41 = vadd.f32 %v4570_v20, %v1797_v22  ;;  %v1804_v29 = vadd.f32 %v4570_v20, %v1795_v11  ;;  %v2400_v16 = vmul.f32 %v2398_v1, %v4485_v51 }
 0x3c2   :  { %v1785_v19 = vsel %vm4646_vm2, %v4576_v21, %v1781_v9  ;;  %v1741_v6 = vmul.f32 %v3331_v46, %v1740_v45  ;;  %v1767_v54 = vmul.f32 %v3333_v42, %v4595_v49  ;;  %v4661_v5 = vadd.f32 %v4523_v55, %v1808_v34 }
 0x3c3   :  { %v1765_v59 = vsel %vm1764_vm5, %v4585_v60, %v1761_v0  ;;  %v4665_v21 = vadd.f32 %v4523_v55, %v1806_v41  ;;  %v1793_v48 = vmul.f32 %v1785_v19, %v4456_v17  ;;  %v4677_v50 = vadd.f32 %v4523_v55, %v1804_v29 }
 0x3c4   :  { %v1745_v31 = vsel %vm1744_vm7, %v3331_v46, %v1741_v6  ;;  %v1768_v23 = vmul.f32 %v3333_v42, %v1767_v54  ;;  %v1835_v10 = vsel %vm98_vm0, %v4661_v5, 0.0  ;;  %v1791_v26 = vmul.f32 %v1765_v59, %v4460_v43 }
 0x3c5   :  { %v1829_v60 = vsel %vm98_vm0, %v4665_v21, 0.0  ;;  %v1802_v17 = vmul.f32 %v4559_v36, %v1793_v48  ;;  %v1789_v38 = vmul.f32 %v1745_v31, %v4464_v25  ;;  %v1823_v43 = vsel %vm98_vm0, %v4677_v50, 0.0 }
 0x3c6   :  { %v1769_v46 = vmul.f32 0.5, %v1768_v23  ;;  %1830 = vadd.xlane.f32.xlu1 %v1829_v60  ;;  %v1800_v57 = vmul.f32 %v4559_v36, %v1791_v26  ;;  %1836 = vadd.xlane.f32.xlu0 %v1835_v10  ;;  %vm1773_vm8 = vweird.f32 %v3333_v42  ;;  %v2401_v11 = vmul.f32 %v2398_v1, %v4489_v61 }
 0x3c7   :  { %3218 = vmatmul.msk.f32.gmra.mxu2 %vm98_vm0, %v4669_v62  ;;  %v1811_v53 = vadd.f32 %v4570_v20, %v1802_v17  ;;  %v1798_v37 = vmul.f32 %v4559_v36, %v1789_v38  ;;  %1824 = vadd.xlane.f32.xlu2 %v1823_v43  ;;  %vm1774_vm11 = vmor %vm1772_vm10, %vm1773_vm8  ;;  %v2402_v6 = vmul.f32 %v2398_v1, %v4493_v40 }
 0x3c8   :  { %v1770_v3 = vsub.f32 1.5, %v1769_v46  ;;  %v1809_v8 = vadd.f32 %v4570_v20, %v1800_v57  ;;  %v2403_v23 = vmul.f32 %v2398_v1, %v4497_v52  ;;  %v2404_v46 = vmul.f32 %v2398_v1, %v4513_v39 }
 0x3c9   :  { %v4690_v33 = vadd.f32 %v4523_v55, %v1811_v53  ;;  %v1807_v25 = vadd.f32 %v4570_v20, %v1798_v37 }
 0x3ca   :  { %v1771_v35 = vmul.f32 %v3333_v42, %v1770_v3  ;;  %v4695_v12 = vadd.f32 %v4523_v55, %v1809_v8 }
 0x3cb   :  { %v4698_v15 = vadd.f32 %v4523_v55, %v1807_v25  ;;  %v1844_v47 = vsel %vm98_vm0, %v4690_v33, 0.0 }
 0x3cc   :  { %v1775_v58 = vsel %vm1774_vm11, %v3333_v42, %v1771_v35  ;;  %v1838_v27 = vsel %vm98_vm0, %v4695_v12, 0.0  ;;  %v2405_v35 = vmul.f32 %v2398_v1, %v4564_v56 }
 0x3cd   :  { %v1832_v49 = vsel %vm98_vm0, %v4698_v15, 0.0  ;;  %v1792_v14 = vmul.f32 %v1775_v58, %v4480_v2 }
 0x3ce   :  { %1839 = vadd.xlane.f32.xlu1 %v1838_v27  ;;  %1845 = vadd.xlane.f32.xlu0 %v1844_v47 }
 0x3cf   :  { %v1801_v4 = vmul.f32 %v4559_v36, %v1792_v14  ;;  %1833 = vadd.xlane.f32.xlu2 %v1832_v49 }
 0x3d1   :  { %v1810_v32 = vadd.f32 %v4570_v20, %v1801_v4  ;;  %v2406_v4 = vmul.f32 %v2398_v1, %v4627_v30 }
 0x3d2   :  { %v2366_v44 = vpop.f32.mrf.mxu2 }
 0x3d3   :  { %v2367_v7 = vadd.f32 %v3248_v63, %v2366_v44  ;;  %v4719_v2 = vadd.f32 %v4523_v55, %v1810_v32 }
 0x3d5   :  { %v2390_v9 = vmax.f32 %v2367_v7, 0.0  ;;  %v1841_v22 = vsel %vm98_vm0, %v4719_v2, 0.0 }
 0x3d7   :  { %v2408_v36 = vmul.f32 %v2399_v24, %v2390_v9  ;;  %1842 = vadd.xlane.f32.xlu2 %v1841_v22 }
 0x3d9   :  { %v2416_v13 = vadd.f32 %v2408_v36, %v2400_v16 }
 0x3db   :  { %3220 = vmatmul.msk.f32.vlgmr.msra.gmra.mxu3 %vm98_vm0, %v2416_v13  ;;  %v2407_v13 = vmul.f32 %v2398_v1, %v4669_v62 }
 0x3e3   :  { %v2369_v20 = vpop.f32.mrf.mxu2 }
 0x3e4   :  { %v2370_v45 = vadd.f32 %v3248_v63, %v2369_v20 }
 0x3e6   :  { %v2391_v34 = vmax.f32 %v2370_v45, 0.0 }
 0x3e8   :  { %v2409_v42 = vmul.f32 %v2399_v24, %v2391_v34 }
 0x3ea   :  { %v2417_v19 = vadd.f32 %v2409_v42, %v2401_v11 }
 0x3eb   :  { %v2372_v0 = vpop.f32.mrf.mxu2 }
 0x3ec   :  { %v2373_v55 = vadd.f32 %v3248_v63, %v2372_v0  ;;  %3221 = vmatmul.msk.f32.gmra.mxu3 %vm98_vm0, %v2417_v19 }
 0x3ee   :  { %v2392_v41 = vmax.f32 %v2373_v55, 0.0 }
 0x3f0   :  { %v2410_v54 = vmul.f32 %v2399_v24, %v2392_v41 }
 0x3f2   :  { %v2418_v59 = vadd.f32 %v2410_v54, %v2402_v6 }
 0x3f3   :  { %v2375_v29 = vpop.f32.mrf.mxu2 }
 0x3f4   :  { %v2376_v48 = vadd.f32 %v3248_v63, %v2375_v29  ;;  %3222 = vmatmul.msk.f32.gmra.mxu3 %vm98_vm0, %v2418_v59 }
 0x3f6   :  { %v2393_v31 = vmax.f32 %v2376_v48, 0.0 }
 0x3f8   :  { %v2411_v10 = vmul.f32 %v2399_v24, %v2393_v31 }
 0x3fa   :  { %v2419_v26 = vadd.f32 %v2411_v10, %v2403_v23 }
 0x3fc   :  { %3223 = vmatmul.msk.f32.gmra.mxu3 %vm98_vm0, %v2419_v26 }
 0x42e   :  { %v2378_v60 = vpop.f32.mrf.mxu2 }
 0x42f   :  { %v2379_v17 = vadd.f32 %v3248_v63, %v2378_v60 }
 0x431   :  { %v2394_v38 = vmax.f32 %v2379_v17, 0.0 }
 0x433   :  { %v2412_v57 = vmul.f32 %v2399_v24, %v2394_v38 }
 0x435   :  { %v2420_v43 = vadd.f32 %v2412_v57, %v2404_v46 }
 0x437   :  { %3224 = vmatmul.msk.f32.gmra.mxu3 %vm98_vm0, %v2420_v43 }
 0x43a   :  { %v2381_v53 = vpop.f32.mrf.mxu2  ;;  %v1825_v7 = vpop.xlane.xlu2 %1824 }
 0x43b   :  { %v2382_v37 = vadd.f32 %v3248_v63, %v2381_v53  ;;  %v1847_v16 = vsel %vm336_vm12, %v1825_v7, 0.0  ;;  %v1927_v36 = vsel %vm420_vm13, %v1825_v7, 0.0 }
 0x43c   :  { %v1855_v20 = vrot.slane %v1847_v16, 4  ;;  %v1935_v45 = vrot.slane %v1927_v36, 4 }
 0x43d   :  { %v2395_v3 = vmax.f32 %v2382_v37, 0.0 }
 0x43e   :  { %v1856_v42 = vadd.f32 %v1855_v20, %v1847_v16  ;;  %v1936_v19 = vadd.f32 %v1935_v45, %v1927_v36 }
 0x43f   :  { %v2413_v25 = vmul.f32 %v2399_v24, %v2395_v3  ;;  %v1828_v3 = vpop.xlane.xlu0 %1827 }
 0x440   :  { %v1857_v0 = vrot.slane %v1856_v42, 2  ;;  %v1937_v55 = vrot.slane %v1936_v19, 2 }
 0x441   :  { %v2421_v47 = vadd.f32 %v2413_v25, %v2405_v35  ;;  %v1928_v25 = vsel %vm420_vm13, %v1828_v3, 0.0 }
 0x442   :  { %v2384_v8 = vpop.f32.mrf.mxu2  ;;  %v1938_v41 = vadd.f32 %v1937_v55, %v1936_v19 }
 0x443   :  { %v2385_v58 = vadd.f32 %v3248_v63, %v2384_v8  ;;  %3225 = vmatmul.msk.f32.gmra.mxu3 %vm98_vm0, %v2421_v47  ;;  %v1848_v8 = vsel %vm336_vm12, %v1828_v3, 0.0  ;;  %v1831_v47 = vpop.xlane.xlu1 %1830 }
 0x444   :  { %v1939_v54 = vrot.slane %v1938_v41, 1  ;;  %v1861_v35 = vrot.slane %v1848_v8, 4 }
 0x445   :  { %v2396_v27 = vmax.f32 %v2385_v58, 0.0  ;;  %v1941_v58 = vrot.slane %v1928_v25, 4 }
 0x446   :  { %v1940_v48 = vadd.f32 %v1939_v54, %v1938_v41 }
 0x447   :  { %v2414_v14 = vmul.f32 %v2399_v24, %v2396_v27  ;;  %v1862_v27 = vadd.f32 %v1861_v35, %v1848_v8 }
 0x448   :  { %v1983_v23 = vmul.f32 0.0078125, %v1940_v48 }
 0x449   :  { %v2422_v9 = vadd.f32 %v2414_v14, %v2406_v4  ;;  %v1929_v14 = vsel %vm420_vm13, %v1831_v47, 0.0  ;;  %v1863_v7 = vrot.slane %v1862_v27, 2 }
 0x44a   :  { %v2387_v49 = vpop.f32.mrf.mxu2  ;;  %v1991_v17 = vsel %vm420_vm13, %v1983_v23, 0.0 }
 0x44b   :  { %v2388_v44 = vadd.f32 %v3248_v63, %v2387_v49  ;;  %3226 = vmatmul.msk.f32.gmra.mxu3 %vm98_vm0, %v2422_v9  ;;  %v1849_v49 = vsel %vm336_vm12, %v1831_v47, 0.0  ;;  %v1840_v9 = vpop.xlane.xlu1 %1839 }
 0x44c   :  { %v1867_v4 = vrot.slane %v1849_v49, 4  ;;  %v1852_v20 = vsel %vm336_vm12, %v1840_v9, 0.0  ;;  %v1932_v45 = vsel %vm420_vm13, %v1840_v9, 0.0 }
 0x44d   :  { %v2397_v32 = vmax.f32 %v2388_v44, 0.0  ;;  %v1947_v44 = vrot.slane %v1929_v14, 4  ;;  %v1965_v55 = vrot.slane %v1932_v45, 4 }
 0x44e   :  { %v1868_v16 = vadd.f32 %v1867_v4, %v1849_v49  ;;  %v1837_v49 = vpop.xlane.xlu0 %1836 }
 0x44f   :  { %v2415_v22 = vmul.f32 %v2399_v24, %v2397_v32  ;;  %v1858_v24 = vadd.f32 %v1857_v0, %v1856_v42  ;;  %v1948_v36 = vadd.f32 %v1947_v44, %v1929_v14  ;;  %v1885_v0 = vrot.slane %v1852_v20, 4 }
 0x451   :  { %v2423_v34 = vadd.f32 %v2415_v22, %v2407_v13  ;;  %v1859_v6 = vrot.slane %v1858_v24, 1  ;;  %v1864_v22 = vadd.f32 %v1863_v7, %v1862_v27 }
 0x453   :  { %3227 = vmatmul.msk.f32.gmra.mxu3 %vm98_vm0, %v2423_v34  ;;  %v1860_v29 = vadd.f32 %v1859_v6, %v1858_v24  ;;  %v1869_v34 = vrot.slane %v1868_v16, 2  ;;  %v1865_v42 = vrot.slane %v1864_v22, 1 }
 0x455   :  { %v1903_v31 = vmul.f32 0.0078125, %v1860_v29  ;;  %v1870_v24 = vadd.f32 %v1869_v34, %v1868_v16  ;;  %v1866_v6 = vadd.f32 %v1865_v42, %v1864_v22  ;;  %v1966_v29 = vadd.f32 %v1965_v55, %v1932_v45 }
 0x456   :  { %v1851_v34 = vsel %vm336_vm12, %v1837_v49, 0.0 }
 0x457   :  { %v1911_v60 = vsel %vm336_vm12, %v1903_v31, 0.0  ;;  %v1871_v48 = vrot.slane %v1870_v24, 1  ;;  %v1904_v23 = vmul.f32 0.0078125, %v1866_v6 }
 0x458   :  { %v1999_v38 = vadd.f32 %v1991_v17, %v1911_v60  ;;  %v1967_v17 = vrot.slane %v1966_v29, 2 }
 0x459   :  { %v1912_v8 = vsel %vm336_vm12, %v1904_v23, 0.0  ;;  %v1846_v23 = vpop.xlane.xlu0 %1845 }
 0x45a   :  { %v4764_v43 = vsub.f32 %v4677_v50, %v1999_v38  ;;  %v1942_v50 = vadd.f32 %v1941_v58, %v1928_v25  ;;  %v1834_v38 = vpop.xlane.xlu2 %1833  ;;  %v1968_v3 = vadd.f32 %v1967_v17, %v1966_v29 }
 0x45b   :  { %v1850_v35 = vsel %vm336_vm12, %v1834_v38, 0.0  ;;  %v1930_v58 = vsel %vm420_vm13, %v1834_v38, 0.0 }
 0x45c   :  { %v2015_v53 = vmul.f32 %v4764_v43, %v4764_v43  ;;  %v1943_v32 = vrot.slane %v1942_v50, 2  ;;  %v1969_v4 = vrot.slane %v1968_v3, 1  ;;  %v1873_v44 = vrot.slane %v1850_v35, 4 }
 0x45d   :  { %v1953_v7 = vrot.slane %v1930_v58, 4 }
 0x45e   :  { %v4742_v11 = vpop.f32.mrf.mxu3  ;;  %v2023_v37 = vsel %vm98_vm0, %v2015_v53, 0.0  ;;  %v1944_v13 = vadd.f32 %v1943_v32, %v1942_v50  ;;  %v1874_v42 = vadd.f32 %v1873_v44, %v1850_v35 }
 0x45f   :  { %v2492_v63 = vsel %vm962_vm9, %v4742_v11, -inf }
 0x460   :  { %2493 = vmax.xlane.f32.xlu1 %v2492_v63  ;;  %v1949_v63 = vrot.slane %v1948_v36, 2  ;;  %v1945_v19 = vrot.slane %v1944_v13, 1 }
 0x462   :  { %v1950_v41 = vadd.f32 %v1949_v63, %v1948_v36  ;;  %v1946_v54 = vadd.f32 %v1945_v19, %v1944_v13  ;;  %v1843_v9 = vpop.xlane.xlu2 %1842  ;;  %v1970_v13 = vadd.f32 %v1969_v4, %v1968_v3  ;;  %v1931_v63 = vsel %vm420_vm13, %v1837_v49, 0.0 }
 0x463   :  { %v1954_v19 = vadd.f32 %v1953_v7, %v1930_v58  ;;  %v1854_v3 = vsel %vm336_vm12, %v1846_v23, 0.0  ;;  %v1934_v58 = vsel %vm420_vm13, %v1846_v23, 0.0 }
 0x464   :  { %v1951_v31 = vrot.slane %v1950_v41, 1  ;;  %v1988_v6 = vmul.f32 0.0078125, %v1970_v13 }
 0x466   :  { %v1952_v53 = vadd.f32 %v1951_v31, %v1950_v41  ;;  %v1955_v31 = vrot.slane %v1954_v19, 2 }
 0x468   :  { %v1985_v50 = vmul.f32 0.0078125, %v1952_v53  ;;  %v1956_v35 = vadd.f32 %v1955_v31, %v1954_v19 }
 0x46a   :  { %v1993_v45 = vsel %vm420_vm13, %v1985_v50, 0.0  ;;  %v1897_v50 = vrot.slane %v1854_v3, 4 }
 0x46f   :  { %v4747_v1 = vpop.f32.mrf.mxu3 }
 0x470   :  { %v2495_v59 = vsel %vm962_vm9, %v4747_v1, -inf }
 0x471   :  { %2496 = vmax.xlane.f32.xlu2 %v2495_v59  ;;  %v1886_v59 = vadd.f32 %v1885_v0, %v1852_v20  ;;  %v1933_v0 = vsel %vm420_vm13, %v1843_v9, 0.0 }
 0x473   :  { %v1887_v60 = vrot.slane %v1886_v59, 2 }
 0x477   :  { %v4751_v10 = vpop.f32.mrf.mxu3 }
 0x478   :  { %v2498_v26 = vsel %vm962_vm9, %v4751_v10, -inf }
 0x479   :  { %2499 = vmax.xlane.f32.xlu0 %v2498_v26  ;;  %v1984_v26 = vmul.f32 0.0078125, %v1946_v54  ;;  %v1879_v54 = vrot.slane %v1851_v34, 4 }
 0x47b   :  { %v1992_v25 = vsel %vm420_vm13, %v1984_v26, 0.0  ;;  %v1971_v26 = vrot.slane %v1933_v0, 4  ;;  %v1880_v53 = vadd.f32 %v1879_v54, %v1851_v34 }
 0x47c   :  { %v2000_v47 = vadd.f32 %v1992_v25, %v1912_v8 }
 0x47d   :  { %v1881_v49 = vrot.slane %v1880_v53, 2 }
 0x47e   :  { %v4794_v36 = vsub.f32 %v4630_v28, %v2000_v47  ;;  %v1853_v28 = vsel %vm336_vm12, %v1843_v9, 0.0  ;;  %v1957_v9 = vrot.slane %v1956_v35, 1 }
 0x47f   :  { %v4759_v46 = vpop.f32.mrf.mxu3  ;;  %v1891_v29 = vrot.slane %v1853_v28, 4 }
 0x480   :  { %v2501_v57 = vsel %vm962_vm9, %v4759_v46, -inf  ;;  %v2016_v55 = vmul.f32 %v4794_v36, %v4794_v36 }
 0x481   :  { %2502 = vmax.xlane.f32.xlu1 %v2501_v57  ;;  %v1872_v57 = vadd.f32 %v1871_v48, %v1870_v24  ;;  %v1875_v48 = vrot.slane %v1874_v42, 2  ;;  %v1892_v8 = vadd.f32 %v1891_v29, %v1853_v28  ;;  %v1958_v28 = vadd.f32 %v1957_v9, %v1956_v35 }
 0x483   :  { %v1905_v27 = vmul.f32 0.0078125, %v1872_v57  ;;  %v1996_v57 = vsel %vm420_vm13, %v1988_v6, 0.0  ;;  %v1876_v25 = vadd.f32 %v1875_v48, %v1874_v42  ;;  %v1893_v4 = vrot.slane %v1892_v8, 2 }
 0x485   :  { %v1913_v20 = vsel %vm336_vm12, %v1905_v27, 0.0  ;;  %v1877_v7 = vrot.slane %v1876_v25, 1 }
 0x486   :  { %v2001_v24 = vadd.f32 %v1993_v45, %v1913_v20  ;;  %v1898_v20 = vadd.f32 %v1897_v50, %v1854_v3  ;;  %v1882_v45 = vadd.f32 %v1881_v49, %v1880_v53 }
 0x487   :  { %v1878_v19 = vadd.f32 %v1877_v7, %v1876_v25 }
 0x488   :  { %v4812_v17 = vsub.f32 %v4665_v21, %v2001_v24  ;;  %v1972_v21 = vadd.f32 %v1971_v26, %v1933_v0  ;;  %v1899_v24 = vrot.slane %v1898_v20, 2 }
 0x489   :  { %2024 = vadd.xlane.f32.xlu1 %v2023_v37  ;;  %v1888_v37 = vadd.f32 %v1887_v60, %v1886_v59  ;;  %v1959_v59 = vrot.slane %v1931_v63, 4  ;;  %v2026_v60 = vsel %vm98_vm0, %v2016_v55, 0.0  ;;  %v1906_v29 = vmul.f32 0.0078125, %v1878_v19 }
 0x48a   :  { %v2017_v47 = vmul.f32 %v4812_v17, %v4812_v17 }
 0x48b   :  { %v1889_v14 = vrot.slane %v1888_v37, 1 }
 0x48d   :  { %v1890_v22 = vadd.f32 %v1889_v14, %v1888_v37  ;;  %v1960_v37 = vadd.f32 %v1959_v59, %v1931_v63  ;;  %v1977_v14 = vrot.slane %v1934_v58, 4  ;;  %v1894_v63 = vadd.f32 %v1893_v4, %v1892_v8 }
 0x48f   :  { %v1908_v41 = vmul.f32 0.0078125, %v1890_v22  ;;  %v1961_v44 = vrot.slane %v1960_v37, 2  ;;  %v2029_v22 = vsel %vm98_vm0, %v2017_v47, 0.0  ;;  %v1978_v34 = vadd.f32 %v1977_v14, %v1934_v58 }
 0x490   :  { %v1895_v54 = vrot.slane %v1894_v63, 1  ;;  %v1914_v58 = vsel %vm336_vm12, %v1906_v29, 0.0 }
 0x491   :  { %v1916_v38 = vsel %vm336_vm12, %v1908_v41, 0.0  ;;  %v1962_v42 = vadd.f32 %v1961_v44, %v1960_v37  ;;  %v1883_v41 = vrot.slane %v1882_v45, 1  ;;  %v1979_v6 = vrot.slane %v1978_v34, 2 }
 0x492   :  { %v2004_v27 = vadd.f32 %v1996_v57, %v1916_v38  ;;  %v1900_v38 = vadd.f32 %v1899_v24, %v1898_v20  ;;  %v1896_v3 = vadd.f32 %v1895_v54, %v1894_v63 }
 0x493   :  { %v1963_v59 = vrot.slane %v1962_v42, 1  ;;  %v1884_v53 = vadd.f32 %v1883_v41, %v1882_v45  ;;  %v1980_v37 = vadd.f32 %v1979_v6, %v1978_v34 }
 0x494   :  { %v4826_v13 = vsub.f32 %v4695_v12, %v2004_v27  ;;  %v1986_v12 = vmul.f32 0.0078125, %v1958_v28  ;;  %v1909_v27 = vmul.f32 0.0078125, %v1896_v3 }
 0x495   :  { %v1964_v25 = vadd.f32 %v1963_v59, %v1962_v42  ;;  %v1981_v47 = vrot.slane %v1980_v37, 1  ;;  %v1907_v49 = vmul.f32 0.0078125, %v1884_v53 }
 0x496   :  { %v2020_v55 = vmul.f32 %v4826_v13, %v4826_v13  ;;  %v1917_v45 = vsel %vm336_vm12, %v1909_v27, 0.0 }
 0x497   :  { %v1987_v14 = vmul.f32 0.0078125, %v1964_v25  ;;  %v1915_v42 = vsel %vm336_vm12, %v1907_v49, 0.0 }
 0x499   :  { %v1995_v19 = vsel %vm420_vm13, %v1987_v14, 0.0 }
 0x4ba   :  { %v4789_v32 = vpop.f32.mrf.mxu3 }
 0x4bb   :  { %v2504_v16 = vsel %vm962_vm9, %v4789_v32, -inf }
 0x4bc   :  { %2505 = vmax.xlane.f32.xlu2 %v2504_v16  ;;  %v1973_v16 = vrot.slane %v1972_v21, 2 }
 0x4be   :  { %v1974_v0 = vadd.f32 %v1973_v16, %v1972_v21  ;;  %v1901_v21 = vrot.slane %v1900_v38, 1  ;;  %v1982_v16 = vadd.f32 %v1981_v47, %v1980_v37 }
 0x4c0   :  { %v1975_v48 = vrot.slane %v1974_v0, 1  ;;  %v1902_v44 = vadd.f32 %v1901_v21, %v1900_v38  ;;  %v1990_v24 = vmul.f32 0.0078125, %v1982_v16 }
 0x4c2   :  { %v1976_v35 = vadd.f32 %v1975_v48, %v1974_v0  ;;  %v2003_v0 = vadd.f32 %v1995_v19, %v1915_v42 }
 0x4c4   :  { %2027 = vadd.xlane.f32.xlu2 %v2026_v60  ;;  %v2038_v60 = vsel %vm98_vm0, %v2020_v55, 0.0  ;;  %v1989_v4 = vmul.f32 0.0078125, %v1976_v35  ;;  %v1910_v55 = vmul.f32 0.0078125, %v1902_v44  ;;  %v4871_v48 = vsub.f32 %v4661_v5, %v2003_v0 }
 0x4c6   :  { %v4830_v23 = vpop.f32.mrf.mxu3  ;;  %v1997_v34 = vsel %vm420_vm13, %v1989_v4, 0.0  ;;  %v2019_v38 = vmul.f32 %v4871_v48, %v4871_v48 }
 0x4c7   :  { %v2507_v57 = vsel %vm962_vm9, %v4830_v23, -inf  ;;  %v2005_v28 = vadd.f32 %v1997_v34, %v1917_v45 }
 0x4c8   :  { %2508 = vmax.xlane.f32.xlu0 %v2507_v57  ;;  %v2035_v37 = vsel %vm98_vm0, %v2019_v38, 0.0 }
 0x4cc   :  { %2030 = vadd.xlane.f32.xlu2 %v2029_v22 }
 0x4ce   :  { %v4840_v7 = vpop.f32.mrf.mxu3 }
 0x4cf   :  { %v2510_v22 = vsel %vm962_vm9, %v4840_v7, -inf }
 0x4d0   :  { %2511 = vmax.xlane.f32.xlu0 %v2510_v22 }
 0x4d3   :  { %v2494_v31 = vpop.xlane.xlu1 %2493 }
 0x4d4   :  { %v2516_v26 = vsub.f32 %v4742_v11, %v2494_v31  ;;  %2039 = vadd.xlane.f32.xlu2 %v2038_v60  ;;  %v1994_v11 = vsel %vm420_vm13, %v1986_v12, 0.0  ;;  %v4868_v12 = vsub.f32 %v4719_v2, %v2005_v28  ;;  %v1918_v31 = vsel %vm336_vm12, %v1910_v55, 0.0 }
 0x4d5   :  { %v2002_v50 = vadd.f32 %v1994_v11, %v1914_v58 }
 0x4d6   :  { %v2524_v8 = vmul.f32 1.442695, %v2516_v26  ;;  %v4862_v54 = vpop.f32.mrf.mxu3  ;;  %v2021_v60 = vmul.f32 %v4868_v12, %v4868_v12 }
 0x4d7   :  { %v4847_v20 = vsub.f32 %v4698_v15, %v2002_v50  ;;  %v2513_v59 = vsel %vm962_vm9, %v4862_v54, -inf }
 0x4d8   :  { %3334 = vpow2.f32 %v2524_v8  ;;  %2514 = vmax.xlane.f32.xlu1 %v2513_v59  ;;  %v2041_v53 = vsel %vm98_vm0, %v2021_v60, 0.0 }
 0x4d9   :  { %v2018_v15 = vmul.f32 %v4847_v20, %v4847_v20 }
 0x4db   :  { %v2032_v29 = vsel %vm98_vm0, %v2018_v15, 0.0 }
 0x4dc   :  { %2033 = vadd.xlane.f32.xlu0 %v2032_v29 }
 0x4de   :  { %v4842_v9 = vpop.eup %3334 }
 0x4df   :  { %v2540_v63 = vsel %vm962_vm9, %v4842_v9, 0.0 }
 0x4e0   :  { %2541 = vadd.xlane.f32.xlu2 %v2540_v63  ;;  %2036 = vadd.xlane.f32.xlu1 %v2035_v37 }
 0x4e4   :  { %v2497_v41 = vpop.xlane.xlu2 %2496  ;;  %2042 = vadd.xlane.f32.xlu0 %v2041_v53 }
 0x4e5   :  { %v2517_v6 = vsub.f32 %v4747_v1, %v2497_v41  ;;  %v1998_v1 = vsel %vm420_vm13, %v1990_v24, 0.0 }
 0x4e6   :  { %v2006_v2 = vadd.f32 %v1998_v1, %v1918_v31 }
 0x4e7   :  { %v2526_v26 = vmul.f32 1.442695, %v2517_v6 }
 0x4e8   :  { %v4885_v3 = vsub.f32 %v4690_v33, %v2006_v2 }
 0x4e9   :  { %3336 = vpow2.f32 %v2526_v26 }
 0x4ea   :  { %v2022_v25 = vmul.f32 %v4885_v3, %v4885_v3 }
 0x4ec   :  { %v2500_v57 = vpop.xlane.xlu0 %2499  ;;  %v2044_v21 = vsel %vm98_vm0, %v2022_v25, 0.0 }
 0x4ed   :  { %v2518_v5 = vsub.f32 %v4751_v10, %v2500_v57  ;;  %2045 = vadd.xlane.f32.xlu1 %v2044_v21 }
 0x4ef   :  { %v2528_v8 = vmul.f32 1.442695, %v2518_v5  ;;  %v4889_v35 = vpop.eup %3336  ;;  %v4914_v5 = vld [vmem:[%s5342_s1 + $0xd0] sm:$0xff] }
 0x4f0   :  { %v2543_v10 = vsel %vm962_vm9, %v4889_v35, 0.0 }
 0x4f1   :  { %3338 = vpow2.f32 %v2528_v8  ;;  %2544 = vadd.xlane.f32.xlu0 %v2543_v10  ;;  %v4920_v8 = vld [vmem:[%s5342_s1 + $0xd8] sm:$0xff] }
 0x4f4   :  { %v2503_v58 = vpop.xlane.xlu1 %2502 }
 0x4f5   :  { %v2519_v11 = vsub.f32 %v4759_v46, %v2503_v58 }
 0x4f7   :  { %v2530_v47 = vmul.f32 1.442695, %v2519_v11  ;;  %v4895_v33 = vpop.eup %3338 }
 0x4f8   :  { %v2546_v4 = vsel %vm962_vm9, %v4895_v33, 0.0 }
 0x4f9   :  { %3340 = vpow2.f32 %v2530_v47  ;;  %2547 = vadd.xlane.f32.xlu1 %v2546_v4 }
 0x4fc   :  { %v2025_v27 = vpop.xlane.xlu1 %2024 }
 0x4fd   :  { %v2047_v50 = vsel %vm336_vm12, %v2025_v27, 0.0  ;;  %v2127_v49 = vsel %vm420_vm13, %v2025_v27, 0.0 }
 0x4fe   :  { %v2055_v14 = vrot.slane %v2047_v50, 4  ;;  %v2135_v46 = vrot.slane %v2127_v49, 4 }
 0x4ff   :  { %v4903_v44 = vpop.eup %3340 }
 0x500   :  { %v2056_v16 = vadd.f32 %v2055_v14, %v2047_v50  ;;  %v2136_v22 = vadd.f32 %v2135_v46, %v2127_v49  ;;  %v2549_v45 = vsel %vm962_vm9, %v4903_v44, 0.0 }
 0x501   :  { %2550 = vadd.xlane.f32.xlu2 %v2549_v45 }
 0x502   :  { %v2057_v34 = vrot.slane %v2056_v16, 2  ;;  %v2137_v63 = vrot.slane %v2136_v22, 2 }
 0x504   :  { %v2058_v42 = vadd.f32 %v2057_v34, %v2056_v16  ;;  %v2138_v19 = vadd.f32 %v2137_v63, %v2136_v22 }
 0x506   :  { %v2059_v15 = vrot.slane %v2058_v42, 1  ;;  %v2139_v28 = vrot.slane %v2138_v19, 1 }
 0x508   :  { %v2060_v0 = vadd.f32 %v2059_v15, %v2058_v42  ;;  %v2140_v55 = vadd.f32 %v2139_v28, %v2138_v19 }
 0x50a   :  { %v2103_v24 = vmul.f32 0.0078125, %v2060_v0  ;;  %v2183_v41 = vmul.f32 0.0078125, %v2140_v55 }
 0x50c   :  { %v2111_v6 = vsel %vm336_vm12, %v2103_v24, 0.0  ;;  %v2191_v59 = vsel %vm420_vm13, %v2183_v41, 0.0 }
 0x50d   :  { %v2199_v29 = vadd.f32 %v2191_v59, %v2111_v6 }
 0x50f   :  { %v2207_v31 = vadd.f32 1e-05, %v2199_v29 }
 0x511   :  { %3342 = vrsqrt.f32 %v2207_v31  ;;  %vm2221_vm15 = vweird.f32 %v2207_v31 }
 0x517   :  { %v3343_v1 = vpop.eup %3342 }
 0x518   :  { %v2216_v26 = vmul.f32 %v3343_v1, %v2207_v31  ;;  %vm2222_vm14 = vweird.f32 %v3343_v1 }
 0x519   :  { %vm2223_vm1 = vmor %vm2221_vm15, %vm2222_vm14 }
 0x51a   :  { %v2217_v60 = vmul.f32 %v3343_v1, %v2216_v26 }
 0x51c   :  { %v2218_v38 = vmul.f32 0.5, %v2217_v60 }
 0x51e   :  { %v2219_v2 = vsub.f32 1.5, %v2218_v38 }
 0x520   :  { %v2220_v57 = vmul.f32 %v3343_v1, %v2219_v2 }
 0x522   :  { %v2224_v53 = vsel %vm2223_vm1, %v3343_v1, %v2220_v57 }
 0x523   :  { %v2295_v37 = vmul.f32 %v2224_v53, %v4764_v43 }
 0x525   :  { %v2303_v25 = vmul.f32 %v2295_v37, %v4914_v5 }
 0x527   :  { %v2311_v58 = vadd.f32 %v2303_v25, %v4920_v8 }
 0x529   :  { %2622 = vmatpush.msrb.mxu1 %v2311_v58 }
 0x52f   :  { %v2506_v11 = vpop.xlane.xlu2 %2505 }
 0x530   :  { %v2520_v10 = vsub.f32 %v4789_v32, %v2506_v11 }
 0x532   :  { %v2532_v21 = vmul.f32 1.442695, %v2520_v10 }
 0x534   :  { %3344 = vpow2.f32 %v2532_v21 }
 0x537   :  { %v2028_v47 = vpop.xlane.xlu2 %2027 }
 0x538   :  { %v2048_v27 = vsel %vm336_vm12, %v2028_v47, 0.0  ;;  %v2128_v43 = vsel %vm420_vm13, %v2028_v47, 0.0 }
 0x539   :  { %v2061_v50 = vrot.slane %v2048_v27, 4  ;;  %v2141_v49 = vrot.slane %v2128_v43, 4 }
 0x53a   :  { %v4929_v14 = vpop.eup %3344 }
 0x53b   :  { %v2062_v46 = vadd.f32 %v2061_v50, %v2048_v27  ;;  %v2142_v4 = vadd.f32 %v2141_v49, %v2128_v43  ;;  %v2552_v16 = vsel %vm962_vm9, %v4929_v14, 0.0  ;;  %v2509_v25 = vpop.xlane.xlu0 %2508 }
 0x53c   :  { %2553 = vadd.xlane.f32.xlu0 %v2552_v16  ;;  %v2521_v10 = vsub.f32 %v4830_v23, %v2509_v25  ;;  %v4952_v23 = vld [vmem:[%s5342_s1 + $0xe8] ss:$0 sm:$0xff] }
 0x53d   :  { %v2063_v32 = vrot.slane %v2062_v46, 2  ;;  %v2143_v22 = vrot.slane %v2142_v4, 2 }
 0x53e   :  { %v2534_v49 = vmul.f32 1.442695, %v2521_v10 }
 0x53f   :  { %v2064_v45 = vadd.f32 %v2063_v32, %v2062_v46  ;;  %v2144_v34 = vadd.f32 %v2143_v22, %v2142_v4  ;;  %v2031_v63 = vpop.xlane.xlu2 %2030 }
 0x540   :  { %v2049_v42 = vsel %vm336_vm12, %v2031_v63, 0.0  ;;  %v2129_v19 = vsel %vm420_vm13, %v2031_v63, 0.0 }
 0x541   :  { %v2065_v15 = vrot.slane %v2064_v45, 1  ;;  %v2145_v28 = vrot.slane %v2144_v34, 1  ;;  %v2067_v0 = vrot.slane %v2049_v42, 4  ;;  %v2147_v55 = vrot.slane %v2129_v19, 4 }
 0x543   :  { %v2066_v24 = vadd.f32 %v2065_v15, %v2064_v45  ;;  %v2146_v41 = vadd.f32 %v2145_v28, %v2144_v34  ;;  %v2068_v6 = vadd.f32 %v2067_v0, %v2049_v42  ;;  %v2148_v59 = vadd.f32 %v2147_v55, %v2129_v19  ;;  %v2512_v55 = vpop.xlane.xlu0 %2511 }
 0x545   :  { %v2104_v29 = vmul.f32 0.0078125, %v2066_v24  ;;  %v2184_v31 = vmul.f32 0.0078125, %v2146_v41  ;;  %v2069_v1 = vrot.slane %v2068_v6, 2  ;;  %v2149_v26 = vrot.slane %v2148_v59, 2 }
 0x547   :  { %v2112_v60 = vsel %vm336_vm12, %v2104_v29, 0.0  ;;  %v2192_v38 = vsel %vm420_vm13, %v2184_v31, 0.0  ;;  %v2070_v2 = vadd.f32 %v2069_v1, %v2068_v6  ;;  %v2150_v57 = vadd.f32 %v2149_v26, %v2148_v59  ;;  %v2040_v53 = vpop.xlane.xlu2 %2039 }
 0x548   :  { %v2200_v37 = vadd.f32 %v2192_v38, %v2112_v60  ;;  %v2052_v58 = vsel %vm336_vm12, %v2040_v53, 0.0  ;;  %v2132_v11 = vsel %vm420_vm13, %v2040_v53, 0.0  ;;  %v2522_v59 = vsub.f32 %v4840_v7, %v2512_v55 }
 0x549   :  { %v2071_v21 = vrot.slane %v2070_v2, 1  ;;  %v2151_v47 = vrot.slane %v2150_v57, 1  ;;  %v2085_v27 = vrot.slane %v2052_v58, 4  ;;  %v2165_v50 = vrot.slane %v2132_v11, 4 }
 0x54a   :  { %v4946_v43 = vadd.f32 1e-05, %v2200_v37  ;;  %v1260_v31 = vmul.f32 %v4952_v23, %v4485_v51 }
 0x54b   :  { %v2072_v46 = vadd.f32 %v2071_v21, %v2070_v2  ;;  %v2152_v4 = vadd.f32 %v2151_v47, %v2150_v57  ;;  %v2086_v16 = vadd.f32 %v2085_v27, %v2052_v58  ;;  %v2166_v32 = vadd.f32 %v2165_v50, %v2132_v11 }
 0x54c   :  { %3346 = vrsqrt.f32 %v4946_v43  ;;  %v1262_v2 = vmul.f32 %v4952_v23, %v4493_v40  ;;  %v2536_v57 = vmul.f32 1.442695, %v2522_v59  ;;  %v1268_v58 = vsel %vm98_vm0, %v1260_v31, 0.0 }
 0x54d   :  { %3348 = vpow2.f32 %v2534_v49  ;;  %v2105_v22 = vmul.f32 0.0078125, %v2072_v46  ;;  %v2185_v45 = vmul.f32 0.0078125, %v2152_v4  ;;  %v2087_v34 = vrot.slane %v2086_v16, 2 }
 0x54e   :  { %v2167_v63 = vrot.slane %v2166_v32, 2  ;;  %v4979_v21 = vsel %vm98_vm0, %v1262_v2, 0.0  ;;  %v1263_v27 = vmul.f32 %v4952_v23, %v4497_v52  ;;  %v1261_v50 = vmul.f32 %v4952_v23, %v4489_v61 }
 0x54f   :  { %v2113_v42 = vsel %vm336_vm12, %v2105_v22, 0.0  ;;  %v2193_v19 = vsel %vm420_vm13, %v2185_v45, 0.0  ;;  %v2088_v15 = vadd.f32 %v2087_v34, %v2086_v16  ;;  %v1264_v49 = vmul.f32 %v4952_v23, %v4513_v39  ;;  %v2515_v16 = vpop.xlane.xlu1 %2514  ;;  %v2034_v22 = vpop.xlane.xlu0 %2033 }
 0x550   :  { %v2201_v28 = vadd.f32 %v2193_v19, %v2113_v42  ;;  %v2168_v0 = vadd.f32 %v2167_v63, %v2166_v32  ;;  %v1266_v46 = vmul.f32 %v4952_v23, %v4627_v30  ;;  %v1265_v34 = vmul.f32 %v4952_v23, %v4564_v56 }
 0x551   :  { %v2089_v24 = vrot.slane %v2088_v15, 1  ;;  %v2523_v42 = vsub.f32 %v4862_v54, %v2515_v16  ;;  %vm2231_vm3 = vweird.f32 %v4946_v43 }
 0x552   :  { %v4958_v41 = vpop.eup %3346  ;;  %v4960_v6 = vadd.f32 1e-05, %v2201_v28  ;;  %v2169_v29 = vrot.slane %v2168_v0, 1  ;;  %v2130_v28 = vsel %vm420_vm13, %v2034_v22, 0.0 }
 0x553   :  { %v2542_v1 = vpop.xlane.xlu2 %2541  ;;  %v4965_v26 = vpop.eup %3348  ;;  %v2226_v60 = vmul.f32 %v4958_v41, %v4946_v43  ;;  %v2090_v38 = vadd.f32 %v2089_v24, %v2088_v15  ;;  %vm2232_vm2 = vweird.f32 %v4958_v41  ;;  %v2050_v15 = vsel %vm336_vm12, %v2034_v22, 0.0 }
 0x554   :  { %3350 = vrcp.f32 %v2542_v1  ;;  %v2555_v7 = vsel %vm962_vm9, %v4965_v26, 0.0  ;;  %v2170_v37 = vadd.f32 %v2169_v29, %v2168_v0  ;;  %v2073_v55 = vrot.slane %v2050_v15, 4  ;;  %vm2233_vm4 = vmor %vm2231_vm3, %vm2232_vm2 }
 0x555   :  { %3352 = vrsqrt.f32 %v4960_v6  ;;  %2556 = vadd.xlane.f32.xlu1 %v2555_v7  ;;  %v2108_v53 = vmul.f32 0.0078125, %v2090_v38  ;;  %v2227_v25 = vmul.f32 %v4958_v41, %v2226_v60  ;;  %v2153_v24 = vrot.slane %v2130_v28, 4 }
 0x556   :  { %3354 = vpow2.f32 %v2536_v57  ;;  %v2188_v10 = vmul.f32 0.0078125, %v2170_v37  ;;  %v2538_v31 = vmul.f32 1.442695, %v2523_v42  ;;  %v2074_v2 = vadd.f32 %v2073_v55, %v2050_v15 }
 0x557   :  { %v2116_v11 = vsel %vm336_vm12, %v2108_v53, 0.0  ;;  %v2228_v47 = vmul.f32 0.5, %v2227_v25  ;;  %v2154_v57 = vadd.f32 %v2153_v24, %v2130_v28  ;;  %v1271_v53 = vsel %vm98_vm0, %v1261_v50, 0.0  ;;  %v2043_v50 = vpop.xlane.xlu0 %2042 }
 0x558   :  { %v2196_v32 = vsel %vm420_vm13, %v2188_v10, 0.0  ;;  %3356 = vpow2.f32 %v2538_v31  ;;  %v2075_v43 = vrot.slane %v2074_v2, 2  ;;  %v5026_v42 = vsel %vm98_vm0, %v1265_v34, 0.0 }
 0x559   :  { %v2229_v45 = vsub.f32 1.5, %v2228_v47  ;;  %v2204_v19 = vadd.f32 %v2196_v32, %v2116_v11  ;;  %v2155_v25 = vrot.slane %v2154_v57, 2  ;;  %v1277_v11 = vsel %vm98_vm0, %v1263_v27, 0.0 }
 0x55a   :  { %v3351_v4 = vpop.eup %3350  ;;  %v5021_v47 = vsel %vm98_vm0, %v1264_v49, 0.0  ;;  %v2076_v32 = vadd.f32 %v2075_v43, %v2074_v2  ;;  %vm2241_vm6 = vweird.f32 %v4960_v6 }
 0x55b   :  { %v4994_v63 = vpop.eup %3352  ;;  %v2572_v59 = vmul.f32 %v3351_v4, %v2542_v1  ;;  %v5005_v60 = vadd.f32 1e-05, %v2204_v19  ;;  %v2230_v54 = vmul.f32 %v4958_v41, %v2229_v45  ;;  %v2156_v22 = vadd.f32 %v2155_v25, %v2154_v57  ;;  %v2037_v45 = vpop.xlane.xlu1 %2036 }
 0x55c   :  { %v2236_v0 = vmul.f32 %v4994_v63, %v4960_v6  ;;  %v5003_v29 = vpop.eup %3354  ;;  %v2051_v27 = vsel %vm336_vm12, %v2037_v45, 0.0  ;;  %v2131_v49 = vsel %vm420_vm13, %v2037_v45, 0.0  ;;  %vm2242_vm5 = vweird.f32 %v4994_v63 }
 0x55d   :  { %1269 = vadd.xlane.f32.xlu1 %v1268_v58  ;;  %v2558_v7 = vsel %vm962_vm9, %v5003_v29, 0.0  ;;  %v2580_v1 = vsub.f32 2.0, %v2572_v59  ;;  %v2234_v37 = vsel %vm2233_vm4, %v4958_v41, %v2230_v54  ;;  %3358 = vrsqrt.f32 %v5005_v60  ;;  %vm5070_vm7 = vmor %vm2241_vm6, %vm2242_vm5 }
 0x55e   :  { %v2237_v38 = vmul.f32 %v4994_v63, %v2236_v0  ;;  %2559 = vadd.xlane.f32.xlu2 %v2558_v7  ;;  %v2296_v16 = vmul.f32 %v2234_v37, %v4794_v36  ;;  %v1286_v41 = vsel %vm98_vm0, %v1266_v46, 0.0  ;;  %v2053_v36 = vsel %vm336_vm12, %v2043_v50, 0.0  ;;  %v5035_v55 = vpop.eup %3356 }
 0x55f   :  { %v2588_v10 = vmul.f32 %v3351_v4, %v2580_v1  ;;  %v2077_v4 = vrot.slane %v2076_v32, 1  ;;  %v2157_v15 = vrot.slane %v2156_v22, 1  ;;  %v2079_v28 = vrot.slane %v2051_v27, 4 }
 0x560   :  { %v5018_v58 = vmul.f32 0.5, %v2237_v38  ;;  %v2159_v0 = vrot.slane %v2131_v49, 4  ;;  %v2091_v34 = vrot.slane %v2053_v36, 4  ;;  %v2304_v24 = vmul.f32 %v2296_v16, %v4914_v5 }
 0x561   :  { %v2596_v19 = vmul.f32 %v4842_v9, %v2588_v10  ;;  %v2133_v9 = vsel %vm420_vm13, %v2043_v50, 0.0  ;;  %v2078_v31 = vadd.f32 %v2077_v4, %v2076_v32  ;;  %v2158_v54 = vadd.f32 %v2157_v15, %v2156_v22 }
 0x562   :  { %v2239_v46 = vsub.f32 1.5, %v5018_v58  ;;  %v2080_v38 = vadd.f32 %v2079_v28, %v2051_v27  ;;  %v2160_v2 = vadd.f32 %v2159_v0, %v2131_v49  ;;  %v2092_v7 = vadd.f32 %v2091_v34, %v2053_v36 }
 0x563   :  { %3228 = vmatmul.msk.f32.vlgmr.msrb.gmra.mxu1 %vm962_vm9, %v2596_v19  ;;  %v5043_v59 = vpop.eup %3358  ;;  %v2171_v1 = vrot.slane %v2133_v9, 4  ;;  %v2561_v37 = vsel %vm962_vm9, %v5035_v55, 0.0  ;;  %v2106_v43 = vmul.f32 0.0078125, %v2078_v31  ;;  %v2186_v25 = vmul.f32 0.0078125, %v2158_v54 }
 0x564   :  { %v2266_v57 = vmul.f32 %v5043_v59, %v5005_v60  ;;  %v2081_v58 = vrot.slane %v2080_v38, 2  ;;  %v2161_v10 = vrot.slane %v2160_v2, 2  ;;  %2562 = vadd.xlane.f32.xlu0 %v2561_v37  ;;  %v2093_v32 = vrot.slane %v2092_v7, 2  ;;  %v2545_v37 = vpop.xlane.xlu0 %2544 }
 0x565   :  { %1278 = vadd.xlane.f32.xlu1 %v1277_v11  ;;  %v2172_v11 = vadd.f32 %v2171_v1, %v2133_v9  ;;  %v2312_v22 = vadd.f32 %v2304_v24, %v4920_v8  ;;  %v2114_v45 = vsel %vm336_vm12, %v2106_v43, 0.0  ;;  %v2194_v50 = vsel %vm420_vm13, %v2186_v25, 0.0 }
 0x566   :  { %1272 = vadd.xlane.f32.xlu2 %v1271_v53  ;;  %v2267_v16 = vmul.f32 %v5043_v59, %v2266_v57  ;;  %v2082_v19 = vadd.f32 %v2081_v58, %v2080_v38  ;;  %v2162_v27 = vadd.f32 %v2161_v10, %v2160_v2  ;;  %v2046_v53 = vpop.xlane.xlu1 %2045  ;;  %v2202_v36 = vadd.f32 %v2194_v50, %v2114_v45 }
 0x567   :  { %v2094_v4 = vadd.f32 %v2093_v32, %v2092_v7  ;;  %v2173_v15 = vrot.slane %v2172_v11, 2  ;;  %2645 = vmatpush.msrb.mxu0 %v2312_v22  ;;  %v2054_v34 = vsel %vm336_vm12, %v2046_v53, 0.0  ;;  %v2134_v9 = vsel %vm420_vm13, %v2046_v53, 0.0 }
 0x568   :  { %v2268_v49 = vmul.f32 0.5, %v2267_v16  ;;  %v2083_v28 = vrot.slane %v2082_v19, 1  ;;  %v2163_v0 = vrot.slane %v2162_v27, 1  ;;  %v5060_v24 = vadd.f32 1e-05, %v2202_v36 }
 0x569   :  { %v2095_v31 = vrot.slane %v2094_v4, 1  ;;  %v2174_v54 = vadd.f32 %v2173_v15, %v2172_v11  ;;  %v2240_v38 = vmul.f32 %v4994_v63, %v2239_v46  ;;  %v2097_v1 = vrot.slane %v2054_v34, 4 }
 0x56a   :  { %v2084_v2 = vadd.f32 %v2083_v28, %v2082_v19  ;;  %v2164_v57 = vadd.f32 %v2163_v0, %v2162_v27  ;;  %v2177_v7 = vrot.slane %v2134_v9, 4  ;;  %v2269_v43 = vsub.f32 1.5, %v2268_v49 }
 0x56b   :  { %3360 = vrsqrt.f32 %v5060_v24  ;;  %v2096_v25 = vadd.f32 %v2095_v31, %v2094_v4  ;;  %v2175_v58 = vrot.slane %v2174_v54, 1  ;;  %v2098_v32 = vadd.f32 %v2097_v1, %v2054_v34 }
 0x56c   :  { %v2107_v10 = vmul.f32 0.0078125, %v2084_v2  ;;  %v2187_v16 = vmul.f32 0.0078125, %v2164_v57  ;;  %v2178_v22 = vadd.f32 %v2177_v7, %v2134_v9  ;;  %1281 = vadd.xlane.f32.xlu0 %v5021_v47  ;;  %3362 = vrcp.f32 %v2545_v37 }
 0x56d   :  { %1287 = vadd.xlane.f32.xlu1 %v1286_v41  ;;  %v2109_v41 = vmul.f32 0.0078125, %v2096_v25  ;;  %v2176_v11 = vadd.f32 %v2175_v58, %v2174_v54  ;;  %v2099_v50 = vrot.slane %v2098_v32, 2  ;;  %v2270_v28 = vmul.f32 %v5043_v59, %v2269_v43 }
 0x56e   :  { %1275 = vadd.xlane.f32.xlu2 %v4979_v21  ;;  %v2244_v21 = vsel %vm5070_vm7, %v4994_v63, %v2240_v38  ;;  %v2115_v45 = vsel %vm336_vm12, %v2107_v10, 0.0  ;;  %v2195_v47 = vsel %vm420_vm13, %v2187_v16, 0.0  ;;  %v2179_v19 = vrot.slane %v2178_v22, 2  ;;  %v2548_v6 = vpop.xlane.xlu1 %2547 }
 0x56f   :  { %v2203_v27 = vadd.f32 %v2195_v47, %v2115_v45  ;;  %v2117_v53 = vsel %vm336_vm12, %v2109_v41, 0.0  ;;  %v2189_v49 = vmul.f32 0.0078125, %v2176_v11  ;;  %3364 = vrcp.f32 %v2548_v6 }
 0x570   :  { %v2100_v36 = vadd.f32 %v2099_v50, %v2098_v32  ;;  %v2180_v4 = vadd.f32 %v2179_v19, %v2178_v22  ;;  %v2297_v63 = vmul.f32 %v2244_v21, %v4812_v17  ;;  %vm2272_vm8 = vweird.f32 %v5043_v59 }
 0x571   :  { %v3361_v0 = vpop.eup %3360  ;;  %v5085_v34 = vadd.f32 1e-05, %v2203_v27  ;;  %v2197_v9 = vsel %vm420_vm13, %v2189_v49, 0.0  ;;  %vm2271_vm10 = vweird.f32 %v5005_v60  ;;  %vm2251_vm15 = vweird.f32 %v5060_v24 }
 0x572   :  { %v2246_v31 = vmul.f32 %v3361_v0, %v5060_v24  ;;  %v2205_v54 = vadd.f32 %v2197_v9, %v2117_v53  ;;  %v2101_v38 = vrot.slane %v2100_v36, 1  ;;  %v2181_v2 = vrot.slane %v2180_v4, 1  ;;  %v3363_v57 = vpop.eup %3362  ;;  %vm5097_vm11 = vmor %vm2271_vm10, %vm2272_vm8 }
 0x573   :  { %v2305_v17 = vmul.f32 %v2297_v63, %v4914_v5  ;;  %v2573_v16 = vmul.f32 %v3363_v57, %v2545_v37  ;;  %v2274_v60 = vsel %vm5097_vm11, %v5043_v59, %v2270_v28  ;;  %vm2252_vm14 = vweird.f32 %v3361_v0 }
 0x574   :  { %v2551_v15 = vpop.xlane.xlu2 %2550  ;;  %v2247_v1 = vmul.f32 %v3361_v0, %v2246_v31  ;;  %v5095_v7 = vadd.f32 1e-05, %v2205_v54  ;;  %v2102_v43 = vadd.f32 %v2101_v38, %v2100_v36  ;;  %v2182_v25 = vadd.f32 %v2181_v2, %v2180_v4 }
 0x575   :  { %3366 = vrcp.f32 %v2551_v15  ;;  %v3365_v10 = vpop.eup %3364  ;;  %v2313_v32 = vadd.f32 %v2305_v17, %v4920_v8  ;;  %v2581_v11 = vsub.f32 2.0, %v2573_v16  ;;  %v2300_v50 = vmul.f32 %v2274_v60, %v4826_v13 }
 0x576   :  { %3368 = vrsqrt.f32 %v5085_v34  ;;  %1284 = vadd.xlane.f32.xlu2 %v5026_v42  ;;  %v2248_v42 = vmul.f32 0.5, %v2247_v1  ;;  %v2110_v22 = vmul.f32 0.0078125, %v2102_v43  ;;  %v2190_v41 = vmul.f32 0.0078125, %v2182_v25 }
 0x577   :  { %3370 = vrsqrt.f32 %v5095_v7  ;;  %v2574_v21 = vmul.f32 %v3365_v10, %v2548_v6  ;;  %2668 = vmatpush.msra.mxu1 %v2313_v32  ;;  %v2589_v27 = vmul.f32 %v3363_v57, %v2581_v11  ;;  %v2308_v18 = vmul.f32 %v2300_v50, %v4914_v5 }
 0x578   :  { %v2249_v45 = vsub.f32 1.5, %v2248_v42  ;;  %v2118_v37 = vsel %vm336_vm12, %v2110_v22, 0.0  ;;  %v2198_v59 = vsel %vm420_vm13, %v2190_v41, 0.0  ;;  %vm2253_vm12 = vmor %vm2251_vm15, %vm2252_vm14  ;;  %vm2261_vm1 = vweird.f32 %v5085_v34 }
 0x579   :  { %v2582_v53 = vsub.f32 2.0, %v2574_v21  ;;  %v2206_v6 = vadd.f32 %v2198_v59, %v2118_v37  ;;  %v2597_v4 = vmul.f32 %v4889_v35, %v2589_v27  ;;  %vm2281_vm4 = vweird.f32 %v5095_v7 }
 0x57a   :  { %v2250_v36 = vmul.f32 %v3361_v0, %v2249_v45  ;;  %vm1301_vm10 = vcmask 7168   ;;  %vm3133_vm11 = vcmask 1041409   ;;  %vm3135_vm14 = vcmask 1042434  }
 0x57b   :  { %v3367_v46 = vpop.eup %3366  ;;  %v2590_v28 = vmul.f32 %v3365_v10, %v2582_v53  ;;  %v2214_v9 = vadd.f32 1e-05, %v2206_v6  ;;  %3229 = vmatmul.msk.f32.vlgmr.msrb.gmra.mxu0 %vm962_vm9, %v2597_v4  ;;  %vm3137_vm15 = vcmask 1043459  }
 0x57c   :  { %v2575_v47 = vmul.f32 %v3367_v46, %v2551_v15  ;;  %v3369_v19 = vpop.eup %3368  ;;  %v2254_v31 = vsel %vm2253_vm12, %v3361_v0, %v2250_v36  ;;  %v2316_v0 = vadd.f32 %v2308_v18, %v4920_v8  ;;  %vm3139_vm12 = vcmask 1044484  }
 0x57d   :  { %v2256_v49 = vmul.f32 %v3369_v19, %v5085_v34  ;;  %v3371_v15 = vpop.eup %3370  ;;  %v2598_v24 = vmul.f32 %v4895_v33, %v2590_v28  ;;  %v2298_v38 = vmul.f32 %v2254_v31, %v4847_v20  ;;  %3372 = vrsqrt.f32 %v2214_v9 }
 0x57e   :  { %v2583_v63 = vsub.f32 2.0, %v2575_v47  ;;  %v2276_v54 = vmul.f32 %v3371_v15, %v5095_v7  ;;  %vm2262_vm13 = vweird.f32 %v3369_v19  ;;  %vm2282_vm3 = vweird.f32 %v3371_v15 }
 0x57f   :  { %v2257_v13 = vmul.f32 %v3369_v19, %v2256_v49  ;;  %3230 = vmatmul.msk.f32.vlgmr.msra.gmra.mxu1 %vm962_vm9, %v2598_v24  ;;  %v2306_v17 = vmul.f32 %v2298_v38, %v4914_v5  ;;  %vm2263_vm2 = vmor %vm2261_vm1, %vm2262_vm13  ;;  %vm2291_vm7 = vweird.f32 %v2214_v9  ;;  %vm3141_vm13 = vcmask 1045509  }
 0x580   :  { %v2277_v35 = vmul.f32 %v3371_v15, %v2276_v54  ;;  %v2591_v57 = vmul.f32 %v3367_v46, %v2583_v63  ;;  %vm2283_vm5 = vmor %vm2281_vm4, %vm2282_vm3  ;;  %vm3143_vm1 = vcmask 1046534  }
 0x581   :  { %v2258_v2 = vmul.f32 0.5, %v2257_v13  ;;  %v2314_v25 = vadd.f32 %v2306_v17, %v4920_v8 }
 0x582   :  { %v2278_v43 = vmul.f32 0.5, %v2277_v35  ;;  %v2599_v20 = vmul.f32 %v4903_v44, %v2591_v57 }
 0x583   :  { %v2259_v1 = vsub.f32 1.5, %v2258_v2  ;;  %2691 = vmatpush.msra.mxu0 %v2314_v25  ;;  %v3373_v10 = vpop.eup %3372 }
 0x584   :  { %v2279_v58 = vsub.f32 1.5, %v2278_v43  ;;  %v2286_v32 = vmul.f32 %v3373_v10, %v2214_v9  ;;  %3231 = vmatmul.msk.f32.vlgmr.msra.gmra.mxu0 %vm962_vm9, %v2599_v20  ;;  %vm2292_vm6 = vweird.f32 %v3373_v10 }
 0x585   :  { %v2260_v33 = vmul.f32 %v3369_v19, %v2259_v1  ;;  %2737 = vmatpush.msrb.mxu0 %v2316_v0  ;;  %vm2293_vm8 = vmor %vm2291_vm7, %vm2292_vm6 }
 0x586   :  { %v2280_v42 = vmul.f32 %v3371_v15, %v2279_v58  ;;  %v2287_v34 = vmul.f32 %v3373_v10, %v2286_v32  ;;  %v5168_v32 = vld [vmem:[%s5342_s1 + $0xf0] ss:$0 sm:$0xff] }
 0x587   :  { %v2264_v16 = vsel %vm2263_vm2, %v3369_v19, %v2260_v33  ;;  %vm3145_vm2 = vcmask 1047559  }
 0x588   :  { %v2299_v60 = vmul.f32 %v2264_v16, %v4871_v48  ;;  %v2284_v46 = vsel %vm2283_vm5, %v3371_v15, %v2280_v42  ;;  %v2288_v41 = vmul.f32 0.5, %v2287_v34 }
 0x589   :  { %v2301_v44 = vmul.f32 %v2284_v46, %v4868_v12 }
 0x58a   :  { %v2307_v22 = vmul.f32 %v2299_v60, %v4914_v5  ;;  %v2289_v45 = vsub.f32 1.5, %v2288_v41 }
 0x58b   :  { %v2309_v21 = vmul.f32 %v2301_v44, %v4914_v5 }
 0x58c   :  { %v2315_v11 = vadd.f32 %v2307_v22, %v4920_v8  ;;  %v2290_v48 = vmul.f32 %v3373_v10, %v2289_v45 }
 0x58d   :  { %v2317_v7 = vadd.f32 %v2309_v21, %v4920_v8 }
 0x58e   :  { %2714 = vmatpush.msrb.mxu1 %v2315_v11  ;;  %v2294_v37 = vsel %vm2293_vm8, %v3373_v10, %v2290_v48 }
 0x58f   :  { %v2302_v47 = vmul.f32 %v2294_v37, %v4885_v3 }
 0x590   :  { %2760 = vmatpush.msra.mxu1 %v2317_v7 }
 0x591   :  { %v2310_v50 = vmul.f32 %v2302_v47, %v4914_v5 }
 0x593   :  { %v2318_v12 = vadd.f32 %v2310_v50, %v4920_v8 }
 0x595   :  { %2783 = vmatpush.msra.mxu0 %v2318_v12 }
 0x5af   :  { %v2554_v19 = vpop.xlane.xlu0 %2553 }
 0x5b0   :  { %3374 = vrcp.f32 %v2554_v19 }
 0x5b6   :  { %v3375_v59 = vpop.eup %3374 }
 0x5b7   :  { %v2576_v27 = vmul.f32 %v3375_v59, %v2554_v19 }
 0x5b9   :  { %v2584_v53 = vsub.f32 2.0, %v2576_v27 }
 0x5bb   :  { %v2592_v49 = vmul.f32 %v3375_v59, %v2584_v53 }
 0x5bd   :  { %v2600_v6 = vmul.f32 %v4929_v14, %v2592_v49 }
 0x5bf   :  { %3232 = vmatmul.msk.f32.vlgmr.msrb.gmra.mxu1 %vm962_vm9, %v2600_v6 }
 0x5c8   :  { %v2557_v36 = vpop.xlane.xlu1 %2556 }
 0x5c9   :  { %3376 = vrcp.f32 %v2557_v36 }
 0x5cf   :  { %v3377_v4 = vpop.eup %3376 }
 0x5d0   :  { %v2577_v63 = vmul.f32 %v3377_v4, %v2557_v36  ;;  %v1270_v10 = vpop.xlane.xlu1 %1269 }
 0x5d1   :  { %v2560_v3 = vpop.xlane.xlu2 %2559  ;;  %v1293_v22 = vadd.f32 %v5168_v32, %v1270_v10 }
 0x5d2   :  { %v2585_v28 = vsub.f32 2.0, %v2577_v63  ;;  %3378 = vrcp.f32 %v2560_v3 }
 0x5d3   :  { %v1302_v11 = vsel %vm1301_vm10, %v1293_v22, -inf }
 0x5d4   :  { %v2593_v5 = vmul.f32 %v3377_v4, %v2585_v28  ;;  %v1303_v48 = vrot.slane %v1302_v11, 4 }
 0x5d6   :  { %v2601_v8 = vmul.f32 %v4965_v26, %v2593_v5  ;;  %v1304_v59 = vmax.f32 %v1302_v11, %v1303_v48 }
 0x5d7   :  { %v2563_v9 = vpop.xlane.xlu0 %2562 }
 0x5d8   :  { %v3379_v15 = vpop.eup %3378  ;;  %3233 = vmatmul.msk.f32.vlgmr.msrb.gmra.mxu0 %vm962_vm9, %v2601_v8  ;;  %3380 = vrcp.f32 %v2563_v9  ;;  %v1279_v42 = vpop.xlane.xlu1 %1278  ;;  %v1305_v63 = vrot.slane %v1304_v59, 2 }
 0x5d9   :  { %v2578_v13 = vmul.f32 %v3379_v15, %v2560_v3  ;;  %v1273_v16 = vpop.xlane.xlu2 %1272  ;;  %v1296_v46 = vadd.f32 %v5168_v32, %v1279_v42 }
 0x5da   :  { %v1294_v60 = vadd.f32 %v5168_v32, %v1273_v16 }
 0x5db   :  { %v2586_v31 = vsub.f32 2.0, %v2578_v13  ;;  %v1323_v21 = vsel %vm1301_vm10, %v1296_v46, -inf }
 0x5dc   :  { %v1309_v34 = vsel %vm1301_vm10, %v1294_v60, -inf  ;;  %v1324_v50 = vrot.slane %v1323_v21, 4 }
 0x5dd   :  { %v2594_v14 = vmul.f32 %v3379_v15, %v2586_v31  ;;  %v1310_v44 = vrot.slane %v1309_v34, 4  ;;  %v1306_v31 = vmax.f32 %v1304_v59, %v1305_v63 }
 0x5de   :  { %v3381_v54 = vpop.eup %3380  ;;  %v1325_v6 = vmax.f32 %v1323_v21, %v1324_v50 }
 0x5df   :  { %v2602_v18 = vmul.f32 %v5003_v29, %v2594_v14  ;;  %v2579_v38 = vmul.f32 %v3381_v54, %v2563_v9  ;;  %v1311_v45 = vmax.f32 %v1309_v34, %v1310_v44  ;;  %v1282_v7 = vpop.xlane.xlu0 %1281 }
 0x5e0   :  { %v5143_v24 = vpop.f32.mrf.mxu1  ;;  %v1288_v37 = vpop.xlane.xlu1 %1287  ;;  %v5180_v12 = vadd.f32 %v5168_v32, %v1282_v7  ;;  %v1326_v15 = vrot.slane %v1325_v6, 2 }
 0x5e1   :  { %3234 = vmatmul.msk.f32.vlgmr.msra.gmra.mxu1 %vm962_vm9, %v2602_v18  ;;  %v2788_v2 = vmul.f32 %v4952_v23, %v5143_v24  ;;  %v2587_v26 = vsub.f32 2.0, %v2579_v38  ;;  %v1276_v41 = vpop.xlane.xlu2 %1275  ;;  %v1312_v19 = vrot.slane %v1311_v45, 2  ;;  %v5183_v27 = vadd.f32 %v5168_v32, %v1288_v37 }
 0x5e2   :  { %v5177_v47 = vadd.f32 %v5168_v32, %v1276_v41  ;;  %v1330_v36 = vsel %vm1301_vm10, %v5180_v12, -inf  ;;  %v1327_v38 = vmax.f32 %v1325_v6, %v1326_v15 }
 0x5e3   :  { %v2796_v35 = vsel %vm98_vm0, %v2788_v2, 0.0  ;;  %v2595_v57 = vmul.f32 %v3381_v54, %v2587_v26  ;;  %v1313_v4 = vmax.f32 %v1311_v45, %v1312_v19  ;;  %v1344_v3 = vsel %vm1301_vm10, %v5183_v27, -inf }
 0x5e4   :  { %2797 = vadd.xlane.f32.xlu0 %v2796_v35  ;;  %v1316_v53 = vsel %vm1301_vm10, %v5177_v47, -inf  ;;  %v1331_v8 = vrot.slane %v1330_v36, 4  ;;  %v1345_v9 = vrot.slane %v1344_v3, 4 }
 0x5e5   :  { %v2603_v17 = vmul.f32 %v5035_v55, %v2595_v57  ;;  %v1317_v28 = vrot.slane %v1316_v53, 4  ;;  %v1314_v13 = vrot.slane %v1313_v4, 1  ;;  %v1307_v57 = vrot.slane %v1306_v31, 1 }
 0x5e6   :  { %v1332_v54 = vmax.f32 %v1330_v36, %v1331_v8  ;;  %v1346_v26 = vmax.f32 %v1344_v3, %v1345_v9 }
 0x5e7   :  { %3235 = vmatmul.msk.f32.vlgmr.msra.gmra.mxu0 %vm962_vm9, %v2603_v17  ;;  %v1318_v14 = vmax.f32 %v1316_v53, %v1317_v28  ;;  %v1315_v2 = vmax.f32 %v1313_v4, %v1314_v13 }
 0x5e9   :  { %v1285_v49 = vpop.xlane.xlu2 %1284  ;;  %v1319_v17 = vrot.slane %v1318_v14, 2 }
 0x5ea   :  { %v5192_v5 = vadd.f32 %v5168_v32, %v1285_v49 }
 0x5eb   :  { %v1320_v10 = vmax.f32 %v1318_v14, %v1319_v17 }
 0x5ec   :  { %v1337_v18 = vsel %vm1301_vm10, %v5192_v5, -inf }
 0x5ed   :  { %v1338_v35 = vrot.slane %v1337_v18, 4  ;;  %v1321_v21 = vrot.slane %v1320_v10, 1 }
 0x5ef   :  { %v1322_v19 = vmax.f32 %v1320_v10, %v1321_v21 }
 0x5f8   :  { %v5150_v1 = vpop.f32.mrf.mxu0 }
 0x5f9   :  { %v2789_v29 = vmul.f32 %v4952_v23, %v5150_v1 }
 0x5fb   :  { %v2799_v43 = vsel %vm98_vm0, %v2789_v29, 0.0  ;;  %v1333_v29 = vrot.slane %v1332_v54, 2 }
 0x5fc   :  { %v5154_v0 = vpop.f32.mrf.mxu1  ;;  %2800 = vadd.xlane.f32.xlu1 %v2799_v43  ;;  %v1328_v43 = vrot.slane %v1327_v38, 1 }
 0x5fd   :  { %v2790_v25 = vmul.f32 %v4952_v23, %v5154_v0  ;;  %v1334_v16 = vmax.f32 %v1332_v54, %v1333_v29 }
 0x5fe   :  { %v1329_v42 = vmax.f32 %v1327_v38, %v1328_v43 }
 0x5ff   :  { %v2802_v33 = vsel %vm98_vm0, %v2790_v25, 0.0  ;;  %v1359_v25 = vsub.f32 %v1294_v60, %v1315_v2  ;;  %v1335_v45 = vrot.slane %v1334_v16, 1 }
 0x600   :  { %2803 = vadd.xlane.f32.xlu0 %v2802_v33  ;;  %v1347_v33 = vrot.slane %v1346_v26, 2  ;;  %v1361_v7 = vsub.f32 %v1296_v46, %v1329_v42 }
 0x601   :  { %v5160_v58 = vpop.f32.mrf.mxu0  ;;  %v1368_v34 = vmul.f32 1.442695, %v1359_v25  ;;  %v1336_v59 = vmax.f32 %v1334_v16, %v1335_v45 }
 0x602   :  { %v2791_v55 = vmul.f32 %v4952_v23, %v5160_v58  ;;  %v1348_v44 = vmax.f32 %v1346_v26, %v1347_v33  ;;  %v1372_v53 = vmul.f32 1.442695, %v1361_v7 }
 0x603   :  { %3382 = vpow2.f32 %v1368_v34  ;;  %v1362_v63 = vsub.f32 %v5180_v12, %v1336_v59 }
 0x604   :  { %v2805_v20 = vsel %vm98_vm0, %v2791_v55, 0.0  ;;  %v1339_v55 = vmax.f32 %v1337_v18, %v1338_v35  ;;  %v1349_v48 = vrot.slane %v1348_v44, 1 }
 0x605   :  { %2806 = vadd.xlane.f32.xlu2 %v2805_v20  ;;  %v1308_v20 = vmax.f32 %v1306_v31, %v1307_v57  ;;  %v1374_v13 = vmul.f32 1.442695, %v1362_v63 }
 0x606   :  { %v1340_v41 = vrot.slane %v1339_v55, 2  ;;  %v1350_v6 = vmax.f32 %v1348_v44, %v1349_v48 }
 0x607   :  { %v1358_v11 = vsub.f32 %v1293_v22, %v1308_v20  ;;  %v1360_v22 = vsub.f32 %v5177_v47, %v1322_v19 }
 0x608   :  { %v1341_v37 = vmax.f32 %v1339_v55, %v1340_v41  ;;  %v1364_v3 = vsub.f32 %v5183_v27, %v1350_v6 }
 0x609   :  { %v1366_v50 = vmul.f32 1.442695, %v1358_v11  ;;  %v5202_v46 = vpop.eup %3382  ;;  %v1370_v15 = vmul.f32 1.442695, %v1360_v22 }
 0x60a   :  { %v1342_v36 = vrot.slane %v1341_v37, 1  ;;  %v1389_v8 = vsel %vm1301_vm10, %v5202_v46, 0.0  ;;  %v1378_v47 = vmul.f32 1.442695, %v1364_v3 }
 0x60b   :  { %3384 = vpow2.f32 %v1366_v50  ;;  %v1390_v31 = vrot.slane %v1389_v8, 4 }
 0x60c   :  { %3386 = vpow2.f32 %v1372_v53  ;;  %v1343_v28 = vmax.f32 %v1341_v37, %v1342_v36 }
 0x60d   :  { %3388 = vpow2.f32 %v1370_v15  ;;  %v1391_v54 = vadd.f32 %v1390_v31, %v1389_v8 }
 0x60e   :  { %v1363_v14 = vsub.f32 %v5192_v5, %v1343_v28  ;;  %3390 = vpow2.f32 %v1374_v13  ;;  %v1267_v28 = vmul.f32 %v4952_v23, %v4669_v62 }
 0x60f   :  { %3392 = vpow2.f32 %v1378_v47  ;;  %v1392_v5 = vrot.slane %v1391_v54, 2 }
 0x610   :  { %v1376_v38 = vmul.f32 1.442695, %v1363_v14 }
 0x611   :  { %v5208_v9 = vpop.eup %3384  ;;  %v1393_v55 = vadd.f32 %v1392_v5, %v1391_v54 }
 0x612   :  { %v5211_v18 = vpop.eup %3386  ;;  %v1382_v12 = vsel %vm1301_vm10, %v5208_v9, 0.0  ;;  %3394 = vpow2.f32 %v1376_v38 }
 0x613   :  { %v1403_v27 = vsel %vm1301_vm10, %v5211_v18, 0.0  ;;  %v1383_v2 = vrot.slane %v1382_v12, 4  ;;  %v5217_v26 = vpop.eup %3388  ;;  %v1394_v45 = vrot.slane %v1393_v55, 1 }
 0x614   :  { %v1404_v35 = vrot.slane %v1403_v27, 4  ;;  %v5219_v57 = vpop.eup %3390  ;;  %v1396_v43 = vsel %vm1301_vm10, %v5217_v26, 0.0 }
 0x615   :  { %v1384_v17 = vadd.f32 %v1383_v2, %v1382_v12  ;;  %v5221_v29 = vpop.eup %3392  ;;  %v1410_v33 = vsel %vm1301_vm10, %v5219_v57, 0.0  ;;  %v1397_v16 = vrot.slane %v1396_v43, 4  ;;  %v1395_v22 = vadd.f32 %v1394_v45, %v1393_v55 }
 0x616   :  { %v1405_v25 = vadd.f32 %v1404_v35, %v1403_v27  ;;  %v1424_v10 = vsel %vm1301_vm10, %v5221_v29, 0.0  ;;  %v1411_v34 = vrot.slane %v1410_v33, 4  ;;  %v1289_v2 = vsel %vm98_vm0, %v1267_v28, 0.0 }
 0x617   :  { %v1385_v20 = vrot.slane %v1384_v17, 2  ;;  %v1425_v11 = vrot.slane %v1424_v10, 4  ;;  %v1398_v7 = vadd.f32 %v1397_v16, %v1396_v43  ;;  %3396 = vrcp.f32 %v1395_v22 }
 0x618   :  { %v5229_v42 = vpop.eup %3394  ;;  %v1406_v44 = vrot.slane %v1405_v25, 2  ;;  %v1412_v50 = vadd.f32 %v1411_v34, %v1410_v33 }
 0x619   :  { %v1417_v48 = vsel %vm1301_vm10, %v5229_v42, 0.0  ;;  %v1386_v37 = vadd.f32 %v1385_v20, %v1384_v17 }
 0x61a   :  { %v1407_v53 = vadd.f32 %v1406_v44, %v1405_v25  ;;  %v1418_v6 = vrot.slane %v1417_v48, 4  ;;  %v1413_v3 = vrot.slane %v1412_v50, 2 }
 0x61b   :  { %v1387_v63 = vrot.slane %v1386_v37, 1 }
 0x61c   :  { %v1408_v13 = vrot.slane %v1407_v53, 1  ;;  %v1419_v47 = vadd.f32 %v1418_v6, %v1417_v48  ;;  %v1414_v35 = vadd.f32 %v1413_v3, %v1412_v50 }
 0x61d   :  { %v1388_v54 = vadd.f32 %v1387_v63, %v1386_v37 }
 0x61e   :  { %v1409_v43 = vadd.f32 %v1408_v13, %v1407_v53  ;;  %v1420_v25 = vrot.slane %v1419_v47, 2  ;;  %v1415_v16 = vrot.slane %v1414_v35, 1 }
 0x61f   :  { %3398 = vrcp.f32 %v1388_v54 }
 0x620   :  { %3400 = vrcp.f32 %v1409_v43  ;;  %v1416_v50 = vadd.f32 %v1415_v16, %v1414_v35 }
 0x63c   :  { %v5196_v60 = vpop.f32.mrf.mxu1 }
 0x63d   :  { %v2792_v49 = vmul.f32 %v4952_v23, %v5196_v60 }
 0x63f   :  { %v2808_v4 = vsel %vm98_vm0, %v2792_v49, 0.0  ;;  %v1426_v49 = vadd.f32 %v1425_v11, %v1424_v10  ;;  %v3397_v10 = vpop.eup %3396  ;;  %v1421_v11 = vadd.f32 %v1420_v25, %v1419_v47 }
 0x640   :  { %2809 = vadd.xlane.f32.xlu1 %v2808_v4  ;;  %v1399_v4 = vrot.slane %v1398_v7, 2 }
 0x641   :  { %v1427_v31 = vrot.slane %v1426_v49, 2  ;;  %v1422_v6 = vrot.slane %v1421_v11, 1 }
 0x642   :  { %v1400_v38 = vadd.f32 %v1399_v4, %v1398_v7  ;;  %v1447_v7 = vmul.f32 %v3397_v10, %v1395_v22 }
 0x643   :  { %v1428_v33 = vadd.f32 %v1427_v31, %v1426_v49 }
 0x644   :  { %v1401_v20 = vrot.slane %v1400_v38, 1  ;;  %v1455_v3 = vsub.f32 2.0, %v1447_v7 }
 0x645   :  { %v1429_v44 = vrot.slane %v1428_v33, 1 }
 0x646   :  { %v1402_v48 = vadd.f32 %v1401_v20, %v1400_v38 }
 0x647   :  { %v1430_v49 = vadd.f32 %v1429_v44, %v1428_v33 }
 0x648   :  { %3402 = vrcp.f32 %v1402_v48 }
 0x649   :  { %3404 = vrcp.f32 %v1416_v50 }
 0x655   :  { %v5231_v41 = vpop.f32.mrf.mxu0 }
 0x656   :  { %v2793_v21 = vmul.f32 %v4952_v23, %v5231_v41 }
 0x657   :  { %v2798_v59 = vpop.xlane.xlu0 %2797 }
 0x658   :  { %v2811_v19 = vsel %vm98_vm0, %v2793_v21, 0.0  ;;  %v2820_v36 = vadd.f32 %v5168_v32, %v2798_v59 }
 0x659   :  { %2812 = vadd.xlane.f32.xlu0 %v2811_v19  ;;  %v3399_v19 = vpop.eup %3398 }
 0x65a   :  { %v2828_v8 = vsel %vm1301_vm10, %v2820_v36, -inf  ;;  %v3401_v4 = vpop.eup %3400  ;;  %v1446_v28 = vmul.f32 %v3399_v19, %v1388_v54 }
 0x65b   :  { %v2829_v15 = vrot.slane %v2828_v8, 4  ;;  %v1449_v22 = vmul.f32 %v3401_v4, %v1409_v43  ;;  %v3403_v13 = vpop.eup %3402 }
 0x65c   :  { %v3405_v31 = vpop.eup %3404  ;;  %v1448_v35 = vmul.f32 %v3403_v13, %v1402_v48 }
 0x65d   :  { %v2830_v27 = vmax.f32 %v2828_v8, %v2829_v15  ;;  %v1423_v8 = vadd.f32 %v1422_v6, %v1421_v11  ;;  %v1463_v15 = vmul.f32 %v3397_v10, %v1455_v3  ;;  %v1450_v33 = vmul.f32 %v3405_v31, %v1416_v50 }
 0x65e   :  { %v5242_v14 = vpop.f32.mrf.mxu1  ;;  %v1456_v11 = vsub.f32 2.0, %v1448_v35 }
 0x65f   :  { %v2794_v12 = vmul.f32 %v4952_v23, %v5242_v14  ;;  %v2831_v17 = vrot.slane %v2830_v27, 2 }
 0x660   :  { %v1464_v3 = vmul.f32 %v3403_v13, %v1456_v11 }
 0x661   :  { %1290 = vadd.xlane.f32.xlu0 %v1289_v2  ;;  %v2814_v5 = vsel %vm98_vm0, %v2794_v12, 0.0  ;;  %v2832_v55 = vmax.f32 %v2830_v27, %v2831_v17  ;;  %v1471_v12 = vmul.f32 %v5202_v46, %v1463_v15 }
 0x662   :  { %2815 = vadd.xlane.f32.xlu2 %v2814_v5  ;;  %v1472_v35 = vmul.f32 %v5217_v26, %v1464_v3 }
 0x663   :  { %v2833_v34 = vrot.slane %v2832_v55, 1 }
 0x664   :  { %v5248_v45 = vpop.f32.mrf.mxu0 }
 0x665   :  { %v2834_v21 = vmax.f32 %v2832_v55, %v2833_v34  ;;  %v2795_v37 = vmul.f32 %v4952_v23, %v5248_v45  ;;  %v1454_v23 = vsub.f32 2.0, %v1446_v28 }
 0x667   :  { %v2884_v59 = vsub.f32 %v2820_v36, %v2834_v21  ;;  %v2817_v53 = vsel %vm98_vm0, %v2795_v37, 0.0  ;;  %v1457_v36 = vsub.f32 2.0, %v1449_v22  ;;  %v1462_v2 = vmul.f32 %v3399_v19, %v1454_v23 }
 0x668   :  { %2818 = vadd.xlane.f32.xlu1 %v2817_v53  ;;  %v1458_v19 = vsub.f32 2.0, %v1450_v33 }
 0x669   :  { %v2892_v63 = vmul.f32 1.442695, %v2884_v59  ;;  %v1465_v25 = vmul.f32 %v3401_v4, %v1457_v36  ;;  %v1470_v44 = vmul.f32 %v5208_v9, %v1462_v2 }
 0x66a   :  { %v1466_v23 = vmul.f32 %v3405_v31, %v1458_v19 }
 0x66b   :  { %3406 = vpow2.f32 %v2892_v63  ;;  %v1473_v50 = vmul.f32 %v5211_v18, %v1465_v25 }
 0x66c   :  { %3408 = vrcp.f32 %v1430_v49  ;;  %v1474_v25 = vmul.f32 %v5219_v57, %v1466_v23 }
 0x66d   :  { %3410 = vrcp.f32 %v1423_v8 }
 0x66f   :  { %v2801_v54 = vpop.xlane.xlu1 %2800 }
 0x670   :  { %v2821_v17 = vadd.f32 %v5168_v32, %v2801_v54 }
 0x671   :  { %v5253_v47 = vpop.eup %3406 }
 0x672   :  { %v3409_v27 = vpop.eup %3408  ;;  %v2908_v38 = vsel %vm1301_vm10, %v5253_v47, 0.0  ;;  %v2835_v20 = vsel %vm1301_vm10, %v2821_v17, -inf }
 0x673   :  { %v2909_v5 = vrot.slane %v2908_v38, 4  ;;  %v2804_v43 = vpop.xlane.xlu0 %2803  ;;  %v1452_v46 = vmul.f32 %v3409_v27, %v1430_v49  ;;  %v3411_v16 = vpop.eup %3410  ;;  %v2836_v34 = vrot.slane %v2835_v20, 4 }
 0x674   :  { %v2822_v10 = vadd.f32 %v5168_v32, %v2804_v43  ;;  %v1451_v53 = vmul.f32 %v3411_v16, %v1423_v8 }
 0x675   :  { %1485 = vperm.xlu0 %3240, %v1471_v12   ;;  %v2910_v55 = vadd.f32 %v2909_v5, %v2908_v38  ;;  %v2837_v48 = vmax.f32 %v2835_v20, %v2836_v34  ;;  %v1460_v59 = vsub.f32 2.0, %v1452_v46 }
 0x676   :  { %v2842_v7 = vsel %vm1301_vm10, %v2822_v10, -inf  ;;  %v1459_v38 = vsub.f32 2.0, %v1451_v53 }
 0x677   :  { %v2911_v21 = vrot.slane %v2910_v55, 2  ;;  %v2843_v37 = vrot.slane %v2842_v7, 4  ;;  %v2838_v4 = vrot.slane %v2837_v48, 2  ;;  %v1468_v12 = vmul.f32 %v3409_v27, %v1460_v59 }
 0x678   :  { %v2807_v49 = vpop.xlane.xlu2 %2806  ;;  %v1467_v31 = vmul.f32 %v3411_v16, %v1459_v38 }
 0x679   :  { %v2912_v6 = vadd.f32 %v2911_v21, %v2910_v55  ;;  %v2844_v63 = vmax.f32 %v2842_v7, %v2843_v37  ;;  %v2823_v28 = vadd.f32 %v5168_v32, %v2807_v49  ;;  %v2839_v22 = vmax.f32 %v2837_v48, %v2838_v4 }
 0x67a   :  { %1480 = vperm.xlu2 %3242, %v1470_v44   ;;  %v1476_v33 = vmul.f32 %v5221_v29, %v1468_v12  ;;  %v1475_v26 = vmul.f32 %v5229_v42, %v1467_v31 }
 0x67b   :  { %v2913_v9 = vrot.slane %v2912_v6, 1  ;;  %v2845_v15 = vrot.slane %v2844_v63, 2  ;;  %v2849_v36 = vsel %vm1301_vm10, %v2823_v28, -inf  ;;  %v2840_v18 = vrot.slane %v2839_v22, 1 }
 0x67c   :  { %v2850_v8 = vrot.slane %v2849_v36, 4 }
 0x67d   :  { %1495 = vperm.xlu0 %3240, %v1473_v50   ;;  %v2914_v54 = vadd.f32 %v2913_v9, %v2912_v6  ;;  %v2846_v2 = vmax.f32 %v2844_v63, %v2845_v15  ;;  %v2841_v5 = vmax.f32 %v2839_v22, %v2840_v18 }
 0x67e   :  { %v2851_v43 = vmax.f32 %v2849_v36, %v2850_v8 }
 0x67f   :  { %3412 = vrcp.f32 %v2914_v54  ;;  %v2847_v13 = vrot.slane %v2846_v2, 1  ;;  %v2885_v55 = vsub.f32 %v2821_v17, %v2841_v5 }
 0x680   :  { %v2852_v27 = vrot.slane %v2851_v43, 2 }
 0x681   :  { %v2848_v20 = vmax.f32 %v2846_v2, %v2847_v13  ;;  %1500 = vperm.xlu1 %3241, %v1474_v25   ;;  %v2894_v46 = vmul.f32 1.442695, %v2885_v55 }
 0x682   :  { %1490 = vperm.xlu2 %3242, %v1472_v35   ;;  %v2853_v44 = vmax.f32 %v2851_v43, %v2852_v27 }
 0x683   :  { %v2886_v34 = vsub.f32 %v2822_v10, %v2848_v20  ;;  %3414 = vpow2.f32 %v2894_v46 }
 0x684   :  { %v2854_v7 = vrot.slane %v2853_v44, 1 }
 0x685   :  { %1510 = vperm.xlu0 %3240, %v1476_v33   ;;  %v3413_v11 = vpop.eup %3412  ;;  %v2896_v21 = vmul.f32 1.442695, %v2886_v34 }
 0x686   :  { %v2972_v48 = vmul.f32 %v3413_v11, %v2914_v54  ;;  %v2855_v57 = vmax.f32 %v2853_v44, %v2854_v7 }
 0x687   :  { %3416 = vpow2.f32 %v2896_v21 }
 0x688   :  { %v2980_v29 = vsub.f32 2.0, %v2972_v48  ;;  %v2887_v16 = vsub.f32 %v2823_v28, %v2855_v57 }
 0x689   :  { %v3415_v37 = vpop.eup %3414 }
 0x68a   :  { %1505 = vperm.xlu2 %3242, %v1475_v26   ;;  %v2988_v17 = vmul.f32 %v3413_v11, %v2980_v29  ;;  %v2898_v19 = vmul.f32 1.442695, %v2887_v16  ;;  %v2915_v10 = vsel %vm1301_vm10, %v3415_v37, 0.0 }
 0x68b   :  { %v2916_v53 = vrot.slane %v2915_v10, 4 }
 0x68c   :  { %v2996_v50 = vmul.f32 %v5253_v47, %v2988_v17  ;;  %3418 = vpow2.f32 %v2898_v19 }
 0x68d   :  { %v3417_v59 = vpop.eup %3416  ;;  %v2917_v6 = vadd.f32 %v2916_v53, %v2915_v10 }
 0x68e   :  { %3006 = vperm.xlu1 %3241, %v2996_v50   ;;  %v2922_v42 = vsel %vm1301_vm10, %v3417_v59, 0.0 }
 0x68f   :  { %v2923_v4 = vrot.slane %v2922_v42, 4  ;;  %v2918_v63 = vrot.slane %v2917_v6, 2 }
 0x691   :  { %v2924_v49 = vadd.f32 %v2923_v4, %v2922_v42  ;;  %v2919_v28 = vadd.f32 %v2918_v63, %v2917_v6 }
 0x692   :  { %v3419_v3 = vpop.eup %3418 }
 0x693   :  { %v2925_v9 = vrot.slane %v2924_v49, 2  ;;  %v2929_v22 = vsel %vm1301_vm10, %v3419_v3, 0.0  ;;  %v2920_v23 = vrot.slane %v2919_v28, 1 }
 0x694   :  { %v2930_v15 = vrot.slane %v2929_v22, 4 }
 0x695   :  { %v2926_v47 = vadd.f32 %v2925_v9, %v2924_v49  ;;  %v2921_v12 = vadd.f32 %v2920_v23, %v2919_v28 }
 0x696   :  { %v2931_v36 = vadd.f32 %v2930_v15, %v2929_v22 }
 0x697   :  { %v2927_v38 = vrot.slane %v2926_v47, 1  ;;  %3420 = vrcp.f32 %v2921_v12 }
 0x698   :  { %v2932_v54 = vrot.slane %v2931_v36, 2 }
 0x699   :  { %v2928_v18 = vadd.f32 %v2927_v38, %v2926_v47 }
 0x69a   :  { %v2933_v2 = vadd.f32 %v2932_v54, %v2931_v36 }
 0x69b   :  { %3422 = vrcp.f32 %v2928_v18 }
 0x69c   :  { %v2934_v8 = vrot.slane %v2933_v2, 1 }
 0x69d   :  { %v3421_v35 = vpop.eup %3420 }
 0x69e   :  { %v2935_v5 = vadd.f32 %v2934_v8, %v2933_v2  ;;  %v2973_v13 = vmul.f32 %v3421_v35, %v2921_v12 }
 0x6a0   :  { %3424 = vrcp.f32 %v2935_v5  ;;  %v2981_v25 = vsub.f32 2.0, %v2973_v13 }
 0x6a1   :  { %v3423_v43 = vpop.eup %3422 }
 0x6a2   :  { %v2974_v33 = vmul.f32 %v3423_v43, %v2928_v18  ;;  %v2989_v31 = vmul.f32 %v3421_v35, %v2981_v25 }
 0x6a4   :  { %v2982_v55 = vsub.f32 2.0, %v2974_v33  ;;  %v2997_v20 = vmul.f32 %v3415_v37, %v2989_v31 }
 0x6a6   :  { %v2990_v27 = vmul.f32 %v3423_v43, %v2982_v55  ;;  %v3425_v46 = vpop.eup %3424  ;;  %3011 = vperm.xlu0 %3240, %v2997_v20  }
 0x6a7   :  { %v2975_v44 = vmul.f32 %v3425_v46, %v2935_v5 }
 0x6a8   :  { %v2998_v34 = vmul.f32 %v3417_v59, %v2990_v27 }
 0x6a9   :  { %v2983_v11 = vsub.f32 2.0, %v2975_v44 }
 0x6aa   :  { %3016 = vperm.xlu1 %3241, %v2998_v34  }
 0x6ab   :  { %v2991_v26 = vmul.f32 %v3425_v46, %v2983_v11 }
 0x6ad   :  { %v2999_v21 = vmul.f32 %v3419_v3, %v2991_v26 }
 0x6af   :  { %3021 = vperm.xlu2 %3242, %v2999_v21  }
 0x6b3   :  { %v2810_v7 = vpop.xlane.xlu1 %2809 }
 0x6b4   :  { %v2824_v48 = vadd.f32 %v5168_v32, %v2810_v7 }
 0x6b6   :  { %v2856_v57 = vsel %vm1301_vm10, %v2824_v48, -inf }
 0x6b7   :  { %v2857_v29 = vrot.slane %v2856_v57, 4 }
 0x6b9   :  { %v2858_v16 = vmax.f32 %v2856_v57, %v2857_v29 }
 0x6bb   :  { %v2859_v17 = vrot.slane %v2858_v16, 2 }
 0x6bd   :  { %v2860_v19 = vmax.f32 %v2858_v16, %v2859_v17 }
 0x6bf   :  { %v2861_v37 = vrot.slane %v2860_v19, 1 }
 0x6c1   :  { %v2862_v50 = vmax.f32 %v2860_v19, %v2861_v37 }
 0x6c3   :  { %v2888_v10 = vsub.f32 %v2824_v48, %v2862_v50 }
 0x6c5   :  { %v2900_v53 = vmul.f32 1.442695, %v2888_v10 }
 0x6c7   :  { %3426 = vpow2.f32 %v2900_v53 }
 0x6cc   :  { %v2813_v59 = vpop.xlane.xlu0 %2812 }
 0x6cd   :  { %v3427_v42 = vpop.eup %3426  ;;  %v2825_v6 = vadd.f32 %v5168_v32, %v2813_v59 }
 0x6ce   :  { %v2936_v4 = vsel %vm1301_vm10, %v3427_v42, 0.0 }
 0x6cf   :  { %v2937_v63 = vrot.slane %v2936_v4, 4  ;;  %v2863_v49 = vsel %vm1301_vm10, %v2825_v6, -inf }
 0x6d0   :  { %v2864_v3 = vrot.slane %v2863_v49, 4 }
 0x6d1   :  { %v2938_v9 = vadd.f32 %v2937_v63, %v2936_v4 }
 0x6d2   :  { %v2865_v28 = vmax.f32 %v2863_v49, %v2864_v3 }
 0x6d3   :  { %v2939_v22 = vrot.slane %v2938_v9, 2 }
 0x6d4   :  { %v2866_v15 = vrot.slane %v2865_v28, 2  ;;  %v1291_v23 = vpop.xlane.xlu0 %1290 }
 0x6d5   :  { %v2816_v47 = vpop.xlane.xlu2 %2815  ;;  %v1300_v36 = vadd.f32 %v5168_v32, %v1291_v23  ;;  %v2940_v12 = vadd.f32 %v2939_v22, %v2938_v9 }
 0x6d6   :  { %v2867_v38 = vmax.f32 %v2865_v28, %v2866_v15  ;;  %v2826_v54 = vadd.f32 %v5168_v32, %v2816_v47 }
 0x6d7   :  { %v1351_v18 = vsel %vm1301_vm10, %v1300_v36, -inf  ;;  %v2941_v2 = vrot.slane %v2940_v12, 1 }
 0x6d8   :  { %v2868_v8 = vrot.slane %v2867_v38, 1  ;;  %v2870_v35 = vsel %vm1301_vm10, %v2826_v54, -inf  ;;  %v1352_v5 = vrot.slane %v1351_v18, 4 }
 0x6d9   :  { %v2871_v13 = vrot.slane %v2870_v35, 4  ;;  %v2942_v43 = vadd.f32 %v2941_v2, %v2940_v12 }
 0x6da   :  { %v2869_v25 = vmax.f32 %v2867_v38, %v2868_v8  ;;  %v1353_v33 = vmax.f32 %v1351_v18, %v1352_v5 }
 0x6db   :  { %v2872_v31 = vmax.f32 %v2870_v35, %v2871_v13  ;;  %3428 = vrcp.f32 %v2942_v43  ;;  %v2819_v44 = vpop.xlane.xlu1 %2818 }
 0x6dc   :  { %v2889_v55 = vsub.f32 %v2825_v6, %v2869_v25  ;;  %v1354_v20 = vrot.slane %v1353_v33, 2  ;;  %v2827_v26 = vadd.f32 %v5168_v32, %v2819_v44 }
 0x6dd   :  { %v2873_v27 = vrot.slane %v2872_v31, 2 }
 0x6de   :  { %v2902_v46 = vmul.f32 1.442695, %v2889_v55  ;;  %v1355_v34 = vmax.f32 %v1353_v33, %v1354_v20  ;;  %v2877_v57 = vsel %vm1301_vm10, %v2827_v26, -inf }
 0x6df   :  { %v2874_v11 = vmax.f32 %v2872_v31, %v2873_v27  ;;  %v2878_v16 = vrot.slane %v2877_v57, 4 }
 0x6e0   :  { %3430 = vpow2.f32 %v2902_v46  ;;  %v1356_v21 = vrot.slane %v1355_v34, 1 }
 0x6e1   :  { %v3429_v7 = vpop.eup %3428  ;;  %v2875_v48 = vrot.slane %v2874_v11, 1  ;;  %v2879_v50 = vmax.f32 %v2877_v57, %v2878_v16 }
 0x6e2   :  { %v1357_v29 = vmax.f32 %v1355_v34, %v1356_v21  ;;  %v2976_v17 = vmul.f32 %v3429_v7, %v2942_v43 }
 0x6e3   :  { %v2876_v19 = vmax.f32 %v2874_v11, %v2875_v48  ;;  %v2880_v4 = vrot.slane %v2879_v50, 2 }
 0x6e4   :  { %v1365_v37 = vsub.f32 %v1300_v36, %v1357_v29  ;;  %v2984_v10 = vsub.f32 2.0, %v2976_v17 }
 0x6e5   :  { %v2890_v53 = vsub.f32 %v2826_v54, %v2876_v19  ;;  %v2881_v9 = vmax.f32 %v2879_v50, %v2880_v4 }
 0x6e6   :  { %v3431_v59 = vpop.eup %3430  ;;  %v1380_v6 = vmul.f32 1.442695, %v1365_v37  ;;  %v2992_v63 = vmul.f32 %v3429_v7, %v2984_v10 }
 0x6e7   :  { %v2943_v32 = vsel %vm1301_vm10, %v3431_v59, 0.0  ;;  %v2904_v49 = vmul.f32 1.442695, %v2890_v53  ;;  %v2882_v22 = vrot.slane %v2881_v9, 1 }
 0x6e8   :  { %v2944_v3 = vrot.slane %v2943_v32, 4  ;;  %3432 = vpow2.f32 %v1380_v6  ;;  %v3000_v15 = vmul.f32 %v3427_v42, %v2992_v63 }
 0x6e9   :  { %3434 = vpow2.f32 %v2904_v49  ;;  %v2883_v47 = vmax.f32 %v2881_v9, %v2882_v22 }
 0x6ea   :  { %v2945_v28 = vadd.f32 %v2944_v3, %v2943_v32  ;;  %3026 = vperm.xlu0 %3240, %v3000_v15  }
 0x6eb   :  { %v2891_v12 = vsub.f32 %v2827_v26, %v2883_v47 }
 0x6ec   :  { %v2946_v23 = vrot.slane %v2945_v28, 2 }
 0x6ed   :  { %v2906_v35 = vmul.f32 1.442695, %v2891_v12 }
 0x6ee   :  { %v3433_v36 = vpop.eup %3432  ;;  %v2947_v18 = vadd.f32 %v2946_v23, %v2945_v28 }
 0x6ef   :  { %v3435_v38 = vpop.eup %3434  ;;  %v1431_v54 = vsel %vm1301_vm10, %v3433_v36, 0.0  ;;  %3436 = vpow2.f32 %v2906_v35 }
 0x6f0   :  { %v2950_v2 = vsel %vm1301_vm10, %v3435_v38, 0.0  ;;  %v1432_v8 = vrot.slane %v1431_v54, 4  ;;  %v2948_v25 = vrot.slane %v2947_v18, 1 }
 0x6f1   :  { %v2951_v5 = vrot.slane %v2950_v2, 4 }
 0x6f2   :  { %v1433_v13 = vadd.f32 %v1432_v8, %v1431_v54  ;;  %v2949_v31 = vadd.f32 %v2948_v25, %v2947_v18  ;;  %v1486_v18 = vpop.permute.xlu0 %1485 }
 0x6f3   :  { %v2952_v43 = vadd.f32 %v2951_v5, %v2950_v2  ;;  %v1481_v2 = vpop.permute.xlu2 %1480 }
 0x6f4   :  { %v1434_v33 = vrot.slane %v1433_v13, 2  ;;  %3438 = vrcp.f32 %v2949_v31 }
 0x6f5   :  { %v2953_v42 = vrot.slane %v2952_v43, 2  ;;  %v3437_v27 = vpop.eup %3436 }
 0x6f6   :  { %v1435_v55 = vadd.f32 %v1434_v33, %v1433_v13  ;;  %v2957_v34 = vsel %vm1301_vm10, %v3437_v27, 0.0 }
 0x6f7   :  { %v2954_v20 = vadd.f32 %v2953_v42, %v2952_v43  ;;  %v2958_v11 = vrot.slane %v2957_v34, 4 }
 0x6f8   :  { %v1436_v46 = vrot.slane %v1435_v55, 1 }
 0x6f9   :  { %v2955_v44 = vrot.slane %v2954_v20, 1  ;;  %v2959_v7 = vadd.f32 %v2958_v11, %v2957_v34 }
 0x6fa   :  { %v1437_v21 = vadd.f32 %v1436_v46, %v1435_v55  ;;  %v3439_v48 = vpop.eup %3438  ;;  %v1496_v8 = vpop.permute.xlu0 %1495  ;;  %v1518_v46 = vmul.f32 %v1481_v2, %v4485_v51 }
 0x6fb   :  { %v2956_v26 = vadd.f32 %v2955_v44, %v2954_v20  ;;  %v2960_v57 = vrot.slane %v2959_v7, 2  ;;  %v2977_v29 = vmul.f32 %v3439_v48, %v2949_v31  ;;  %v1491_v35 = vpop.permute.xlu2 %1490  ;;  %v1519_v31 = vmul.f32 %v1486_v18, %v4489_v61 }
 0x6fc   :  { %v1520_v42 = vmul.f32 %v1491_v35, %v4493_v40 }
 0x6fd   :  { %3440 = vrcp.f32 %v2956_v26  ;;  %v2985_v16 = vsub.f32 2.0, %v2977_v29  ;;  %v2961_v17 = vadd.f32 %v2960_v57, %v2959_v7  ;;  %v1533_v40 = vsel %vm98_vm0, %v1519_v31, 0.0 }
 0x6fe   :  { %3442 = vrcp.f32 %v1437_v21 }
 0x6ff   :  { %v2993_v19 = vmul.f32 %v3439_v48, %v2985_v16  ;;  %v2962_v37 = vrot.slane %v2961_v17, 1  ;;  %v1521_v16 = vmul.f32 %v1496_v8, %v4497_v52 }
 0x701   :  { %v3001_v10 = vmul.f32 %v3431_v59, %v2993_v19  ;;  %v2963_v6 = vadd.f32 %v2962_v37, %v2961_v17  ;;  %v65_v59 = vld [vmem:[%s5342_s1 + $0x110] sm:$0xff] }
 0x702   :  { %3161 = vmatpush.msrb.mxu2 %v65_v59  ;;  %v1511_v5 = vpop.permute.xlu0 %1510 }
 0x703   :  { %v3441_v50 = vpop.eup %3440  ;;  %3031 = vperm.xlu1 %3241, %v3001_v10   ;;  %3444 = vrcp.f32 %v2963_v6  ;;  %v1506_v43 = vpop.permute.xlu2 %1505 }
 0x704   :  { %v2978_v53 = vmul.f32 %v3441_v50, %v2956_v26  ;;  %v3443_v4 = vpop.eup %3442  ;;  %v1540_v26 = vsel %vm98_vm0, %v1520_v42, 0.0  ;;  %v1523_v61 = vmul.f32 %v1506_v43, %v4564_v56 }
 0x705   :  { %v1453_v32 = vmul.f32 %v3443_v4, %v1437_v21  ;;  %v1526_v21 = vsel %vm98_vm0, %v1518_v46, 0.0  ;;  %v1541_v48 = vrot.slane %v1540_v26, 4 }
 0x706   :  { %v2986_v63 = vsub.f32 2.0, %v2978_v53  ;;  %v1561_v29 = vsel %vm98_vm0, %v1523_v61, 0.0  ;;  %v1527_v19 = vrot.slane %v1526_v21, 4 }
 0x707   :  { %v1461_v3 = vsub.f32 2.0, %v1453_v32 }
 0x708   :  { %v2994_v49 = vmul.f32 %v3441_v50, %v2986_v63  ;;  %v1547_v63 = vsel %vm98_vm0, %v1521_v16, 0.0 }
 0x709   :  { %v1469_v28 = vmul.f32 %v3443_v4, %v1461_v3  ;;  %v3445_v22 = vpop.eup %3444  ;;  %v1562_v4 = vrot.slane %v1561_v29, 4 }
 0x70a   :  { %v3002_v9 = vmul.f32 %v3435_v38, %v2994_v49  ;;  %v2979_v23 = vmul.f32 %v3445_v22, %v2963_v6  ;;  %v1501_v38 = vpop.permute.xlu1 %1500 }
 0x70b   :  { %v1477_v15 = vmul.f32 %v3433_v36, %v1469_v28  ;;  %v64_v36 = vld [vmem:[%s5342_s1 + $0x108] sm:$0xff]  ;;  %v3022_v55 = vpop.permute.xlu2 %3021  ;;  %v1522_v56 = vmul.f32 %v1501_v38, %v4513_v39  ;;  %v1528_v39 = vadd.f32 %v1527_v19, %v1526_v21  ;;  %v1524_v28 = vmul.f32 %v1511_v5, %v4627_v30 }
 0x70c   :  { %3036 = vperm.xlu2 %3242, %v3002_v9   ;;  %v2987_v47 = vsub.f32 2.0, %v2979_v23  ;;  %3162 = vmatpush.msrb.mxu2 %v64_v36  ;;  %v3047_v57 = vmul.f32 %v3022_v55, %v5160_v58  ;;  %v1563_v18 = vadd.f32 %v1562_v4, %v1561_v29 }
 0x70d   :  { %1515 = vperm.xlu1 %3241, %v1477_v15   ;;  %v1554_v32 = vsel %vm98_vm0, %v1522_v56, 0.0  ;;  %v1529_v38 = vrot.slane %v1528_v39, 2  ;;  %v1568_v5 = vsel %vm98_vm0, %v1524_v28, 0.0 }
 0x70e   :  { %v2995_v12 = vmul.f32 %v3445_v22, %v2987_v47  ;;  %v3073_v58 = vsel %vm98_vm0, %v3047_v57, 0.0 }
 0x70f   :  { %v3074_v22 = vrot.slane %v3073_v58, 4 }
 0x710   :  { %v3003_v54 = vmul.f32 %v3437_v27, %v2995_v12  ;;  %v63_v27 = vld [vmem:[%s5342_s1 + $0x100] sm:$0xff]  ;;  %v1548_v12 = vrot.slane %v1547_v63, 4 }
 0x711   :  { %3163 = vmatpush.msrb.mxu2 %v63_v27  ;;  %v1564_v27 = vrot.slane %v1563_v18, 2 }
 0x712   :  { %3041 = vperm.xlu0 %3240, %v3003_v54   ;;  %v3007_v13 = vpop.permute.xlu1 %3006  ;;  %v1555_v54 = vrot.slane %v1554_v32, 4 }
 0x713   :  { %v3044_v44 = vmul.f32 %v3007_v13, %v5143_v24  ;;  %v3075_v13 = vadd.f32 %v3074_v22, %v3073_v58  ;;  %v1565_v56 = vadd.f32 %v1564_v27, %v1563_v18 }
 0x714   :  { %v1556_v42 = vadd.f32 %v1555_v54, %v1554_v32 }
 0x715   :  { %v3052_v24 = vsel %vm98_vm0, %v3044_v44, 0.0  ;;  %v3076_v61 = vrot.slane %v3075_v13, 2  ;;  %v1566_v22 = vrot.slane %v1565_v56, 1 }
 0x716   :  { %v3053_v10 = vrot.slane %v3052_v24, 4 }
 0x718   :  { %v3012_v25 = vpop.permute.xlu0 %3011  ;;  %v3054_v15 = vadd.f32 %v3053_v10, %v3052_v24 }
 0x719   :  { %v3045_v20 = vmul.f32 %v3012_v25, %v5150_v1 }
 0x71a   :  { %v3055_v43 = vrot.slane %v3054_v15, 2 }
 0x71b   :  { %v3059_v1 = vsel %vm98_vm0, %v3045_v20, 0.0 }
 0x71c   :  { %v3017_v33 = vpop.permute.xlu1 %3016  ;;  %v3060_v17 = vrot.slane %v3059_v1, 4 }
 0x71d   :  { %v3046_v34 = vmul.f32 %v3017_v33, %v5154_v0  ;;  %v1534_v0 = vrot.slane %v1533_v40, 4  ;;  %v1549_v33 = vadd.f32 %v1548_v12, %v1547_v63 }
 0x71e   :  { %v3061_v49 = vadd.f32 %v3060_v17, %v3059_v1  ;;  %v3056_v1 = vadd.f32 %v3055_v43, %v3054_v15 }
 0x71f   :  { %v3066_v7 = vsel %vm98_vm0, %v3046_v34, 0.0  ;;  %v1535_v6 = vadd.f32 %v1534_v0, %v1533_v40  ;;  %v1569_v34 = vrot.slane %v1568_v5, 4  ;;  %v1530_v40 = vadd.f32 %v1529_v38, %v1528_v39 }
 0x720   :  { %v3067_v37 = vrot.slane %v3066_v7, 4  ;;  %v3062_v2 = vrot.slane %v3061_v49, 2  ;;  %v1550_v21 = vrot.slane %v1549_v33, 2  ;;  %v3057_v10 = vrot.slane %v3056_v1, 1 }
 0x721   :  { %v1536_v47 = vrot.slane %v1535_v6, 2  ;;  %v1570_v17 = vadd.f32 %v1569_v34, %v1568_v5  ;;  %v1531_v32 = vrot.slane %v1530_v40, 1 }
 0x722   :  { %v3068_v3 = vadd.f32 %v3067_v37, %v3066_v7  ;;  %v3063_v46 = vadd.f32 %v3062_v2, %v3061_v49  ;;  %v1557_v7 = vrot.slane %v1556_v42, 2 }
 0x724   :  { %v3069_v36 = vrot.slane %v3068_v3, 2  ;;  %v3064_v29 = vrot.slane %v3063_v46, 1  ;;  %v1558_v4 = vadd.f32 %v1557_v7, %v1556_v42  ;;  %v1567_v42 = vadd.f32 %v1566_v22, %v1565_v56 }
 0x726   :  { %v3070_v44 = vadd.f32 %v3069_v36, %v3068_v3  ;;  %v3065_v39 = vadd.f32 %v3064_v29, %v3063_v46  ;;  %v1571_v3 = vrot.slane %v1570_v17, 2 }
 0x728   :  { %v3071_v19 = vrot.slane %v3070_v44, 1  ;;  %v1572_v38 = vadd.f32 %v1571_v3, %v1570_v17 }
 0x72a   :  { %v1573_v46 = vrot.slane %v1572_v38, 1 }
 0x75c   :  { %v3027_v11 = vpop.permute.xlu0 %3026 }
 0x75d   :  { %v3048_v51 = vmul.f32 %v3027_v11, %v5196_v60  ;;  %v1542_v60 = vadd.f32 %v1541_v48, %v1540_v26 }
 0x75f   :  { %v3080_v53 = vsel %vm98_vm0, %v3048_v51, 0.0  ;;  %v1543_v23 = vrot.slane %v1542_v60, 2 }
 0x760   :  { %v3081_v9 = vrot.slane %v3080_v53, 4 }
 0x761   :  { %v1544_v20 = vadd.f32 %v1543_v23, %v1542_v60  ;;  %v3058_v23 = vadd.f32 %v3057_v10, %v3056_v1 }
 0x762   :  { %v3082_v30 = vadd.f32 %v3081_v9, %v3080_v53  ;;  %v3072_v9 = vadd.f32 %v3071_v19, %v3070_v44 }
 0x763   :  { %v1545_v57 = vrot.slane %v1544_v20, 1 }
 0x764   :  { %v3083_v11 = vrot.slane %v3082_v30, 2 }
 0x765   :  { %v1546_v49 = vadd.f32 %v1545_v57, %v1544_v20 }
 0x766   :  { %v3037_v50 = vpop.permute.xlu2 %3036  ;;  %v3084_v37 = vadd.f32 %v3083_v11, %v3082_v30 }
 0x767   :  { %v3050_v52 = vmul.f32 %v3037_v50, %v5242_v14  ;;  %v62_v14 = vld [vmem:[%s5342_s1 + $0xf8] sm:$0xff]  ;;  %v3077_v50 = vadd.f32 %v3076_v61, %v3075_v13  ;;  %v3110_v36 = vadd.f32 %v3072_v9, %v1546_v49 }
 0x768   :  { %3164 = vmatpush.msrb.mxu2 %v62_v14 }
 0x769   :  { %v3094_v8 = vsel %vm98_vm0, %v3050_v52, 0.0  ;;  %v3078_v15 = vrot.slane %v3077_v50, 1  ;;  %v3118_v34 = vmul.f32 0.5, %v3110_v36 }
 0x76a   :  { %v3095_v31 = vrot.slane %v3094_v8, 4 }
 0x76b   :  { %v3079_v13 = vadd.f32 %v3078_v15, %v3077_v50 }
 0x76c   :  { %v3096_v51 = vadd.f32 %v3095_v31, %v3094_v8  ;;  %v1532_v8 = vadd.f32 %v1531_v32, %v1530_v40 }
 0x76e   :  { %v3097_v58 = vrot.slane %v3096_v51, 2  ;;  %v3108_v43 = vadd.f32 %v3058_v23, %v1532_v8 }
 0x770   :  { %v3098_v18 = vadd.f32 %v3097_v58, %v3096_v51 }
 0x772   :  { %v3099_v20 = vrot.slane %v3098_v18, 1 }
 0x774   :  { %v3100_v1 = vadd.f32 %v3099_v20, %v3098_v18 }
 0x775   :  { %v3032_v59 = vpop.permute.xlu1 %3031 }
 0x776   :  { %v3049_v35 = vmul.f32 %v3032_v59, %v5231_v41  ;;  %v1537_v41 = vadd.f32 %v1536_v47, %v1535_v6  ;;  %v1551_v6 = vadd.f32 %v1550_v21, %v1549_v33  ;;  %v1559_v59 = vrot.slane %v1558_v4, 1 }
 0x778   :  { %v3087_v25 = vsel %vm98_vm0, %v3049_v35, 0.0  ;;  %v1538_v24 = vrot.slane %v1537_v41, 1  ;;  %v1552_v54 = vrot.slane %v1551_v6, 1 }
 0x779   :  { %v3088_v55 = vrot.slane %v3087_v25, 4 }
 0x77a   :  { %v1539_v52 = vadd.f32 %v1538_v24, %v1537_v41  ;;  %v1553_v31 = vadd.f32 %v1552_v54, %v1551_v6 }
 0x77b   :  { %v3089_v26 = vadd.f32 %v3088_v55, %v3087_v25  ;;  %v1560_v55 = vadd.f32 %v1559_v59, %v1558_v4 }
 0x77c   :  { %v3109_v35 = vadd.f32 %v3065_v39, %v1539_v52  ;;  %v3111_v11 = vadd.f32 %v3079_v13, %v1553_v31 }
 0x77d   :  { %v3090_v48 = vrot.slane %v3089_v26, 2 }
 0x77e   :  { %v3117_v41 = vmul.f32 0.5, %v3109_v35  ;;  %v3119_v24 = vmul.f32 0.5, %v3111_v11 }
 0x77f   :  { %v1516_v0 = vpop.permute.xlu1 %1515  ;;  %v3091_v53 = vadd.f32 %v3090_v48, %v3089_v26  ;;  %v3116_v26 = vmul.f32 0.5, %v3108_v43  ;;  %v1574_v48 = vadd.f32 %v1573_v46, %v1572_v38 }
 0x780   :  { %v1525_v16 = vmul.f32 %v1516_v0, %v4669_v62  ;;  %v3085_v62 = vrot.slane %v3084_v37, 1 }
 0x781   :  { %v3092_v47 = vrot.slane %v3091_v53, 1  ;;  %v3134_v21 = vsel %vm3133_vm11, %v3117_v41, %v3116_v26  ;;  %v3114_v56 = vadd.f32 %v3100_v1, %v1574_v48 }
 0x782   :  { %v1575_v60 = vsel %vm98_vm0, %v1525_v16, 0.0  ;;  %v3086_v30 = vadd.f32 %v3085_v62, %v3084_v37  ;;  %v3136_v0 = vsel %vm3135_vm14, %v3118_v34, %v3134_v21 }
 0x783   :  { %v1576_v63 = vrot.slane %v1575_v60, 4  ;;  %v3093_v25 = vadd.f32 %v3092_v47, %v3091_v53  ;;  %v3138_v37 = vsel %vm3137_vm15, %v3119_v24, %v3136_v0 }
 0x784   :  { %v3042_v12 = vpop.permute.xlu0 %3041  ;;  %v3112_v44 = vadd.f32 %v3086_v30, %v1560_v55 }
 0x785   :  { %v1577_v28 = vadd.f32 %v1576_v63, %v1575_v60  ;;  %v3051_v2 = vmul.f32 %v3042_v12, %v5248_v45  ;;  %v3113_v40 = vadd.f32 %v3093_v25, %v1567_v42  ;;  %v3122_v60 = vmul.f32 0.5, %v3114_v56  ;;  %v3251_v63 = vld [vmem:[%s5342_s1 + $0x118] ss:$0 sm:$0xff] }
 0x786   :  { %v3120_v57 = vmul.f32 0.5, %v3112_v44 }
 0x787   :  { %v1578_v14 = vrot.slane %v1577_v28, 2  ;;  %v3101_v5 = vsel %vm98_vm0, %v3051_v2, 0.0  ;;  %v3121_v29 = vmul.f32 0.5, %v3113_v40 }
 0x788   :  { %v3102_v33 = vrot.slane %v3101_v5, 4  ;;  %v3140_v50 = vsel %vm3139_vm12, %v3120_v57, %v3138_v37 }
 0x789   :  { %v1579_v27 = vadd.f32 %v1578_v14, %v1577_v28  ;;  %v3142_v53 = vsel %vm3141_vm13, %v3121_v29, %v3140_v50 }
 0x78a   :  { %v3103_v45 = vadd.f32 %v3102_v33, %v3101_v5  ;;  %v3144_v4 = vsel %vm3143_vm1, %v3122_v60, %v3142_v53 }
 0x78b   :  { %v1580_v7 = vrot.slane %v1579_v27, 1 }
 0x78c   :  { %v3104_v61 = vrot.slane %v3103_v45, 2 }
 0x78d   :  { %v1581_v17 = vadd.f32 %v1580_v7, %v1579_v27 }
 0x78e   :  { %v3105_v51 = vadd.f32 %v3104_v61, %v3103_v45 }
 0x790   :  { %v3106_v16 = vrot.slane %v3105_v51, 1 }
 0x792   :  { %v3107_v19 = vadd.f32 %v3106_v16, %v3105_v51 }
 0x794   :  { %v3115_v10 = vadd.f32 %v3107_v19, %v1581_v17 }
 0x796   :  { %v3123_v6 = vmul.f32 0.5, %v3115_v10 }
 0x798   :  { %v3146_v58 = vsel %vm3145_vm2, %v3123_v6, %v3144_v4 }
 0x799   :  { %3236 = vmatmul.msk.f32.vlgmr.msrb.gmra.mxu2 %vm98_vm0, %v3146_v58 }
 0x81c   :  { %v3166_v32 = vpop.f32.mrf.mxu2 }
 0x81d   :  { %v3167_v49 = vadd.f32 %v3251_v63, %v3166_v32 }
 0x81f   :  { %3169 = vst.msk [vmem:[#allocation2] sm:$0xff] %vm962_vm9, %v3167_v49 }
 0x820   :  { %3180 = dma.vmem_to_hbm [thread:$0]  %s3176_s11, 128, %s3178_s14, [#allocation3]  }
 0x821   :  { %3470 = dma.done.wait [#allocation3], 128  }
 0x822   :  { %3471 = vsyncadd [#allocation3], 4294967168 }
 0x823   :  { %3185 = vsyncpa [#allocation3], 1 }

</bundles_post_ra>
